<compile_context>
chip_gen: v6e
topology: v6e:2x2x1
jax: 0.10.0
libtpu: 0.0.40
codegen_flags: <defaults>
</compile_context>

<pallas_src>
import functools

import numpy as np
import jax
import jax.numpy as jnp
from jax.experimental import pallas as pl
from jax.experimental.pallas import tpu as pltpu


# ----------------------------- Pallas kernel --------------------------------
def _hebbian_layer_kernel(B, N, p_ref, w_ref, b_ref, lw_ref, act_ref, lwo_ref):
    # p_ref:  (K, B*N)   im2col patches, K = Cin*9, column = b*N + (h*Wo + w)
    # w_ref:  (C, K)     conv weight flattened (Cout, Cin*3*3)
    # b_ref:  (C, 1)     conv bias
    # lw_ref: (C, N, N)  lateral weights (aliased to lwo_ref)
    # act_ref:(B, C*N)   output: normalized act + centered lateral (lane-dense)
    # lwo_ref:(C, N, N)  output: updated (clipped) lateral weights
    C = w_ref.shape[0]
    hp = jax.lax.Precision.HIGHEST
    inv_n = 1.0 / N                      # exact: spatial sizes are powers of two

    # ---- conv (3x3, stride 2, pad 1): one lane-dense (C,K)@(K,B*N) MXU matmul
    conv = jnp.dot(w_ref[...], p_ref[...], precision=hp,
                   preferred_element_type=jnp.float32)              # (C, B*N)
    conv = jnp.maximum(conv + b_ref[...], 0.0)                      # bias + ReLU

    # ---- per-image (B=2, static): L2 normalize over spatial, accumulate Gram
    acts = []
    gram = jnp.zeros((N, N), jnp.float32)
    for b in range(B):
        a = conv[:, b * N:(b + 1) * N]                              # (C, N)
        ssq = jnp.sum(a * a, axis=1, keepdims=True)                 # (C, 1)
        a = a / (jnp.sqrt(ssq) + 1e-6)                              # exact divide
        acts.append(a)
        # a^T @ a without materializing a transpose (MXU ingests trans_a natively)
        gram = gram + jax.lax.dot_general(
            a, a, (((0,), (0,)), ((), ())),
            precision=hp, preferred_element_type=jnp.float32)       # (N, N)

    # ---- Hebbian delta + in-place (aliased) clip-update of lateral weights ----
    delta = gram * (0.001 / C)
    w_new = jnp.clip(lw_ref[...] + delta[None, :, :], -1.0, 1.0)    # (C, N, N)
    lwo_ref[...] = w_new

    # ---- lateral mix on the VPU (M=B=2 is a hopeless MXU shape) + centering ---
    for b in range(B):
        a = acts[b]                                                 # (C, N)
        lat = jnp.sum(a[:, :, None] * w_new, axis=1)                # (C, N)
        lat = lat - jnp.sum(lat, axis=1, keepdims=True) * inv_n
        out = a + lat                                               # (C, N)
        # lane-dense (B, C*N) output via static per-channel slice stores
        for c in range(C):
            act_ref[b:b + 1, c * N:(c + 1) * N] = out[c:c + 1, :]


def hebbian_layer(patches, w_flat, bias, lat_w, batch, spatial_n):
    K, BN = patches.shape
    C = w_flat.shape[0]
    B, N = batch, spatial_n
    assert BN == B * N and lat_w.shape == (C, N, N)

    flops = 2 * C * K * B * N + 2 * B * C * N * N + 2 * B * C * N * N
    bytes_accessed = 4 * (K * B * N + C * K + C + 2 * C * N * N
                          + B * C * N + C * N * N)
    kernel = functools.partial(_hebbian_layer_kernel, B, N)

    return pl.pallas_call(
        kernel,
        out_shape=(jax.ShapeDtypeStruct((B, C * N), jnp.float32),
                   jax.ShapeDtypeStruct((C, N, N), jnp.float32)),
        grid=(1,),
        in_specs=[
            pl.BlockSpec((K, B * N), lambda i: (0, 0)),
            pl.BlockSpec((C, K), lambda i: (0, 0)),
            pl.BlockSpec((C, 1), lambda i: (0, 0)),
            pl.BlockSpec((C, N, N), lambda i: (0, 0, 0)),
        ],
        out_specs=(
            pl.BlockSpec((B, C * N), lambda i: (0, 0)),
            pl.BlockSpec((C, N, N), lambda i: (0, 0, 0)),
        ),
        input_output_aliases={3: 1},       # lat_w -> updated lat_w (in-place)
        cost_estimate=pl.CostEstimate(flops=flops, transcendentals=B * C,
                                      bytes_accessed=bytes_accessed),
        compiler_params=pltpu.CompilerParams(
            dimension_semantics=("arbitrary",),
            # 32 MiB is ample here; raise toward ~100 MiB on v5e/v6e and keep
            # <=48-56 MiB on v7x only when block sizes grow at production N.
            vmem_limit_bytes=32 * 1024 * 1024),
    )(patches, w_flat, bias.reshape(C, 1), lat_w)


# ------------------------------- JAX glue ------------------------------------
def im2col_nchw(x, k=3, stride=2, pad=1):
    """x: (B,C,H,W) NCHW -> patches (C*k*k, B*Ho*Wo).
    Row index = c*9 + kh*3 + kw (matches Conv2d weight flatten); column index =
    b*(Ho*Wo) + h*Wo + w (matches the kernel's lane-dense (C, B*N) conv layout)."""
    B, C, H, W = x.shape
    xp = jnp.pad(x, ((0, 0), (0, 0), (pad, pad), (pad, pad)))
    Ho = (H + 2 * pad - k) // stride + 1
    Wo = (W + 2 * pad - k) // stride + 1
    taps = [xp[:, :, kh:kh + stride * Ho:stride, kw:kw + stride * Wo:stride]
            for kh in range(k) for kw in range(k)]            # 9 x (B, C, Ho, Wo)
    patches = jnp.stack(taps, axis=2)                         # (B, C, 9, Ho, Wo)
    patches = patches.transpose(1, 2, 0, 3, 4)                # (C, 9, B, Ho, Wo)
    patches = patches.reshape(C * k * k, B * Ho * Wo)
    return patches.astype(jnp.float32), Ho, Wo


def init_params(key, layer_shapes):
    params = []
    for (cin, cout, spatial) in layer_shapes:
        key, k1, k2 = jax.random.split(key, 3)
        fan_in = cin * 9
        bound = 1.0 / np.sqrt(fan_in)
        w_conv = jax.random.uniform(k1, (cout, cin, 3, 3), jnp.float32, -bound, bound)
        b_conv = jax.random.uniform(k2, (cout,), jnp.float32, -bound, bound)
        N = spatial[0] * spatial[1]
        lat_w = jnp.zeros((cout, N, N), jnp.float32)
        params.append((w_conv, b_conv, lat_w))
    return params


def multilayer_hebbian_forward(x, params):
    """Equivalent of MultiLayerHebbian.forward: returns (B, C_last*H_last*W_last)."""
    # TODO(synk): the per-step host-side logging (act energy / delta magnitude /
    # weight norm print) in HebbianEncoder.forward has no in-kernel equivalent.
    B = x.shape[0]
    act_flat = None
    for (w_conv, b_conv, lat_w) in params:
        patches, Ho, Wo = im2col_nchw(x)
        Cout = w_conv.shape[0]
        act_flat, _lat_new = hebbian_layer(patches, w_conv.reshape(Cout, -1),
                                           b_conv, lat_w, B, Ho * Wo)
        # (B, C*Ho*Wo) is already the NCHW row-major flatten -> free reshape.
        x = act_flat.reshape(B, Cout, Ho, Wo)
    return act_flat


# -------------------------- pure-JAX reference --------------------------------
def reference_forward(x, params):
    hp = jax.lax.Precision.HIGHEST
    for (w_conv, b_conv, lat_w) in params:
        act = jax.lax.conv_general_dilated(
            x, w_conv, window_strides=(2, 2), padding=((1, 1), (1, 1)),
            dimension_numbers=('NCHW', 'OIHW', 'NCHW'), precision=hp)
        act = act + b_conv.reshape(1, -1, 1, 1)
        act = jnp.maximum(act, 0.0)
        nrm = jnp.sqrt(jnp.sum(act * act, axis=(2, 3), keepdims=True))
        act = act / (nrm + 1e-6)
        B, C, H, W = act.shape
        flat = act.reshape(B, C, H * W)
        heb = jnp.einsum('bni,bnj->nij', flat, flat, precision=hp)
        delta = 0.001 * jnp.mean(heb, axis=0)
        lw = jnp.clip(lat_w + delta, -1.0, 1.0)
        lateral = jnp.einsum('bci,cij->bcj', flat, lw, precision=hp)
        lateral = lateral.reshape(B, C, H, W)
        lateral = lateral - jnp.mean(lateral, axis=(2, 3), keepdims=True)
        x = act + lateral
    return x.reshape(x.shape[0], -1)


# ---------------------------------- main --------------------------------------
if __name__ == "__main__":
    key = jax.random.PRNGKey(0)
    B, Cin, Hin, Win = 2, 4, 16, 16
    # (in_c, out_c, spatial-after-stride-2-conv)
    layer_shapes = [(4, 8, (8, 8)), (8, 16, (4, 4))]

    key, kx = jax.random.split(key)
    x = jax.random.normal(kx, (B, Cin, Hin, Win), jnp.float32)
    params = init_params(key, layer_shapes)

    # Reference first (keeps the aliased lateral-weight buffers untouched).
    ref = jax.block_until_ready(reference_forward(x, params))

    fwd = jax.jit(multilayer_hebbian_forward)
    out = jax.block_until_ready(fwd(x, params))
    assert out.shape == (B, 16 * 4 * 4)

    # All matmuls are f32/HIGHEST on both sides; only summation order differs
    # (~1e-6), so this tolerance is generous while still catching bf16-level drift.
    if not np.allclose(np.asarray(out), np.asarray(ref), rtol=5e-3, atol=5e-4):
        raise SystemExit("mismatch vs pure-JAX reference")
    print("KERNEL_OK")
</pallas_src>

<mosaic_0001>
module attributes {stable_mosaic.version = 11 : i64} {
  func.func @_hebbian_layer_kernel(%arg0: i32, %arg1: memref<36x128xf32, #tpu.memory_space<vmem>>, %arg2: memref<8x36xf32, #tpu.memory_space<vmem>>, %arg3: memref<8x1xf32, #tpu.memory_space<vmem>>, %arg4: memref<8x64x64xf32, #tpu.memory_space<vmem>>, %arg5: memref<2x512xf32, #tpu.memory_space<vmem>>, %arg6: memref<8x64x64xf32, #tpu.memory_space<vmem>>) attributes {dimension_semantics = [#tpu.dimension_semantics<arbitrary>], iteration_bounds = array<i64: 1>, scalar_prefetch = 0 : i64, scratch_operands = 0 : i64, tpu.core_type = #tpu.core_type<tc>, window_params = [{pipeline_mode = #tpu.pipeline_mode<synchronous>, transform_indices = @transform_0, window_bounds = array<i64: 36, 128>}, {pipeline_mode = #tpu.pipeline_mode<synchronous>, transform_indices = @transform_1, window_bounds = array<i64: 8, 36>}, {pipeline_mode = #tpu.pipeline_mode<synchronous>, transform_indices = @transform_2, window_bounds = array<i64: 8, 1>}, {pipeline_mode = #tpu.pipeline_mode<synchronous>, transform_indices = @transform_3, window_bounds = array<i64: 8, 64, 64>}, {pipeline_mode = #tpu.pipeline_mode<synchronous>, transform_indices = @transform_4, window_bounds = array<i64: 2, 512>}, {pipeline_mode = #tpu.pipeline_mode<synchronous>, transform_indices = @transform_5, window_bounds = array<i64: 8, 64, 64>}]} {
    %c0 = arith.constant 0 : index
    %c0_0 = arith.constant 0 : index
    %0 = vector.load %arg2[%c0, %c0_0] : memref<8x36xf32, #tpu.memory_space<vmem>>, vector<8x36xf32>
    %c0_1 = arith.constant 0 : index
    %c0_2 = arith.constant 0 : index
    %1 = vector.load %arg1[%c0_1, %c0_2] : memref<36x128xf32, #tpu.memory_space<vmem>>, vector<36x128xf32>
    %cst = arith.constant dense<0.000000e+00> : vector<8x128xf32>
    %2 = tpu.matmul %0, %1, %cst {dimension_numbers = #tpu.dot_dimension_numbers<[1], [0], [0], [1], [0, 0, 1, 1], [], []>, precision = #tpu.contract_precision<fp32>} : vector<8x36xf32>, vector<36x128xf32>, vector<8x128xf32> -> vector<8x128xf32>
    %c0_3 = arith.constant 0 : index
    %c0_4 = arith.constant 0 : index
    %3 = vector.load %arg3[%c0_3, %c0_4] : memref<8x1xf32, #tpu.memory_space<vmem>>, vector<8x1xf32>
    %4 = vector.broadcast %3 : vector<8x1xf32> to vector<8x128xf32>
    %5 = arith.addf %2, %4 : vector<8x128xf32>
    %cst_5 = arith.constant 0.000000e+00 : f32
    %6 = vector.broadcast %cst_5 : f32 to vector<8x128xf32>
    %7 = arith.maximumf %5, %6 : vector<8x128xf32>
    %cst_6 = arith.constant 0.000000e+00 : f32
    %8 = vector.broadcast %cst_6 : f32 to vector<64x64xf32>
    %9 = vector.extract_strided_slice %7 {offsets = [0, 0], sizes = [8, 64], strides = [1, 1]} : vector<8x128xf32> to vector<8x64xf32>
    %10 = arith.mulf %9, %9 : vector<8x64xf32>
    %cst_7 = arith.constant dense<0.000000e+00> : vector<8xf32>
    %11 = vector.multi_reduction <add>, %10, %cst_7 [1] : vector<8x64xf32> to vector<8xf32>
    %12 = vector.shape_cast %11 : vector<8xf32> to vector<8x1xf32>
    %13 = math.sqrt %12 : vector<8x1xf32>
    %cst_8 = arith.constant 9.99999997E-7 : f32
    %14 = vector.broadcast %cst_8 : f32 to vector<8x1xf32>
    %15 = arith.addf %13, %14 : vector<8x1xf32>
    %16 = vector.broadcast %15 : vector<8x1xf32> to vector<8x64xf32>
    %17 = arith.divf %9, %16 : vector<8x64xf32>
    %cst_9 = arith.constant dense<0.000000e+00> : vector<64x64xf32>
    %18 = tpu.matmul %17, %17, %cst_9 {dimension_numbers = #tpu.dot_dimension_numbers<[0], [0], [1], [1], [0, 1, 1, 1], [], []>, precision = #tpu.contract_precision<fp32>} : vector<8x64xf32>, vector<8x64xf32>, vector<64x64xf32> -> vector<64x64xf32>
    %19 = arith.addf %8, %18 : vector<64x64xf32>
    %20 = vector.extract_strided_slice %7 {offsets = [0, 64], sizes = [8, 64], strides = [1, 1]} : vector<8x128xf32> to vector<8x64xf32>
    %21 = arith.mulf %20, %20 : vector<8x64xf32>
    %cst_10 = arith.constant dense<0.000000e+00> : vector<8xf32>
    %22 = vector.multi_reduction <add>, %21, %cst_10 [1] : vector<8x64xf32> to vector<8xf32>
    %23 = vector.shape_cast %22 : vector<8xf32> to vector<8x1xf32>
    %24 = math.sqrt %23 : vector<8x1xf32>
    %cst_11 = arith.constant 9.99999997E-7 : f32
    %25 = vector.broadcast %cst_11 : f32 to vector<8x1xf32>
    %26 = arith.addf %24, %25 : vector<8x1xf32>
    %27 = vector.broadcast %26 : vector<8x1xf32> to vector<8x64xf32>
    %28 = arith.divf %20, %27 : vector<8x64xf32>
    %cst_12 = arith.constant dense<0.000000e+00> : vector<64x64xf32>
    %29 = tpu.matmul %28, %28, %cst_12 {dimension_numbers = #tpu.dot_dimension_numbers<[0], [0], [1], [1], [0, 1, 1, 1], [], []>, precision = #tpu.contract_precision<fp32>} : vector<8x64xf32>, vector<8x64xf32>, vector<64x64xf32> -> vector<64x64xf32>
    %30 = arith.addf %19, %29 : vector<64x64xf32>
    %cst_13 = arith.constant 1.250000e-04 : f32
    %31 = vector.broadcast %cst_13 : f32 to vector<64x64xf32>
    %32 = arith.mulf %30, %31 : vector<64x64xf32>
    %c0_14 = arith.constant 0 : index
    %c0_15 = arith.constant 0 : index
    %c0_16 = arith.constant 0 : index
    %33 = vector.load %arg4[%c0_14, %c0_15, %c0_16] : memref<8x64x64xf32, #tpu.memory_space<vmem>>, vector<8x64x64xf32>
    %34 = vector.shape_cast %32 : vector<64x64xf32> to vector<1x64x64xf32>
    %35 = vector.broadcast %34 : vector<1x64x64xf32> to vector<8x64x64xf32>
    %36 = arith.addf %33, %35 : vector<8x64x64xf32>
    %cst_17 = arith.constant -1.000000e+00 : f32
    %cst_18 = arith.constant 1.000000e+00 : f32
    %37 = vector.broadcast %cst_17 : f32 to vector<8x64x64xf32>
    %38 = arith.maximumf %37, %36 : vector<8x64x64xf32>
    %39 = vector.broadcast %cst_18 : f32 to vector<8x64x64xf32>
    %40 = arith.minimumf %39, %38 : vector<8x64x64xf32>
    %c0_19 = arith.constant 0 : index
    %c0_20 = arith.constant 0 : index
    %c0_21 = arith.constant 0 : index
    %41 = vector.load %arg6[%c0_19, %c0_20, %c0_21] : memref<8x64x64xf32, #tpu.memory_space<vmem>>, vector<8x64x64xf32>
    tpu.vector_store %arg6[%c0_19, %c0_20, %c0_21], %40 {strides = array<i32>} : memref<8x64x64xf32, #tpu.memory_space<vmem>>, vector<8x64x64xf32>,
    %42 = vector.shape_cast %17 : vector<8x64xf32> to vector<8x64x1xf32>
    %43 = vector.broadcast %42 : vector<8x64x1xf32> to vector<8x64x64xf32>
    %44 = arith.mulf %43, %40 : vector<8x64x64xf32>
    %cst_22 = arith.constant dense<0.000000e+00> : vector<8x64xf32>
    %45 = vector.multi_reduction <add>, %44, %cst_22 [1] : vector<8x64x64xf32> to vector<8x64xf32>
    %cst_23 = arith.constant dense<0.000000e+00> : vector<8xf32>
    %46 = vector.multi_reduction <add>, %45, %cst_23 [1] : vector<8x64xf32> to vector<8xf32>
    %47 = vector.shape_cast %46 : vector<8xf32> to vector<8x1xf32>
    %cst_24 = arith.constant 1.562500e-02 : f32
    %48 = vector.broadcast %cst_24 : f32 to vector<8x1xf32>
    %49 = arith.mulf %47, %48 : vector<8x1xf32>
    %50 = vector.broadcast %49 : vector<8x1xf32> to vector<8x64xf32>
    %51 = arith.subf %45, %50 : vector<8x64xf32>
    %52 = arith.addf %17, %51 : vector<8x64xf32>
    %53 = vector.extract_strided_slice %52 {offsets = [0, 0], sizes = [1, 64], strides = [1, 1]} : vector<8x64xf32> to vector<1x64xf32>
    %c0_25 = arith.constant 0 : index
    %c0_26 = arith.constant 0 : index
    %54 = vector.load %arg5[%c0_25, %c0_26] : memref<2x512xf32, #tpu.memory_space<vmem>>, vector<1x64xf32>
    tpu.vector_store %arg5[%c0_25, %c0_26], %53 {strides = array<i32>} : memref<2x512xf32, #tpu.memory_space<vmem>>, vector<1x64xf32>,
    %55 = vector.extract_strided_slice %52 {offsets = [1, 0], sizes = [1, 64], strides = [1, 1]} : vector<8x64xf32> to vector<1x64xf32>
    %c0_27 = arith.constant 0 : index
    %c64 = arith.constant 64 : index
    %56 = vector.load %arg5[%c0_27, %c64] : memref<2x512xf32, #tpu.memory_space<vmem>>, vector<1x64xf32>
    tpu.vector_store %arg5[%c0_27, %c64], %55 {strides = array<i32>} : memref<2x512xf32, #tpu.memory_space<vmem>>, vector<1x64xf32>,
    %57 = vector.extract_strided_slice %52 {offsets = [2, 0], sizes = [1, 64], strides = [1, 1]} : vector<8x64xf32> to vector<1x64xf32>
    %c0_28 = arith.constant 0 : index
    %c128 = arith.constant 128 : index
    %58 = vector.load %arg5[%c0_28, %c128] : memref<2x512xf32, #tpu.memory_space<vmem>>, vector<1x64xf32>
    tpu.vector_store %arg5[%c0_28, %c128], %57 {strides = array<i32>} : memref<2x512xf32, #tpu.memory_space<vmem>>, vector<1x64xf32>,
    %59 = vector.extract_strided_slice %52 {offsets = [3, 0], sizes = [1, 64], strides = [1, 1]} : vector<8x64xf32> to vector<1x64xf32>
    %c0_29 = arith.constant 0 : index
    %c192 = arith.constant 192 : index
    %60 = vector.load %arg5[%c0_29, %c192] : memref<2x512xf32, #tpu.memory_space<vmem>>, vector<1x64xf32>
    tpu.vector_store %arg5[%c0_29, %c192], %59 {strides = array<i32>} : memref<2x512xf32, #tpu.memory_space<vmem>>, vector<1x64xf32>,
    %61 = vector.extract_strided_slice %52 {offsets = [4, 0], sizes = [1, 64], strides = [1, 1]} : vector<8x64xf32> to vector<1x64xf32>
    %c0_30 = arith.constant 0 : index
    %c256 = arith.constant 256 : index
    %62 = vector.load %arg5[%c0_30, %c256] : memref<2x512xf32, #tpu.memory_space<vmem>>, vector<1x64xf32>
    tpu.vector_store %arg5[%c0_30, %c256], %61 {strides = array<i32>} : memref<2x512xf32, #tpu.memory_space<vmem>>, vector<1x64xf32>,
    %63 = vector.extract_strided_slice %52 {offsets = [5, 0], sizes = [1, 64], strides = [1, 1]} : vector<8x64xf32> to vector<1x64xf32>
    %c0_31 = arith.constant 0 : index
    %c320 = arith.constant 320 : index
    %64 = vector.load %arg5[%c0_31, %c320] : memref<2x512xf32, #tpu.memory_space<vmem>>, vector<1x64xf32>
    tpu.vector_store %arg5[%c0_31, %c320], %63 {strides = array<i32>} : memref<2x512xf32, #tpu.memory_space<vmem>>, vector<1x64xf32>,
    %65 = vector.extract_strided_slice %52 {offsets = [6, 0], sizes = [1, 64], strides = [1, 1]} : vector<8x64xf32> to vector<1x64xf32>
    %c0_32 = arith.constant 0 : index
    %c384 = arith.constant 384 : index
    %66 = vector.load %arg5[%c0_32, %c384] : memref<2x512xf32, #tpu.memory_space<vmem>>, vector<1x64xf32>
    tpu.vector_store %arg5[%c0_32, %c384], %65 {strides = array<i32>} : memref<2x512xf32, #tpu.memory_space<vmem>>, vector<1x64xf32>,
    %67 = vector.extract_strided_slice %52 {offsets = [7, 0], sizes = [1, 64], strides = [1, 1]} : vector<8x64xf32> to vector<1x64xf32>
    %c0_33 = arith.constant 0 : index
    %c448 = arith.constant 448 : index
    %68 = vector.load %arg5[%c0_33, %c448] : memref<2x512xf32, #tpu.memory_space<vmem>>, vector<1x64xf32>
    tpu.vector_store %arg5[%c0_33, %c448], %67 {strides = array<i32>} : memref<2x512xf32, #tpu.memory_space<vmem>>, vector<1x64xf32>,
    %69 = vector.shape_cast %28 : vector<8x64xf32> to vector<8x64x1xf32>
    %70 = vector.broadcast %69 : vector<8x64x1xf32> to vector<8x64x64xf32>
    %71 = arith.mulf %70, %40 : vector<8x64x64xf32>
    %cst_34 = arith.constant dense<0.000000e+00> : vector<8x64xf32>
    %72 = vector.multi_reduction <add>, %71, %cst_34 [1] : vector<8x64x64xf32> to vector<8x64xf32>
    %cst_35 = arith.constant dense<0.000000e+00> : vector<8xf32>
    %73 = vector.multi_reduction <add>, %72, %cst_35 [1] : vector<8x64xf32> to vector<8xf32>
    %74 = vector.shape_cast %73 : vector<8xf32> to vector<8x1xf32>
    %cst_36 = arith.constant 1.562500e-02 : f32
    %75 = vector.broadcast %cst_36 : f32 to vector<8x1xf32>
    %76 = arith.mulf %74, %75 : vector<8x1xf32>
    %77 = vector.broadcast %76 : vector<8x1xf32> to vector<8x64xf32>
    %78 = arith.subf %72, %77 : vector<8x64xf32>
    %79 = arith.addf %28, %78 : vector<8x64xf32>
    %80 = vector.extract_strided_slice %79 {offsets = [0, 0], sizes = [1, 64], strides = [1, 1]} : vector<8x64xf32> to vector<1x64xf32>
    %c1 = arith.constant 1 : index
    %c0_37 = arith.constant 0 : index
    %81 = vector.load %arg5[%c1, %c0_37] : memref<2x512xf32, #tpu.memory_space<vmem>>, vector<1x64xf32>
    tpu.vector_store %arg5[%c1, %c0_37], %80 {strides = array<i32>} : memref<2x512xf32, #tpu.memory_space<vmem>>, vector<1x64xf32>,
    %82 = vector.extract_strided_slice %79 {offsets = [1, 0], sizes = [1, 64], strides = [1, 1]} : vector<8x64xf32> to vector<1x64xf32>
    %c1_38 = arith.constant 1 : index
    %c64_39 = arith.constant 64 : index
    %83 = vector.load %arg5[%c1_38, %c64_39] : memref<2x512xf32, #tpu.memory_space<vmem>>, vector<1x64xf32>
    tpu.vector_store %arg5[%c1_38, %c64_39], %82 {strides = array<i32>} : memref<2x512xf32, #tpu.memory_space<vmem>>, vector<1x64xf32>,
    %84 = vector.extract_strided_slice %79 {offsets = [2, 0], sizes = [1, 64], strides = [1, 1]} : vector<8x64xf32> to vector<1x64xf32>
    %c1_40 = arith.constant 1 : index
    %c128_41 = arith.constant 128 : index
    %85 = vector.load %arg5[%c1_40, %c128_41] : memref<2x512xf32, #tpu.memory_space<vmem>>, vector<1x64xf32>
    tpu.vector_store %arg5[%c1_40, %c128_41], %84 {strides = array<i32>} : memref<2x512xf32, #tpu.memory_space<vmem>>, vector<1x64xf32>,
    %86 = vector.extract_strided_slice %79 {offsets = [3, 0], sizes = [1, 64], strides = [1, 1]} : vector<8x64xf32> to vector<1x64xf32>
    %c1_42 = arith.constant 1 : index
    %c192_43 = arith.constant 192 : index
    %87 = vector.load %arg5[%c1_42, %c192_43] : memref<2x512xf32, #tpu.memory_space<vmem>>, vector<1x64xf32>
    tpu.vector_store %arg5[%c1_42, %c192_43], %86 {strides = array<i32>} : memref<2x512xf32, #tpu.memory_space<vmem>>, vector<1x64xf32>,
    %88 = vector.extract_strided_slice %79 {offsets = [4, 0], sizes = [1, 64], strides = [1, 1]} : vector<8x64xf32> to vector<1x64xf32>
    %c1_44 = arith.constant 1 : index
    %c256_45 = arith.constant 256 : index
    %89 = vector.load %arg5[%c1_44, %c256_45] : memref<2x512xf32, #tpu.memory_space<vmem>>, vector<1x64xf32>
    tpu.vector_store %arg5[%c1_44, %c256_45], %88 {strides = array<i32>} : memref<2x512xf32, #tpu.memory_space<vmem>>, vector<1x64xf32>,
    %90 = vector.extract_strided_slice %79 {offsets = [5, 0], sizes = [1, 64], strides = [1, 1]} : vector<8x64xf32> to vector<1x64xf32>
    %c1_46 = arith.constant 1 : index
    %c320_47 = arith.constant 320 : index
    %91 = vector.load %arg5[%c1_46, %c320_47] : memref<2x512xf32, #tpu.memory_space<vmem>>, vector<1x64xf32>
    tpu.vector_store %arg5[%c1_46, %c320_47], %90 {strides = array<i32>} : memref<2x512xf32, #tpu.memory_space<vmem>>, vector<1x64xf32>,
    %92 = vector.extract_strided_slice %79 {offsets = [6, 0], sizes = [1, 64], strides = [1, 1]} : vector<8x64xf32> to vector<1x64xf32>
    %c1_48 = arith.constant 1 : index
    %c384_49 = arith.constant 384 : index
    %93 = vector.load %arg5[%c1_48, %c384_49] : memref<2x512xf32, #tpu.memory_space<vmem>>, vector<1x64xf32>
    tpu.vector_store %arg5[%c1_48, %c384_49], %92 {strides = array<i32>} : memref<2x512xf32, #tpu.memory_space<vmem>>, vector<1x64xf32>,
    %94 = vector.extract_strided_slice %79 {offsets = [7, 0], sizes = [1, 64], strides = [1, 1]} : vector<8x64xf32> to vector<1x64xf32>
    %c1_50 = arith.constant 1 : index
    %c448_51 = arith.constant 448 : index
    %95 = vector.load %arg5[%c1_50, %c448_51] : memref<2x512xf32, #tpu.memory_space<vmem>>, vector<1x64xf32>
    tpu.vector_store %arg5[%c1_50, %c448_51], %94 {strides = array<i32>} : memref<2x512xf32, #tpu.memory_space<vmem>>, vector<1x64xf32>,
    return
  }
  func.func @transform_0(%arg0: i32) -> (i32, i32) {
    %c0_i32 = arith.constant 0 : i32
    %c0_i32_0 = arith.constant 0 : i32
    %c0_i32_1 = arith.constant 0 : i32
    return %c0_i32, %c0_i32_0 : i32, i32
  }
  func.func @transform_1(%arg0: i32) -> (i32, i32) {
    %c0_i32 = arith.constant 0 : i32
    %c0_i32_0 = arith.constant 0 : i32
    %c0_i32_1 = arith.constant 0 : i32
    return %c0_i32, %c0_i32_0 : i32, i32
  }
  func.func @transform_2(%arg0: i32) -> (i32, i32) {
    %c0_i32 = arith.constant 0 : i32
    %c0_i32_0 = arith.constant 0 : i32
    %c0_i32_1 = arith.constant 0 : i32
    return %c0_i32, %c0_i32_0 : i32, i32
  }
  func.func @transform_3(%arg0: i32) -> (i32, i32, i32) {
    %c0_i32 = arith.constant 0 : i32
    %c0_i32_0 = arith.constant 0 : i32
    %c0_i32_1 = arith.constant 0 : i32
    %c0_i32_2 = arith.constant 0 : i32
    return %c0_i32, %c0_i32_0, %c0_i32_1 : i32, i32, i32
  }
  func.func @transform_4(%arg0: i32) -> (i32, i32) {
    %c0_i32 = arith.constant 0 : i32
    %c0_i32_0 = arith.constant 0 : i32
    %c0_i32_1 = arith.constant 0 : i32
    return %c0_i32, %c0_i32_0 : i32, i32
  }
  func.func @transform_5(%arg0: i32) -> (i32, i32, i32) {
    %c0_i32 = arith.constant 0 : i32
    %c0_i32_0 = arith.constant 0 : i32
    %c0_i32_1 = arith.constant 0 : i32
    %c0_i32_2 = arith.constant 0 : i32
    return %c0_i32, %c0_i32_0, %c0_i32_1 : i32, i32, i32
  }
}

module attributes {stable_mosaic.version = 11 : i64} {
  func.func @_hebbian_layer_kernel(%arg0: i32, %arg1: memref<72x32xf32, #tpu.memory_space<vmem>>, %arg2: memref<16x72xf32, #tpu.memory_space<vmem>>, %arg3: memref<16x1xf32, #tpu.memory_space<vmem>>, %arg4: memref<16x16x16xf32, #tpu.memory_space<vmem>>, %arg5: memref<2x256xf32, #tpu.memory_space<vmem>>, %arg6: memref<16x16x16xf32, #tpu.memory_space<vmem>>) attributes {dimension_semantics = [#tpu.dimension_semantics<arbitrary>], iteration_bounds = array<i64: 1>, scalar_prefetch = 0 : i64, scratch_operands = 0 : i64, tpu.core_type = #tpu.core_type<tc>, window_params = [{pipeline_mode = #tpu.pipeline_mode<synchronous>, transform_indices = @transform_0, window_bounds = array<i64: 72, 32>}, {pipeline_mode = #tpu.pipeline_mode<synchronous>, transform_indices = @transform_1, window_bounds = array<i64: 16, 72>}, {pipeline_mode = #tpu.pipeline_mode<synchronous>, transform_indices = @transform_2, window_bounds = array<i64: 16, 1>}, {pipeline_mode = #tpu.pipeline_mode<synchronous>, transform_indices = @transform_3, window_bounds = array<i64: 16, 16, 16>}, {pipeline_mode = #tpu.pipeline_mode<synchronous>, transform_indices = @transform_4, window_bounds = array<i64: 2, 256>}, {pipeline_mode = #tpu.pipeline_mode<synchronous>, transform_indices = @transform_5, window_bounds = array<i64: 16, 16, 16>}]} {
    %c0 = arith.constant 0 : index
    %c0_0 = arith.constant 0 : index
    %0 = vector.load %arg2[%c0, %c0_0] : memref<16x72xf32, #tpu.memory_space<vmem>>, vector<16x72xf32>
    %c0_1 = arith.constant 0 : index
    %c0_2 = arith.constant 0 : index
    %1 = vector.load %arg1[%c0_1, %c0_2] : memref<72x32xf32, #tpu.memory_space<vmem>>, vector<72x32xf32>
    %cst = arith.constant dense<0.000000e+00> : vector<16x32xf32>
    %2 = tpu.matmul %0, %1, %cst {dimension_numbers = #tpu.dot_dimension_numbers<[1], [0], [0], [1], [0, 0, 1, 1], [], []>, precision = #tpu.contract_precision<fp32>} : vector<16x72xf32>, vector<72x32xf32>, vector<16x32xf32> -> vector<16x32xf32>
    %c0_3 = arith.constant 0 : index
    %c0_4 = arith.constant 0 : index
    %3 = vector.load %arg3[%c0_3, %c0_4] : memref<16x1xf32, #tpu.memory_space<vmem>>, vector<16x1xf32>
    %4 = vector.broadcast %3 : vector<16x1xf32> to vector<16x32xf32>
    %5 = arith.addf %2, %4 : vector<16x32xf32>
    %cst_5 = arith.constant 0.000000e+00 : f32
    %6 = vector.broadcast %cst_5 : f32 to vector<16x32xf32>
    %7 = arith.maximumf %5, %6 : vector<16x32xf32>
    %cst_6 = arith.constant 0.000000e+00 : f32
    %8 = vector.broadcast %cst_6 : f32 to vector<16x16xf32>
    %9 = vector.extract_strided_slice %7 {offsets = [0, 0], sizes = [16, 16], strides = [1, 1]} : vector<16x32xf32> to vector<16x16xf32>
    %10 = arith.mulf %9, %9 : vector<16x16xf32>
    %cst_7 = arith.constant dense<0.000000e+00> : vector<16xf32>
    %11 = vector.multi_reduction <add>, %10, %cst_7 [1] : vector<16x16xf32> to vector<16xf32>
    %12 = vector.shape_cast %11 : vector<16xf32> to vector<16x1xf32>
    %13 = math.sqrt %12 : vector<16x1xf32>
    %cst_8 = arith.constant 9.99999997E-7 : f32
    %14 = vector.broadcast %cst_8 : f32 to vector<16x1xf32>
    %15 = arith.addf %13, %14 : vector<16x1xf32>
    %16 = vector.broadcast %15 : vector<16x1xf32> to vector<16x16xf32>
    %17 = arith.divf %9, %16 : vector<16x16xf32>
    %cst_9 = arith.constant dense<0.000000e+00> : vector<16x16xf32>
    %18 = tpu.matmul %17, %17, %cst_9 {dimension_numbers = #tpu.dot_dimension_numbers<[0], [0], [1], [1], [0, 1, 1, 1], [], []>, precision = #tpu.contract_precision<fp32>} : vector<16x16xf32>, vector<16x16xf32>, vector<16x16xf32> -> vector<16x16xf32>
    %19 = arith.addf %8, %18 : vector<16x16xf32>
    %20 = vector.extract_strided_slice %7 {offsets = [0, 16], sizes = [16, 16], strides = [1, 1]} : vector<16x32xf32> to vector<16x16xf32>
    %21 = arith.mulf %20, %20 : vector<16x16xf32>
    %cst_10 = arith.constant dense<0.000000e+00> : vector<16xf32>
    %22 = vector.multi_reduction <add>, %21, %cst_10 [1] : vector<16x16xf32> to vector<16xf32>
    %23 = vector.shape_cast %22 : vector<16xf32> to vector<16x1xf32>
    %24 = math.sqrt %23 : vector<16x1xf32>
    %cst_11 = arith.constant 9.99999997E-7 : f32
    %25 = vector.broadcast %cst_11 : f32 to vector<16x1xf32>
    %26 = arith.addf %24, %25 : vector<16x1xf32>
    %27 = vector.broadcast %26 : vector<16x1xf32> to vector<16x16xf32>
    %28 = arith.divf %20, %27 : vector<16x16xf32>
    %cst_12 = arith.constant dense<0.000000e+00> : vector<16x16xf32>
    %29 = tpu.matmul %28, %28, %cst_12 {dimension_numbers = #tpu.dot_dimension_numbers<[0], [0], [1], [1], [0, 1, 1, 1], [], []>, precision = #tpu.contract_precision<fp32>} : vector<16x16xf32>, vector<16x16xf32>, vector<16x16xf32> -> vector<16x16xf32>
    %30 = arith.addf %19, %29 : vector<16x16xf32>
    %cst_13 = arith.constant 6.250000e-05 : f32
    %31 = vector.broadcast %cst_13 : f32 to vector<16x16xf32>
    %32 = arith.mulf %30, %31 : vector<16x16xf32>
    %c0_14 = arith.constant 0 : index
    %c0_15 = arith.constant 0 : index
    %c0_16 = arith.constant 0 : index
    %33 = vector.load %arg4[%c0_14, %c0_15, %c0_16] : memref<16x16x16xf32, #tpu.memory_space<vmem>>, vector<16x16x16xf32>
    %34 = vector.shape_cast %32 : vector<16x16xf32> to vector<1x16x16xf32>
    %35 = vector.broadcast %34 : vector<1x16x16xf32> to vector<16x16x16xf32>
    %36 = arith.addf %33, %35 : vector<16x16x16xf32>
    %cst_17 = arith.constant -1.000000e+00 : f32
    %cst_18 = arith.constant 1.000000e+00 : f32
    %37 = vector.broadcast %cst_17 : f32 to vector<16x16x16xf32>
    %38 = arith.maximumf %37, %36 : vector<16x16x16xf32>
    %39 = vector.broadcast %cst_18 : f32 to vector<16x16x16xf32>
    %40 = arith.minimumf %39, %38 : vector<16x16x16xf32>
    %c0_19 = arith.constant 0 : index
    %c0_20 = arith.constant 0 : index
    %c0_21 = arith.constant 0 : index
    %41 = vector.load %arg6[%c0_19, %c0_20, %c0_21] : memref<16x16x16xf32, #tpu.memory_space<vmem>>, vector<16x16x16xf32>
    tpu.vector_store %arg6[%c0_19, %c0_20, %c0_21], %40 {strides = array<i32>} : memref<16x16x16xf32, #tpu.memory_space<vmem>>, vector<16x16x16xf32>,
    %42 = vector.shape_cast %17 : vector<16x16xf32> to vector<16x16x1xf32>
    %43 = vector.broadcast %42 : vector<16x16x1xf32> to vector<16x16x16xf32>
    %44 = arith.mulf %43, %40 : vector<16x16x16xf32>
    %cst_22 = arith.constant dense<0.000000e+00> : vector<16x16xf32>
    %45 = vector.multi_reduction <add>, %44, %cst_22 [1] : vector<16x16x16xf32> to vector<16x16xf32>
    %cst_23 = arith.constant dense<0.000000e+00> : vector<16xf32>
    %46 = vector.multi_reduction <add>, %45, %cst_23 [1] : vector<16x16xf32> to vector<16xf32>
    %47 = vector.shape_cast %46 : vector<16xf32> to vector<16x1xf32>
    %cst_24 = arith.constant 6.250000e-02 : f32
    %48 = vector.broadcast %cst_24 : f32 to vector<16x1xf32>
    %49 = arith.mulf %47, %48 : vector<16x1xf32>
    %50 = vector.broadcast %49 : vector<16x1xf32> to vector<16x16xf32>
    %51 = arith.subf %45, %50 : vector<16x16xf32>
    %52 = arith.addf %17, %51 : vector<16x16xf32>
    %53 = vector.extract_strided_slice %52 {offsets = [0, 0], sizes = [1, 16], strides = [1, 1]} : vector<16x16xf32> to vector<1x16xf32>
    %c0_25 = arith.constant 0 : index
    %c0_26 = arith.constant 0 : index
    %54 = vector.load %arg5[%c0_25, %c0_26] : memref<2x256xf32, #tpu.memory_space<vmem>>, vector<1x16xf32>
    tpu.vector_store %arg5[%c0_25, %c0_26], %53 {strides = array<i32>} : memref<2x256xf32, #tpu.memory_space<vmem>>, vector<1x16xf32>,
    %55 = vector.extract_strided_slice %52 {offsets = [1, 0], sizes = [1, 16], strides = [1, 1]} : vector<16x16xf32> to vector<1x16xf32>
    %c0_27 = arith.constant 0 : index
    %c16 = arith.constant 16 : index
    %56 = vector.load %arg5[%c0_27, %c16] : memref<2x256xf32, #tpu.memory_space<vmem>>, vector<1x16xf32>
    tpu.vector_store %arg5[%c0_27, %c16], %55 {strides = array<i32>} : memref<2x256xf32, #tpu.memory_space<vmem>>, vector<1x16xf32>,
    %57 = vector.extract_strided_slice %52 {offsets = [2, 0], sizes = [1, 16], strides = [1, 1]} : vector<16x16xf32> to vector<1x16xf32>
    %c0_28 = arith.constant 0 : index
    %c32 = arith.constant 32 : index
    %58 = vector.load %arg5[%c0_28, %c32] : memref<2x256xf32, #tpu.memory_space<vmem>>, vector<1x16xf32>
    tpu.vector_store %arg5[%c0_28, %c32], %57 {strides = array<i32>} : memref<2x256xf32, #tpu.memory_space<vmem>>, vector<1x16xf32>,
    %59 = vector.extract_strided_slice %52 {offsets = [3, 0], sizes = [1, 16], strides = [1, 1]} : vector<16x16xf32> to vector<1x16xf32>
    %c0_29 = arith.constant 0 : index
    %c48 = arith.constant 48 : index
    %60 = vector.load %arg5[%c0_29, %c48] : memref<2x256xf32, #tpu.memory_space<vmem>>, vector<1x16xf32>
    tpu.vector_store %arg5[%c0_29, %c48], %59 {strides = array<i32>} : memref<2x256xf32, #tpu.memory_space<vmem>>, vector<1x16xf32>,
    %61 = vector.extract_strided_slice %52 {offsets = [4, 0], sizes = [1, 16], strides = [1, 1]} : vector<16x16xf32> to vector<1x16xf32>
    %c0_30 = arith.constant 0 : index
    %c64 = arith.constant 64 : index
    %62 = vector.load %arg5[%c0_30, %c64] : memref<2x256xf32, #tpu.memory_space<vmem>>, vector<1x16xf32>
    tpu.vector_store %arg5[%c0_30, %c64], %61 {strides = array<i32>} : memref<2x256xf32, #tpu.memory_space<vmem>>, vector<1x16xf32>,
    %63 = vector.extract_strided_slice %52 {offsets = [5, 0], sizes = [1, 16], strides = [1, 1]} : vector<16x16xf32> to vector<1x16xf32>
    %c0_31 = arith.constant 0 : index
    %c80 = arith.constant 80 : index
    %64 = vector.load %arg5[%c0_31, %c80] : memref<2x256xf32, #tpu.memory_space<vmem>>, vector<1x16xf32>
    tpu.vector_store %arg5[%c0_31, %c80], %63 {strides = array<i32>} : memref<2x256xf32, #tpu.memory_space<vmem>>, vector<1x16xf32>,
    %65 = vector.extract_strided_slice %52 {offsets = [6, 0], sizes = [1, 16], strides = [1, 1]} : vector<16x16xf32> to vector<1x16xf32>
    %c0_32 = arith.constant 0 : index
    %c96 = arith.constant 96 : index
    %66 = vector.load %arg5[%c0_32, %c96] : memref<2x256xf32, #tpu.memory_space<vmem>>, vector<1x16xf32>
    tpu.vector_store %arg5[%c0_32, %c96], %65 {strides = array<i32>} : memref<2x256xf32, #tpu.memory_space<vmem>>, vector<1x16xf32>,
    %67 = vector.extract_strided_slice %52 {offsets = [7, 0], sizes = [1, 16], strides = [1, 1]} : vector<16x16xf32> to vector<1x16xf32>
    %c0_33 = arith.constant 0 : index
    %c112 = arith.constant 112 : index
    %68 = vector.load %arg5[%c0_33, %c112] : memref<2x256xf32, #tpu.memory_space<vmem>>, vector<1x16xf32>
    tpu.vector_store %arg5[%c0_33, %c112], %67 {strides = array<i32>} : memref<2x256xf32, #tpu.memory_space<vmem>>, vector<1x16xf32>,
    %69 = vector.extract_strided_slice %52 {offsets = [8, 0], sizes = [1, 16], strides = [1, 1]} : vector<16x16xf32> to vector<1x16xf32>
    %c0_34 = arith.constant 0 : index
    %c128 = arith.constant 128 : index
    %70 = vector.load %arg5[%c0_34, %c128] : memref<2x256xf32, #tpu.memory_space<vmem>>, vector<1x16xf32>
    tpu.vector_store %arg5[%c0_34, %c128], %69 {strides = array<i32>} : memref<2x256xf32, #tpu.memory_space<vmem>>, vector<1x16xf32>,
    %71 = vector.extract_strided_slice %52 {offsets = [9, 0], sizes = [1, 16], strides = [1, 1]} : vector<16x16xf32> to vector<1x16xf32>
    %c0_35 = arith.constant 0 : index
    %c144 = arith.constant 144 : index
    %72 = vector.load %arg5[%c0_35, %c144] : memref<2x256xf32, #tpu.memory_space<vmem>>, vector<1x16xf32>
    tpu.vector_store %arg5[%c0_35, %c144], %71 {strides = array<i32>} : memref<2x256xf32, #tpu.memory_space<vmem>>, vector<1x16xf32>,
    %73 = vector.extract_strided_slice %52 {offsets = [10, 0], sizes = [1, 16], strides = [1, 1]} : vector<16x16xf32> to vector<1x16xf32>
    %c0_36 = arith.constant 0 : index
    %c160 = arith.constant 160 : index
    %74 = vector.load %arg5[%c0_36, %c160] : memref<2x256xf32, #tpu.memory_space<vmem>>, vector<1x16xf32>
    tpu.vector_store %arg5[%c0_36, %c160], %73 {strides = array<i32>} : memref<2x256xf32, #tpu.memory_space<vmem>>, vector<1x16xf32>,
    %75 = vector.extract_strided_slice %52 {offsets = [11, 0], sizes = [1, 16], strides = [1, 1]} : vector<16x16xf32> to vector<1x16xf32>
    %c0_37 = arith.constant 0 : index
    %c176 = arith.constant 176 : index
    %76 = vector.load %arg5[%c0_37, %c176] : memref<2x256xf32, #tpu.memory_space<vmem>>, vector<1x16xf32>
    tpu.vector_store %arg5[%c0_37, %c176], %75 {strides = array<i32>} : memref<2x256xf32, #tpu.memory_space<vmem>>, vector<1x16xf32>,
    %77 = vector.extract_strided_slice %52 {offsets = [12, 0], sizes = [1, 16], strides = [1, 1]} : vector<16x16xf32> to vector<1x16xf32>
    %c0_38 = arith.constant 0 : index
    %c192 = arith.constant 192 : index
    %78 = vector.load %arg5[%c0_38, %c192] : memref<2x256xf32, #tpu.memory_space<vmem>>, vector<1x16xf32>
    tpu.vector_store %arg5[%c0_38, %c192], %77 {strides = array<i32>} : memref<2x256xf32, #tpu.memory_space<vmem>>, vector<1x16xf32>,
    %79 = vector.extract_strided_slice %52 {offsets = [13, 0], sizes = [1, 16], strides = [1, 1]} : vector<16x16xf32> to vector<1x16xf32>
    %c0_39 = arith.constant 0 : index
    %c208 = arith.constant 208 : index
    %80 = vector.load %arg5[%c0_39, %c208] : memref<2x256xf32, #tpu.memory_space<vmem>>, vector<1x16xf32>
    tpu.vector_store %arg5[%c0_39, %c208], %79 {strides = array<i32>} : memref<2x256xf32, #tpu.memory_space<vmem>>, vector<1x16xf32>,
    %81 = vector.extract_strided_slice %52 {offsets = [14, 0], sizes = [1, 16], strides = [1, 1]} : vector<16x16xf32> to vector<1x16xf32>
    %c0_40 = arith.constant 0 : index
    %c224 = arith.constant 224 : index
    %82 = vector.load %arg5[%c0_40, %c224] : memref<2x256xf32, #tpu.memory_space<vmem>>, vector<1x16xf32>
    tpu.vector_store %arg5[%c0_40, %c224], %81 {strides = array<i32>} : memref<2x256xf32, #tpu.memory_space<vmem>>, vector<1x16xf32>,
    %83 = vector.extract_strided_slice %52 {offsets = [15, 0], sizes = [1, 16], strides = [1, 1]} : vector<16x16xf32> to vector<1x16xf32>
    %c0_41 = arith.constant 0 : index
    %c240 = arith.constant 240 : index
    %84 = vector.load %arg5[%c0_41, %c240] : memref<2x256xf32, #tpu.memory_space<vmem>>, vector<1x16xf32>
    tpu.vector_store %arg5[%c0_41, %c240], %83 {strides = array<i32>} : memref<2x256xf32, #tpu.memory_space<vmem>>, vector<1x16xf32>,
    %85 = vector.shape_cast %28 : vector<16x16xf32> to vector<16x16x1xf32>
    %86 = vector.broadcast %85 : vector<16x16x1xf32> to vector<16x16x16xf32>
    %87 = arith.mulf %86, %40 : vector<16x16x16xf32>
    %cst_42 = arith.constant dense<0.000000e+00> : vector<16x16xf32>
    %88 = vector.multi_reduction <add>, %87, %cst_42 [1] : vector<16x16x16xf32> to vector<16x16xf32>
    %cst_43 = arith.constant dense<0.000000e+00> : vector<16xf32>
    %89 = vector.multi_reduction <add>, %88, %cst_43 [1] : vector<16x16xf32> to vector<16xf32>
    %90 = vector.shape_cast %89 : vector<16xf32> to vector<16x1xf32>
    %cst_44 = arith.constant 6.250000e-02 : f32
    %91 = vector.broadcast %cst_44 : f32 to vector<16x1xf32>
    %92 = arith.mulf %90, %91 : vector<16x1xf32>
    %93 = vector.broadcast %92 : vector<16x1xf32> to vector<16x16xf32>
    %94 = arith.subf %88, %93 : vector<16x16xf32>
    %95 = arith.addf %28, %94 : vector<16x16xf32>
    %96 = vector.extract_strided_slice %95 {offsets = [0, 0], sizes = [1, 16], strides = [1, 1]} : vector<16x16xf32> to vector<1x16xf32>
    %c1 = arith.constant 1 : index
    %c0_45 = arith.constant 0 : index
    %97 = vector.load %arg5[%c1, %c0_45] : memref<2x256xf32, #tpu.memory_space<vmem>>, vector<1x16xf32>
    tpu.vector_store %arg5[%c1, %c0_45], %96 {strides = array<i32>} : memref<2x256xf32, #tpu.memory_space<vmem>>, vector<1x16xf32>,
    %98 = vector.extract_strided_slice %95 {offsets = [1, 0], sizes = [1, 16], strides = [1, 1]} : vector<16x16xf32> to vector<1x16xf32>
    %c1_46 = arith.constant 1 : index
    %c16_47 = arith.constant 16 : index
    %99 = vector.load %arg5[%c1_46, %c16_47] : memref<2x256xf32, #tpu.memory_space<vmem>>, vector<1x16xf32>
    tpu.vector_store %arg5[%c1_46, %c16_47], %98 {strides = array<i32>} : memref<2x256xf32, #tpu.memory_space<vmem>>, vector<1x16xf32>,
    %100 = vector.extract_strided_slice %95 {offsets = [2, 0], sizes = [1, 16], strides = [1, 1]} : vector<16x16xf32> to vector<1x16xf32>
    %c1_48 = arith.constant 1 : index
    %c32_49 = arith.constant 32 : index
    %101 = vector.load %arg5[%c1_48, %c32_49] : memref<2x256xf32, #tpu.memory_space<vmem>>, vector<1x16xf32>
    tpu.vector_store %arg5[%c1_48, %c32_49], %100 {strides = array<i32>} : memref<2x256xf32, #tpu.memory_space<vmem>>, vector<1x16xf32>,
    %102 = vector.extract_strided_slice %95 {offsets = [3, 0], sizes = [1, 16], strides = [1, 1]} : vector<16x16xf32> to vector<1x16xf32>
    %c1_50 = arith.constant 1 : index
    %c48_51 = arith.constant 48 : index
    %103 = vector.load %arg5[%c1_50, %c48_51] : memref<2x256xf32, #tpu.memory_space<vmem>>, vector<1x16xf32>
    tpu.vector_store %arg5[%c1_50, %c48_51], %102 {strides = array<i32>} : memref<2x256xf32, #tpu.memory_space<vmem>>, vector<1x16xf32>,
    %104 = vector.extract_strided_slice %95 {offsets = [4, 0], sizes = [1, 16], strides = [1, 1]} : vector<16x16xf32> to vector<1x16xf32>
    %c1_52 = arith.constant 1 : index
    %c64_53 = arith.constant 64 : index
    %105 = vector.load %arg5[%c1_52, %c64_53] : memref<2x256xf32, #tpu.memory_space<vmem>>, vector<1x16xf32>
    tpu.vector_store %arg5[%c1_52, %c64_53], %104 {strides = array<i32>} : memref<2x256xf32, #tpu.memory_space<vmem>>, vector<1x16xf32>,
    %106 = vector.extract_strided_slice %95 {offsets = [5, 0], sizes = [1, 16], strides = [1, 1]} : vector<16x16xf32> to vector<1x16xf32>
    %c1_54 = arith.constant 1 : index
    %c80_55 = arith.constant 80 : index
    %107 = vector.load %arg5[%c1_54, %c80_55] : memref<2x256xf32, #tpu.memory_space<vmem>>, vector<1x16xf32>
    tpu.vector_store %arg5[%c1_54, %c80_55], %106 {strides = array<i32>} : memref<2x256xf32, #tpu.memory_space<vmem>>, vector<1x16xf32>,
    %108 = vector.extract_strided_slice %95 {offsets = [6, 0], sizes = [1, 16], strides = [1, 1]} : vector<16x16xf32> to vector<1x16xf32>
    %c1_56 = arith.constant 1 : index
    %c96_57 = arith.constant 96 : index
    %109 = vector.load %arg5[%c1_56, %c96_57] : memref<2x256xf32, #tpu.memory_space<vmem>>, vector<1x16xf32>
    tpu.vector_store %arg5[%c1_56, %c96_57], %108 {strides = array<i32>} : memref<2x256xf32, #tpu.memory_space<vmem>>, vector<1x16xf32>,
    %110 = vector.extract_strided_slice %95 {offsets = [7, 0], sizes = [1, 16], strides = [1, 1]} : vector<16x16xf32> to vector<1x16xf32>
    %c1_58 = arith.constant 1 : index
    %c112_59 = arith.constant 112 : index
    %111 = vector.load %arg5[%c1_58, %c112_59] : memref<2x256xf32, #tpu.memory_space<vmem>>, vector<1x16xf32>
    tpu.vector_store %arg5[%c1_58, %c112_59], %110 {strides = array<i32>} : memref<2x256xf32, #tpu.memory_space<vmem>>, vector<1x16xf32>,
    %112 = vector.extract_strided_slice %95 {offsets = [8, 0], sizes = [1, 16], strides = [1, 1]} : vector<16x16xf32> to vector<1x16xf32>
    %c1_60 = arith.constant 1 : index
    %c128_61 = arith.constant 128 : index
    %113 = vector.load %arg5[%c1_60, %c128_61] : memref<2x256xf32, #tpu.memory_space<vmem>>, vector<1x16xf32>
    tpu.vector_store %arg5[%c1_60, %c128_61], %112 {strides = array<i32>} : memref<2x256xf32, #tpu.memory_space<vmem>>, vector<1x16xf32>,
    %114 = vector.extract_strided_slice %95 {offsets = [9, 0], sizes = [1, 16], strides = [1, 1]} : vector<16x16xf32> to vector<1x16xf32>
    %c1_62 = arith.constant 1 : index
    %c144_63 = arith.constant 144 : index
    %115 = vector.load %arg5[%c1_62, %c144_63] : memref<2x256xf32, #tpu.memory_space<vmem>>, vector<1x16xf32>
    tpu.vector_store %arg5[%c1_62, %c144_63], %114 {strides = array<i32>} : memref<2x256xf32, #tpu.memory_space<vmem>>, vector<1x16xf32>,
    %116 = vector.extract_strided_slice %95 {offsets = [10, 0], sizes = [1, 16], strides = [1, 1]} : vector<16x16xf32> to vector<1x16xf32>
    %c1_64 = arith.constant 1 : index
    %c160_65 = arith.constant 160 : index
    %117 = vector.load %arg5[%c1_64, %c160_65] : memref<2x256xf32, #tpu.memory_space<vmem>>, vector<1x16xf32>
    tpu.vector_store %arg5[%c1_64, %c160_65], %116 {strides = array<i32>} : memref<2x256xf32, #tpu.memory_space<vmem>>, vector<1x16xf32>,
    %118 = vector.extract_strided_slice %95 {offsets = [11, 0], sizes = [1, 16], strides = [1, 1]} : vector<16x16xf32> to vector<1x16xf32>
    %c1_66 = arith.constant 1 : index
    %c176_67 = arith.constant 176 : index
    %119 = vector.load %arg5[%c1_66, %c176_67] : memref<2x256xf32, #tpu.memory_space<vmem>>, vector<1x16xf32>
    tpu.vector_store %arg5[%c1_66, %c176_67], %118 {strides = array<i32>} : memref<2x256xf32, #tpu.memory_space<vmem>>, vector<1x16xf32>,
    %120 = vector.extract_strided_slice %95 {offsets = [12, 0], sizes = [1, 16], strides = [1, 1]} : vector<16x16xf32> to vector<1x16xf32>
    %c1_68 = arith.constant 1 : index
    %c192_69 = arith.constant 192 : index
    %121 = vector.load %arg5[%c1_68, %c192_69] : memref<2x256xf32, #tpu.memory_space<vmem>>, vector<1x16xf32>
    tpu.vector_store %arg5[%c1_68, %c192_69], %120 {strides = array<i32>} : memref<2x256xf32, #tpu.memory_space<vmem>>, vector<1x16xf32>,
    %122 = vector.extract_strided_slice %95 {offsets = [13, 0], sizes = [1, 16], strides = [1, 1]} : vector<16x16xf32> to vector<1x16xf32>
    %c1_70 = arith.constant 1 : index
    %c208_71 = arith.constant 208 : index
    %123 = vector.load %arg5[%c1_70, %c208_71] : memref<2x256xf32, #tpu.memory_space<vmem>>, vector<1x16xf32>
    tpu.vector_store %arg5[%c1_70, %c208_71], %122 {strides = array<i32>} : memref<2x256xf32, #tpu.memory_space<vmem>>, vector<1x16xf32>,
    %124 = vector.extract_strided_slice %95 {offsets = [14, 0], sizes = [1, 16], strides = [1, 1]} : vector<16x16xf32> to vector<1x16xf32>
    %c1_72 = arith.constant 1 : index
    %c224_73 = arith.constant 224 : index
    %125 = vector.load %arg5[%c1_72, %c224_73] : memref<2x256xf32, #tpu.memory_space<vmem>>, vector<1x16xf32>
    tpu.vector_store %arg5[%c1_72, %c224_73], %124 {strides = array<i32>} : memref<2x256xf32, #tpu.memory_space<vmem>>, vector<1x16xf32>,
    %126 = vector.extract_strided_slice %95 {offsets = [15, 0], sizes = [1, 16], strides = [1, 1]} : vector<16x16xf32> to vector<1x16xf32>
    %c1_74 = arith.constant 1 : index
    %c240_75 = arith.constant 240 : index
    %127 = vector.load %arg5[%c1_74, %c240_75] : memref<2x256xf32, #tpu.memory_space<vmem>>, vector<1x16xf32>
    tpu.vector_store %arg5[%c1_74, %c240_75], %126 {strides = array<i32>} : memref<2x256xf32, #tpu.memory_space<vmem>>, vector<1x16xf32>,
    return
  }
  func.func @transform_0(%arg0: i32) -> (i32, i32) {
    %c0_i32 = arith.constant 0 : i32
    %c0_i32_0 = arith.constant 0 : i32
    %c0_i32_1 = arith.constant 0 : i32
    return %c0_i32, %c0_i32_0 : i32, i32
  }
  func.func @transform_1(%arg0: i32) -> (i32, i32) {
    %c0_i32 = arith.constant 0 : i32
    %c0_i32_0 = arith.constant 0 : i32
    %c0_i32_1 = arith.constant 0 : i32
    return %c0_i32, %c0_i32_0 : i32, i32
  }
  func.func @transform_2(%arg0: i32) -> (i32, i32) {
    %c0_i32 = arith.constant 0 : i32
    %c0_i32_0 = arith.constant 0 : i32
    %c0_i32_1 = arith.constant 0 : i32
    return %c0_i32, %c0_i32_0 : i32, i32
  }
  func.func @transform_3(%arg0: i32) -> (i32, i32, i32) {
    %c0_i32 = arith.constant 0 : i32
    %c0_i32_0 = arith.constant 0 : i32
    %c0_i32_1 = arith.constant 0 : i32
    %c0_i32_2 = arith.constant 0 : i32
    return %c0_i32, %c0_i32_0, %c0_i32_1 : i32, i32, i32
  }
  func.func @transform_4(%arg0: i32) -> (i32, i32) {
    %c0_i32 = arith.constant 0 : i32
    %c0_i32_0 = arith.constant 0 : i32
    %c0_i32_1 = arith.constant 0 : i32
    return %c0_i32, %c0_i32_0 : i32, i32
  }
  func.func @transform_5(%arg0: i32) -> (i32, i32, i32) {
    %c0_i32 = arith.constant 0 : i32
    %c0_i32_0 = arith.constant 0 : i32
    %c0_i32_1 = arith.constant 0 : i32
    %c0_i32_2 = arith.constant 0 : i32
    return %c0_i32, %c0_i32_0, %c0_i32_1 : i32, i32, i32
  }
}

</mosaic_0001>

<bundles_post_ra>
// kernel: multilayer_hebbian_forward.2
= control target key start
LH: loop header
LB: loop body
LE: loop exit
PB: predicated region body
PF: predicated region fallthrough
CT: control target
= control target key end

     0   :  { %vm35_vm0 = vcmask 1043456   ;;  %vm31_vm1 = vcmask 293888   ;;  %v4271_v0 = vmov 0.0   ;;  %vm4272_vm2 = vmmov 0   ;;  %s6907_s0 = inlined_call_operand.vmem [shape: f32[36,128], index: 0, kind: input, shape index: {}]   ;;  %s6908_s1 = inlined_call_operand.vmem [shape: f32[8,36], index: 1, kind: input, shape index: {}]   ;;  %s6909_s2 = inlined_call_operand.vmem [shape: f32[8,1], index: 2, kind: input, shape index: {}]   ;;  %s6910_s3 = inlined_call_operand.vmem [shape: f32[8,64,64], index: 3, kind: input, shape index: {}, may-alias: {3,5}]   ;;  %s6911_s5 = inlined_call_operand.vmem [shape: f32[8,64,64], index: 5, kind: output, shape index: {1}, may-alias: {3,5}]   ;;  %s6912_s4 = inlined_call_operand.vmem [shape: f32[2,512], index: 4, kind: output, shape index: {0}]  }
   0x1   :  { %4011 = vmatprep.subr.mxu0 %v4271_v0  ;;  %v24_v1 = vld [vmem:[%s6907_s0 + $0x20] sm:$0xf]  ;;  %v23_v2 = vld [vmem:[%s6907_s0 + $0x18] sm:$0xff]  ;;  %v22_v3 = vld [vmem:[%s6907_s0 + $0x10] sm:$0xff]  ;;  %4024 = vmatprep.subr.mxu1 %v4271_v0  ;;  %v4273_v14 = vmov 0   ;;  %vm539_vm3 = vcmask 523264  }
   0x2   :  { %v37_v4 = vsel %vm35_vm0, %v24_v1, 0  ;;  %v4317_v5 = vand.u32 4294901760, %v23_v2  ;;  %v4319_v6 = vand.u32 4294901760, %v22_v3  ;;  %v21_v7 = vld [vmem:[%s6907_s0 + $0x8] sm:$0xff]  ;;  %v20_v8 = vld [vmem:[%s6907_s0] sm:$0xff]  ;;  %4021 = vmatprep.mubr.msk.f32.mxu0 %vm4272_vm2, %v4271_v0  ;;  %4034 = vmatprep.mubr.msk.f32.mxu1 %vm4272_vm2, %v4271_v0  ;;  %vm606_vm8 = vcmask 64512  }
   0x3   :  { %v19_v9 = vld [vmem:[%s6908_s1] sm:$0xff]  ;;  %v4334_v10 = vand.u32 4294901760, %v37_v4  ;;  %v4336_v11 = vand.u32 4294901760, %v21_v7  ;;  %v4338_v12 = vand.u32 4294901760, %v20_v8  ;;  %4262 = vset.pattern.permute.xlu0 %v4273_v14  ;;  %s4274_s1 = smov 64   ;;  %vm3029_vm9 = vcmask 1041409  }
   0x4   :  { %v33_v13 = vsel %vm31_vm1, %v19_v9, 0  ;;  %v25_v15 = vld [vmem:[%s6909_s2] sm:$0xff]  ;;  %v4347_v17 = vsub.f32 %v23_v2, %v4317_v5  ;;  %v4350_v18 = vsub.f32 %v22_v3, %v4319_v6  ;;  %vm3031_vm10 = vcmask 1042434  }
   0x5   :  { %v4344_v16 = vand.u32 4294901760, %v33_v13  ;;  %28 = vperm.xlu0 %4262, %v25_v15   ;;  %4012 = vmatpush3.msra.mxu0 %v4334_v10  ;;  %v143_v19 = vsub.f32 %v37_v4, %v4334_v10  ;;  %v4355_v20 = vsub.f32 %v21_v7, %v4336_v11  ;;  %v4358_v21 = vsub.f32 %v20_v8, %v4338_v12 }
   0x6   :  { %4013 = vmatprep.subr.mxu0 %v4271_v0  ;;  %v151_v23 = vand.u32 4294901760, %v4347_v17  ;;  %v158_v24 = vand.u32 4294901760, %v4350_v18  ;;  %vm3033_vm11 = vcmask 1043459   ;;  %vm3035_vm12 = vcmask 1044484  }
   0x7   :  { %v4362_v22 = vsub.f32 %v33_v13, %v4344_v16  ;;  %4014 = vmatpush3.msra.mxu0 %v4317_v5  ;;  %v144_v25 = vand.u32 4294901760, %v143_v19  ;;  %v165_v26 = vand.u32 4294901760, %v4355_v20  ;;  %v172_v31 = vand.u32 4294901760, %v4358_v21 }
   0x8   :  { %4015 = vmatprep.subr.mxu0 %v4271_v0  ;;  %v152_v28 = vsub.f32 %v4347_v17, %v151_v23  ;;  %v159_v30 = vsub.f32 %v4350_v18, %v158_v24  ;;  %vm3037_vm13 = vcmask 1045509   ;;  %vm3039_vm14 = vcmask 1046534  }
   0x9   :  { %v111_v27 = vand.u32 4294901760, %v4362_v22  ;;  %4016 = vmatpush3.msra.mxu0 %v4319_v6  ;;  %v145_v29 = vsub.f32 %v143_v19, %v144_v25  ;;  %v166_v35 = vsub.f32 %v4355_v20, %v165_v26  ;;  %v173_v38 = vsub.f32 %v4358_v21, %v172_v31 }
   0xa   :  { %4017 = vmatprep.subr.mxu0 %v4271_v0  ;;  %v153_v34 = vand.u32 4294901760, %v152_v28  ;;  %v160_v37 = vand.u32 4294901760, %v159_v30  ;;  %vm3041_vm15 = vcmask 1047559   ;;  %vm3096_vm0 = vcmask 516096  }
   0xb   :  { %v112_v32 = vsub.f32 %v4362_v22, %v111_v27  ;;  %4018 = vmatpush3.msra.mxu0 %v4336_v11  ;;  %v146_v33 = vand.u32 4294901760, %v145_v29  ;;  %v167_v39 = vand.u32 4294901760, %v166_v35  ;;  %v174_v40 = vand.u32 4294901760, %v173_v38 }
   0xc   :  { %4019 = vmatprep.subr.mxu0 %v4271_v0  ;;  %vm3111_vm1 = vcmask 1040896  }
   0xd   :  { %v113_v36 = vand.u32 4294901760, %v112_v32  ;;  %4020 = vmatpush3.msra.mxu0 %v4338_v12  ;;  %4025 = vmatpush3.msra.mxu1 %v146_v33 }
   0xe   :  { %4026 = vmatprep.subr.mxu1 %v4271_v0  ;;  %4037 = vmatprep.subr.mxu0 %v4271_v0 }
   0xf   :  { %4022 = vmatmul.mubr.f32.vlgmr.msra.gmra.mxu0 %v113_v36  ;;  %4027 = vmatpush3.msra.mxu1 %v153_v34 }
  0x10   :  { %4038 = vmatpush3.msra.mxu0 %v143_v19  ;;  %4028 = vmatprep.subr.mxu1 %v4271_v0  ;;  %v2509_v19 = vlaneseq }
  0x11   :  { %4039 = vmatprep.subr.mxu0 %v4271_v0  ;;  %4029 = vmatpush3.msra.mxu1 %v160_v37 }
  0x12   :  { %4040 = vmatpush3.msra.mxu0 %v4347_v17  ;;  %4030 = vmatprep.subr.mxu1 %v4271_v0 }
  0x13   :  { %4041 = vmatprep.subr.mxu0 %v4271_v0  ;;  %4031 = vmatpush3.msra.mxu1 %v167_v39 }
  0x14   :  { %4042 = vmatpush3.msra.mxu0 %v4350_v18  ;;  %4032 = vmatprep.subr.mxu1 %v4271_v0 }
  0x15   :  { %4043 = vmatprep.subr.mxu0 %v4271_v0  ;;  %4033 = vmatpush3.msra.mxu1 %v174_v40 }
  0x16   :  { %4044 = vmatpush3.msra.mxu0 %v4355_v20  ;;  %4035 = vmatmul.mubr.f32.vlgmr.msra.gmra.mxu1 %v4344_v16  ;;  %v4441_v20 = vshrl.u32 %v2509_v19, 7 }
  0x17   :  { %4045 = vmatprep.subr.mxu0 %v4271_v0  ;;  %4050 = vmatprep.subr.mxu1 %v4271_v0 }
  0x18   :  { %4046 = vmatpush3.msra.mxu0 %v4358_v21  ;;  %4051 = vmatpush3.msra.mxu1 %v4334_v10  ;;  %7013 = vst [vmem:[#allocation4_spill] sm:$0xff] %v4441_v20  ;;  %v2511_v21 = vsub.s32 0, %v4441_v20  ;;  %v2616_v36 = vsub.s32 3, %v4441_v20  ;;  %v2651_v38 = vsub.s32 4, %v4441_v20  ;;  %v2686_v40 = vsub.s32 5, %v4441_v20 }
  0x19   :  { %4047 = vmatprep.mubr.msk.f32.mxu0 %vm4272_vm2, %v4271_v0  ;;  %4052 = vmatprep.subr.mxu1 %v4271_v0 }
  0x1a   :  { %4063 = vmatprep.subr.mxu0 %v4271_v0  ;;  %4048 = vmatmul.mubr.f32.vlgmr.msra.gmra.mxu0 %v4362_v22 }
  0x1b   :  { %4053 = vmatpush3.msra.mxu1 %v4317_v5  ;;  %4064 = vmatpush3.msra.mxu0 %v144_v25  ;;  %v2546_v25 = vsub.s32 1, %v4441_v20 }
  0x1c   :  { %4054 = vmatprep.subr.mxu1 %v4271_v0  ;;  %4065 = vmatprep.subr.mxu0 %v4271_v0 }
  0x1d   :  { %4055 = vmatpush3.msra.mxu1 %v4319_v6  ;;  %4066 = vmatpush3.msra.mxu0 %v151_v23 }
  0x1e   :  { %4056 = vmatprep.subr.mxu1 %v4271_v0  ;;  %4067 = vmatprep.subr.mxu0 %v4271_v0 }
  0x1f   :  { %4057 = vmatpush3.msra.mxu1 %v4336_v11  ;;  %4068 = vmatpush3.msra.mxu0 %v158_v24 }
  0x20   :  { %4058 = vmatprep.subr.mxu1 %v4271_v0  ;;  %4069 = vmatprep.subr.mxu0 %v4271_v0 }
  0x21   :  { %4059 = vmatpush3.msra.mxu1 %v4338_v12  ;;  %4060 = vmatprep.mubr.msk.f32.mxu1 %vm4272_vm2, %v4271_v0 }
  0x22   :  { %4070 = vmatpush3.msra.mxu0 %v165_v26  ;;  %4061 = vmatmul.mubr.f32.vlgmr.msra.gmra.mxu1 %v111_v27 }
  0x23   :  { %4071 = vmatprep.subr.mxu0 %v4271_v0  ;;  %4076 = vmatprep.subr.mxu1 %v4271_v0 }
  0x24   :  { %4072 = vmatpush3.msra.mxu0 %v172_v31  ;;  %4073 = vmatprep.mubr.msk.f32.mxu0 %vm4272_vm2, %v4271_v0  ;;  %v2581_v31 = vsub.s32 2, %v4441_v20 }
  0x25   :  { %4077 = vmatpush3.msra.mxu1 %v4334_v10  ;;  %4074 = vmatmul.mubr.f32.vlgmr.msra.gmra.mxu0 %v4344_v16 }
  0x26   :  { %4078 = vmatprep.subr.mxu1 %v4271_v0  ;;  %4086 = vmatprep.mubr.msk.f32.mxu1 %vm4272_vm2, %v4271_v0 }
  0x27   :  { %4079 = vmatpush3.msra.mxu1 %v4317_v5 }
  0x28   :  { %4080 = vmatprep.subr.mxu1 %v4271_v0 }
  0x29   :  { %4081 = vmatpush3.msra.mxu1 %v4319_v6 }
  0x2a   :  { %4082 = vmatprep.subr.mxu1 %v4271_v0 }
  0x2b   :  { %4083 = vmatpush3.msra.mxu1 %v4336_v11 }
  0x2c   :  { %4084 = vmatprep.subr.mxu1 %v4271_v0 }
  0x2d   :  { %4085 = vmatpush3.msra.mxu1 %v4338_v12 }
  0x2e   :  { %4087 = vmatmul.mubr.f32.vlgmr.msra.gmra.mxu1 %v4344_v16 }
  0x80   :  { %v29_v46 = vpop.permute.xlu0 %28 }
  0xcf   :  { %v115_v41 = vpop.f32.mrf.mxu0 }
  0xd0   :  { %v116_v48 = vadd.f32 %v115_v41, %v29_v46 }
  0xd1   :  { %v4023_v42 = vpop.f32.mrf.mxu0 }
  0xd2   :  { %v2721_v42 = vsub.s32 6, %v4441_v20 }
  0xd6   :  { %v211_v43 = vpop.f32.mrf.mxu1 }
  0xd7   :  { %v212_v50 = vadd.f32 %v211_v43, %v116_v48 }
  0xd8   :  { %v4036_v44 = vpop.f32.mrf.mxu1 }
  0xd9   :  { %v2756_v44 = vsub.s32 7, %v4441_v20 }
  0xda   :  { %v293_v45 = vpop.f32.mrf.mxu0 }
  0xdb   :  { %v294_v53 = vadd.f32 %v293_v45, %v212_v50 }
  0xdc   :  { %v4049_v47 = vpop.f32.mrf.mxu0 }
  0xe2   :  { %v371_v49 = vpop.f32.mrf.mxu1 }
  0xe3   :  { %v372_v55 = vadd.f32 %v371_v49, %v294_v53 }
  0xe4   :  { %v4062_v51 = vpop.f32.mrf.mxu1 }
  0xe5   :  { %v457_v52 = vpop.f32.mrf.mxu0 }
  0xe6   :  { %v458_v56 = vadd.f32 %v457_v52, %v372_v55 }
  0xe7   :  { %v4075_v54 = vpop.f32.mrf.mxu0 }
  0xee   :  { %v533_v57 = vpop.f32.mrf.mxu1 }
  0xef   :  { %v534_v58 = vadd.f32 %v533_v57, %v458_v56 }
  0xf0   :  { %v4088_v59 = vpop.f32.mrf.mxu1 }
  0xf1   :  { %v537_v60 = vmax.f32 %v534_v58, 0.0 }
  0xf3   :  { %v538_v61 = vmul.f32 %v537_v60, %v537_v60 }
  0xf5   :  { %554 = vrot.lane.b32.xlu0 %v538_v61, %s4274_s1  ;;  %v540_v0 = vsel %vm539_vm3, %v538_v61, 0.0 }
 0x167   :  { %v555_v62 = vpop.permute.xlu0 %554 }
 0x168   :  { %v557_v63 = vsel %vm539_vm3, %v555_v62, 0.0 }
 0x169   :  { %558 = vadd.xlane.f32.xlu1 %v557_v63 }
 0x16d   :  { %541 = vadd.xlane.f32.xlu1 %v540_v0 }
 0x1f2   :  { %v559_v1 = vpop.xlane.xlu1 %558 }
 0x1f3   :  { %4263 = vrsqrt.f32 %v559_v1  ;;  %vm562_vm4 = vcmp.eq.f32.partialorder %v559_v1, inf  ;;  %v565_v4 = vand.u32 2147483648, %v559_v1  ;;  %vm564_vm5 = vcmp.eq.f32.partialorder %v559_v1, 0.0 }
 0x1f6   :  { %v542_v5 = vpop.xlane.xlu1 %541 }
 0x1f7   :  { %4265 = vrsqrt.f32 %v542_v5  ;;  %vm545_vm6 = vcmp.eq.f32.partialorder %v542_v5, inf  ;;  %v548_v14 = vand.u32 2147483648, %v542_v5  ;;  %vm547_vm7 = vcmp.eq.f32.partialorder %v542_v5, 0.0 }
 0x200   :  { %v4264_v2 = vpop.eup %4263 }
 0x201   :  { %v561_v3 = vmul.f32 %v4264_v2, %v559_v1 }
 0x203   :  { %v563_v6 = vsel %vm562_vm4, %v559_v1, %v561_v3 }
 0x204   :  { %v566_v7 = vsel %vm564_vm5, %v565_v4, %v563_v6  ;;  %v4266_v9 = vpop.eup %4265 }
 0x205   :  { %v567_v8 = vadd.f32 1e-06, %v566_v7  ;;  %v544_v12 = vmul.f32 %v4266_v9, %v542_v5 }
 0x207   :  { %4267 = vrcp.f32 %v567_v8  ;;  %v546_v13 = vsel %vm545_vm6, %v542_v5, %v544_v12 }
 0x208   :  { %v549_v15 = vsel %vm547_vm7, %v548_v14, %v546_v13 }
 0x209   :  { %v550_v16 = vadd.f32 1e-06, %v549_v15 }
 0x20b   :  { %4269 = vrcp.f32 %v550_v16 }
 0x214   :  { %v4268_v10 = vpop.eup %4267 }
 0x215   :  { %v4434_v11 = vmul.f32 %v4268_v10, %v537_v60 }
 0x217   :  { %7011 = vst [vmem:[#allocation2_spill] sm:$0xff] %v4434_v11  ;;  %571 = vrot.lane.b32.xlu0 %v4434_v11, %s4274_s1  ;;  %v4468_v33 = vrot.slane %v4434_v11, %v2511_v21  ;;  %v4472_v34 = vrot.slane %v4434_v11, %v2546_v25  ;;  %v4476_v35 = vrot.slane %v4434_v11, %v2581_v31 }
 0x218   :  { %v4270_v17 = vpop.eup %4269  ;;  %v4484_v37 = vrot.slane %v4434_v11, %v2616_v36  ;;  %v4492_v39 = vrot.slane %v4434_v11, %v2651_v38  ;;  %v4500_v41 = vrot.slane %v4434_v11, %v2686_v40  ;;  %v4508_v43 = vrot.slane %v4434_v11, %v2721_v42 }
 0x219   :  { %v4438_v18 = vmul.f32 %v4270_v17, %v537_v60  ;;  %v4517_v45 = vrot.slane %v4434_v11, %v2756_v44 }
 0x21b   :  { %7012 = vst [vmem:[#allocation3_spill] sm:$0xff] %v4438_v18  ;;  %v2512_v22 = vrot.slane %v4438_v18, %v2511_v21  ;;  %v2547_v27 = vrot.slane %v4438_v18, %v2546_v25  ;;  %v4463_v32 = vrot.slane %v4438_v18, %v2581_v31 }
 0x235   :  { %1378 = vxpose.xlu0.b32.start.end [1/1] (short) (narrow) %v4438_v18, 64 }
 0x27a   :  { %2514 = vbcast.lane.b32.xlu0 %v2512_v22, 256 }
 0x27e   :  { %2522 = vbcast.lane.b32.xlu0 %v2512_v22, 272 }
 0x282   :  { %2526 = vbcast.lane.b32.xlu0 %v2512_v22, 280 }
 0x286   :  { %2534 = vbcast.lane.b32.xlu0 %v2512_v22, 296 }
 0x289   :  { %v572_v23 = vpop.permute.xlu0 %571 }
 0x28a   :  { %v4445_v24 = vand.u32 4294901760, %v572_v23  ;;  %574 = vxpose.xlu1.b32.start.end [1/1] (short) (narrow) %v572_v23, 64  ;;  %2542 = vbcast.lane.b32.xlu0 %v2512_v22, 312 }
 0x28c   :  { %v4449_v26 = vsub.f32 %v572_v23, %v4445_v24  ;;  %4089 = vmatprep.subr.mxu0 %v4445_v24 }
 0x28d   :  { %4090 = vmatpush3.msra.mxu0 %v4445_v24 }
 0x28e   :  { %4117 = vmatprep.subr.mxu0 %v4449_v26  ;;  %2553 = vbcast.lane.b32.xlu0 %v2547_v27, 264  ;;  %v4456_v28 = vand.u32 4294901760, %v4449_v26 }
 0x290   :  { %v811_v29 = vsub.f32 %v4449_v26, %v4456_v28 }
 0x292   :  { %2561 = vbcast.lane.b32.xlu0 %v2547_v27, 280  ;;  %v812_v30 = vand.u32 4294901760, %v811_v29 }
 0x294   :  { %4103 = vmatprep.subr.mxu1 %v812_v30 }
 0x295   :  { %4104 = vmatpush3.msra.mxu1 %v812_v30 }
 0x296   :  { %4131 = vmatprep.subr.mxu1 %v4445_v24  ;;  %2569 = vbcast.lane.b32.xlu0 %v2547_v27, 296 }
 0x29a   :  { %2577 = vbcast.lane.b32.xlu0 %v2547_v27, 312 }
 0x29e   :  { %2588 = vbcast.lane.b32.xlu0 %v4463_v32, 264 }
 0x2a2   :  { %2596 = vbcast.lane.b32.xlu0 %v4463_v32, 280 }
 0x2a6   :  { %3153 = vbcast.lane.b32.xlu0 %v4468_v33, 320 }
 0x2aa   :  { %3189 = vbcast.lane.b32.xlu0 %v4472_v34, 320 }
 0x2ae   :  { %3225 = vbcast.lane.b32.xlu0 %v4476_v35, 320 }
 0x2b1   :  { %v4529_v46 = vpop.trf.xlu0 }
 0x2b2   :  { %3161 = vbcast.lane.b32.xlu0 %v4468_v33, 336 }
 0x2b5   :  { %v4534_v47 = vpop.trf.xlu0 }
 0x2b6   :  { %3261 = vbcast.lane.b32.xlu0 %v4484_v37, 320 }
 0x2b9   :  { %v4539_v48 = vpop.trf.xlu0 }
 0x2ba   :  { %3233 = vbcast.lane.b32.xlu0 %v4476_v35, 336 }
 0x2bd   :  { %v4544_v49 = vpop.trf.xlu0 }
 0x2be   :  { %3301 = vbcast.lane.b32.xlu0 %v4492_v39, 328 }
 0x2c1   :  { %v4550_v52 = vpop.trf.xlu0 }
 0x2c2   :  { %3201 = vbcast.lane.b32.xlu0 %v4472_v34, 344 }
 0x2c4   :  { %2518 = vbcast.lane.b32.xlu1 %v2512_v22, 264 }
 0x2c5   :  { %v4565_v59 = vpop.trf.xlu0 }
 0x2c6   :  { %3333 = vbcast.lane.b32.xlu0 %v4500_v41, 320 }
 0x2c8   :  { %2530 = vbcast.lane.b32.xlu1 %v2512_v22, 288 }
 0x2c9   :  { %v4591_v7 = vpop.trf.xlu0 }
 0x2ca   :  { %3237 = vbcast.lane.b32.xlu0 %v4476_v35, 344 }
 0x2cc   :  { %2538 = vbcast.lane.b32.xlu1 %v2512_v22, 304 }
 0x2cd   :  { %v4612_v21 = vpop.trf.xlu0 }
 0x2ce   :  { %3369 = vbcast.lane.b32.xlu0 %v4508_v43, 320 }
 0x2d0   :  { %2549 = vbcast.lane.b32.xlu1 %v2547_v27, 256 }
 0x2d2   :  { %3169 = vbcast.lane.b32.xlu0 %v4468_v33, 352 }
 0x2d4   :  { %2557 = vbcast.lane.b32.xlu1 %v2547_v27, 272 }
 0x2d6   :  { %3273 = vbcast.lane.b32.xlu0 %v4484_v37, 344 }
 0x2d8   :  { %2565 = vbcast.lane.b32.xlu1 %v2547_v27, 288 }
 0x2da   :  { %3405 = vbcast.lane.b32.xlu0 %v4517_v45, 320 }
 0x2dc   :  { %2573 = vbcast.lane.b32.xlu1 %v2547_v27, 304  ;;  %v4624_v27 = vand.u32 4294901760, %v4438_v18 }
 0x2de   :  { %3241 = vbcast.lane.b32.xlu0 %v4476_v35, 352 }
 0x2e0   :  { %2584 = vbcast.lane.b32.xlu1 %v4463_v32, 256 }
 0x2e2   :  { %3377 = vbcast.lane.b32.xlu0 %v4508_v43, 336 }
 0x2e4   :  { %2592 = vbcast.lane.b32.xlu1 %v4463_v32, 272 }
 0x2e6   :  { %3209 = vbcast.lane.b32.xlu0 %v4472_v34, 360 }
 0x2e8   :  { %2600 = vbcast.lane.b32.xlu1 %v4463_v32, 288 }
 0x2ea   :  { %3345 = vbcast.lane.b32.xlu0 %v4500_v41, 344 }
 0x2ec   :  { %3157 = vbcast.lane.b32.xlu1 %v4468_v33, 328 }
 0x2ee   :  { %3245 = vbcast.lane.b32.xlu0 %v4476_v35, 360 }
 0x2f0   :  { %3193 = vbcast.lane.b32.xlu1 %v4472_v34, 328 }
 0x2f2   :  { %3381 = vbcast.lane.b32.xlu0 %v4508_v43, 344 }
 0x2f4   :  { %3229 = vbcast.lane.b32.xlu1 %v4476_v35, 328 }
 0x2f6   :  { %3213 = vbcast.lane.b32.xlu0 %v4472_v34, 368 }
 0x2f8   :  { %3197 = vbcast.lane.b32.xlu1 %v4472_v34, 336 }
 0x2fa   :  { %3349 = vbcast.lane.b32.xlu0 %v4500_v41, 352 }
 0x2fc   :  { %3265 = vbcast.lane.b32.xlu1 %v4484_v37, 328 }
 0x2fe   :  { %3249 = vbcast.lane.b32.xlu0 %v4476_v35, 368 }
 0x300   :  { %3297 = vbcast.lane.b32.xlu1 %v4492_v39, 320 }
 0x302   :  { %3385 = vbcast.lane.b32.xlu0 %v4508_v43, 352 }
 0x304   :  { %3165 = vbcast.lane.b32.xlu1 %v4468_v33, 344 }
 0x306   :  { %3217 = vbcast.lane.b32.xlu0 %v4472_v34, 376  ;;  %v590_v50 = vpop.trf.xlu1 }
 0x307   :  { %v608_v51 = vsel %vm606_vm8, %v590_v50, 0 }
 0x308   :  { %v4552_v53 = vand.u32 4294901760, %v608_v51  ;;  %3269 = vbcast.lane.b32.xlu1 %v4484_v37, 336 }
 0x30a   :  { %v4556_v54 = vsub.f32 %v608_v51, %v4552_v53  ;;  %3353 = vbcast.lane.b32.xlu0 %v4500_v41, 360  ;;  %4105 = vmatprep.mubr.f32.mxu1 %v4552_v53  ;;  %v591_v55 = vpop.trf.xlu1 }
 0x30b   :  { %v611_v56 = vsel %vm606_vm8, %v591_v55, 0  ;;  %v4639_v55 = vsub.f32 %v4438_v18, %v4624_v27 }
 0x30c   :  { %v4561_v57 = vand.u32 4294901760, %v611_v56  ;;  %3337 = vbcast.lane.b32.xlu1 %v4500_v41, 328  ;;  %v699_v58 = vand.u32 4294901760, %v4556_v54 }
 0x30e   :  { %v4568_v60 = vsub.f32 %v611_v56, %v4561_v57  ;;  %3253 = vbcast.lane.b32.xlu0 %v4476_v35, 376  ;;  %4106 = vmatmul.mubr.f32.vlgmr.msra.gmra.mxu1 %v4561_v57  ;;  %v592_v61 = vpop.trf.xlu1  ;;  %v700_v62 = vsub.f32 %v4556_v54, %v699_v58  ;;  %v4641_v56 = vpop.permute.xlu0 %2514 }
 0x30f   :  { %4132 = vmatpush3.msra.mxu1 %v4445_v24  ;;  %v614_v63 = vsel %vm606_vm8, %v592_v61, 0  ;;  %7014 = vst [vmem:[#allocation5_spill] sm:$0xff] %v4641_v56 }
 0x310   :  { %v709_v0 = vand.u32 4294901760, %v4568_v60  ;;  %v4578_v1 = vand.u32 4294901760, %v614_v63  ;;  %4159 = vmatprep.subr.mxu1 %v4445_v24  ;;  %3305 = vbcast.lane.b32.xlu1 %v4492_v39, 336  ;;  %v701_v2 = vand.u32 4294901760, %v700_v62 }
 0x312   :  { %v710_v3 = vsub.f32 %v4568_v60, %v709_v0  ;;  %v4586_v4 = vsub.f32 %v614_v63, %v4578_v1  ;;  %3389 = vbcast.lane.b32.xlu0 %v4508_v43, 360  ;;  %4091 = vmatprep.mubr.f32.mxu0 %v701_v2  ;;  %v593_v5 = vpop.trf.xlu1 }
 0x313   :  { %4108 = vmatprep.mubr.f32.mxu1 %v4578_v1  ;;  %v617_v6 = vsel %vm606_vm8, %v593_v5, 0 }
 0x314   :  { %v4593_v8 = vand.u32 4294901760, %v617_v6  ;;  %3373 = vbcast.lane.b32.xlu1 %v4508_v43, 328  ;;  %v711_v9 = vand.u32 4294901760, %v710_v3  ;;  %v719_v10 = vand.u32 4294901760, %v4586_v4 }
 0x316   :  { %v4598_v12 = vsub.f32 %v617_v6, %v4593_v8  ;;  %3357 = vbcast.lane.b32.xlu0 %v4500_v41, 368  ;;  %4092 = vmatmul.mubr.f32.vlgmr.msra.gmra.mxu0 %v711_v9  ;;  %v594_v13 = vpop.trf.xlu1  ;;  %v720_v14 = vsub.f32 %v4586_v4, %v719_v10  ;;  %v4655_v6 = vand.u32 4294901760, %v4639_v55 }
 0x317   :  { %4109 = vmatmul.mubr.f32.gmra.mxu1 %v4593_v8  ;;  %4118 = vmatpush3.msra.mxu0 %v4449_v26  ;;  %v620_v15 = vsel %vm606_vm8, %v594_v13, 0  ;;  %v4663_v13 = vrot.slane %v4438_v18, %v2616_v36  ;;  %v4680_v36 = vrot.slane %v4438_v18, %v2651_v38 }
 0x318   :  { %v4607_v16 = vand.u32 4294901760, %v620_v15  ;;  %4145 = vmatprep.subr.mxu0 %v4456_v28  ;;  %3205 = vbcast.lane.b32.xlu1 %v4472_v34, 352  ;;  %v721_v17 = vand.u32 4294901760, %v720_v14  ;;  %v729_v19 = vand.u32 4294901760, %v4598_v12 }
 0x31a   :  { %v4615_v22 = vsub.f32 %v620_v15, %v4607_v16  ;;  %3325 = vbcast.lane.b32.xlu0 %v4492_v39, 376  ;;  %4094 = vmatprep.mubr.f32.mxu0 %v721_v17  ;;  %v595_v23 = vpop.trf.xlu1  ;;  %v730_v25 = vsub.f32 %v4598_v12, %v729_v19  ;;  %v4666_v17 = vpop.permute.xlu0 %2522 }
 0x31b   :  { %4111 = vmatprep.mubr.f32.mxu1 %v4607_v16  ;;  %v623_v26 = vsel %vm606_vm8, %v595_v23, 0  ;;  %7015 = vst [vmem:[#allocation6_spill] sm:$0xff] %v4666_v17 }
 0x31c   :  { %v4626_v29 = vand.u32 4294901760, %v623_v26  ;;  %3341 = vbcast.lane.b32.xlu1 %v4500_v41, 336  ;;  %v731_v30 = vand.u32 4294901760, %v730_v25  ;;  %v739_v31 = vand.u32 4294901760, %v4615_v22 }
 0x31e   :  { %v4631_v34 = vsub.f32 %v623_v26, %v4626_v29  ;;  %3361 = vbcast.lane.b32.xlu0 %v4500_v41, 376  ;;  %4095 = vmatmul.mubr.f32.gmra.mxu0 %v731_v30  ;;  %v596_v35 = vpop.trf.xlu1  ;;  %v740_v50 = vsub.f32 %v4615_v22, %v739_v31  ;;  %v1614_v26 = vsub.f32 %v4639_v55, %v4655_v6 }
 0x31f   :  { %4112 = vmatmul.mubr.f32.gmra.mxu1 %v4626_v29  ;;  %v626_v51 = vsel %vm606_vm8, %v596_v35, 0 }
 0x320   :  { %v4643_v61 = vand.u32 4294901760, %v626_v51  ;;  %3409 = vbcast.lane.b32.xlu1 %v4517_v45, 328  ;;  %v741_v62 = vand.u32 4294901760, %v740_v50  ;;  %v749_v41 = vand.u32 4294901760, %v4631_v34 }
 0x322   :  { %v4648_v63 = vsub.f32 %v626_v51, %v4643_v61  ;;  %3397 = vbcast.lane.b32.xlu0 %v4508_v43, 376  ;;  %4097 = vmatprep.mubr.f32.mxu0 %v741_v62  ;;  %v597_v2 = vpop.trf.xlu1  ;;  %v750_v3 = vsub.f32 %v4631_v34, %v749_v41  ;;  %v1615_v51 = vand.u32 4294901760, %v1614_v26  ;;  %v4685_v62 = vpop.permute.xlu0 %2526 }
 0x323   :  { %4114 = vmatprep.mubr.f32.mxu1 %v4643_v61  ;;  %v629_v5 = vsel %vm606_vm8, %v597_v2, 0  ;;  %7016 = vst [vmem:[#allocation7_spill] sm:$0xff] %v4685_v62 }
 0x324   :  { %v4657_v9 = vand.u32 4294901760, %v629_v5  ;;  %3309 = vbcast.lane.b32.xlu1 %v4492_v39, 344  ;;  %v751_v14 = vand.u32 4294901760, %v750_v3  ;;  %v759_v15 = vand.u32 4294901760, %v4648_v63 }
 0x326   :  { %v768_v23 = vsub.f32 %v629_v5, %v4657_v9  ;;  %2619 = vbcast.lane.b32.xlu0 %v4663_v13, 256  ;;  %4098 = vmatmul.mubr.f32.gmra.mxu0 %v751_v14  ;;  %v760_v25 = vsub.f32 %v4648_v63, %v759_v15  ;;  %v4701_v38 = vpop.permute.xlu0 %2534 }
 0x327   :  { %4115 = vmatmul.mubr.f32.gmra.mxu1 %v4657_v9  ;;  %7017 = vst [vmem:[#allocation8_spill] sm:$0xff] %v4701_v38 }
 0x328   :  { %4133 = vmatprep.mubr.f32.mxu1 %v699_v58  ;;  %3173 = vbcast.lane.b32.xlu1 %v4468_v33, 360  ;;  %v761_v30 = vand.u32 4294901760, %v760_v25  ;;  %v769_v35 = vand.u32 4294901760, %v768_v23 }
 0x32a   :  { %2654 = vbcast.lane.b32.xlu0 %v4680_v36, 256  ;;  %4100 = vmatprep.mubr.f32.mxu0 %v761_v30  ;;  %v770_v50 = vsub.f32 %v768_v23, %v769_v35 }
 0x32b   :  { %4134 = vmatmul.mubr.f32.vlgmr.msra.gmra.mxu1 %v709_v0 }
 0x32c   :  { %4160 = vmatpush3.msra.mxu1 %v4445_v24  ;;  %4136 = vmatprep.mubr.f32.mxu1 %v719_v10  ;;  %v771_v58 = vand.u32 4294901760, %v770_v50  ;;  %v4698_v24 = vrot.slane %v4438_v18, %v2686_v40  ;;  %v1417_v10 = vsel %vm606_vm8, %v4539_v48, 0  ;;  %v1423_v48 = vsel %vm606_vm8, %v4550_v52, 0 }
 0x32d   :  { %4187 = vmatprep.subr.mxu1 %v1615_v51  ;;  %3277 = vbcast.lane.b32.xlu1 %v4484_v37, 352  ;;  %v4776_v52 = vand.u32 4294901760, %v1423_v48 }
 0x32e   :  { %2627 = vbcast.lane.b32.xlu0 %v4663_v13, 272  ;;  %4101 = vmatmul.mubr.f32.gmra.mxu0 %v771_v58 }
 0x32f   :  { %4137 = vmatmul.mubr.f32.gmra.mxu1 %v729_v19  ;;  %4119 = vmatprep.mubr.f32.mxu0 %v4556_v54  ;;  %v4710_v54 = vrot.slane %v4438_v18, %v2721_v42  ;;  %v1411_v42 = vsel %vm606_vm8, %v4529_v46, 0  ;;  %v1414_v46 = vsel %vm606_vm8, %v4534_v47, 0  ;;  %v1420_v19 = vsel %vm606_vm8, %v4544_v49, 0 }
 0x330   :  { %4139 = vmatprep.mubr.f32.mxu1 %v739_v31  ;;  %v4735_v0 = vand.u32 4294901760, %v1411_v42  ;;  %v4770_v31 = vand.u32 4294901760, %v1420_v19  ;;  %v4802_v5 = vsub.f32 %v1423_v48, %v4776_v52 }
 0x331   :  { %3413 = vbcast.lane.b32.xlu1 %v4517_v45, 336 }
 0x332   :  { %2693 = vbcast.lane.b32.xlu0 %v4698_v24, 264  ;;  %4120 = vmatmul.mubr.f32.vlgmr.msra.gmra.mxu0 %v4568_v60  ;;  %v4733_v60 = vrot.slane %v4438_v18, %v2756_v44  ;;  %v4750_v44 = vand.u32 4294901760, %v1414_v46  ;;  %v4754_v47 = vsub.f32 %v1411_v42, %v4735_v0  ;;  %v4796_v2 = vsub.f32 %v1420_v19, %v4770_v31 }
 0x333   :  { %4140 = vmatmul.mubr.f32.gmra.mxu1 %v749_v41  ;;  %4146 = vmatpush3.msra.mxu0 %v4456_v28  ;;  %v4717_v28 = vpop.permute.xlu0 %2542  ;;  %v1542_v30 = vand.u32 4294901760, %v4802_v5 }
 0x334   :  { %4122 = vmatprep.mubr.f32.mxu0 %v4586_v4  ;;  %4142 = vmatprep.mubr.f32.mxu1 %v759_v15  ;;  %7018 = vst [vmem:[#allocation9_spill] sm:$0xff] %v4717_v28  ;;  %v1502_v41 = vand.u32 4294901760, %v4754_v47 }
 0x335   :  { %4173 = vmatprep.subr.mxu0 %v4624_v27  ;;  %3313 = vbcast.lane.b32.xlu1 %v4492_v39, 352 }
 0x336   :  { %2724 = vbcast.lane.b32.xlu0 %v4710_v54, 256  ;;  %4123 = vmatmul.mubr.f32.gmra.mxu0 %v4598_v12  ;;  %v4720_v40 = vpop.permute.xlu1 %2518 }
 0x337   :  { %4143 = vmatmul.mubr.f32.gmra.mxu1 %v769_v35  ;;  %4125 = vmatprep.mubr.f32.mxu0 %v4615_v22  ;;  %7019 = vst [vmem:[#allocation10_spill] sm:$0xff] %v4720_v40  ;;  %v4741_v4 = vpop.permute.xlu0 %2553  ;;  %v4759_v22 = vand.u32 4294901760, %v1417_v10 }
 0x338   :  { %4161 = vmatprep.mubr.f32.mxu1 %v4552_v53  ;;  %7020 = vst [vmem:[#allocation11_spill] sm:$0xff] %v4741_v4 }
 0x339   :  { %3177 = vbcast.lane.b32.xlu1 %v4468_v33, 368 }
 0x33a   :  { %2631 = vbcast.lane.b32.xlu0 %v4663_v13, 280  ;;  %4126 = vmatmul.mubr.f32.gmra.mxu0 %v4631_v34  ;;  %v4746_v12 = vpop.permute.xlu1 %2530 }
 0x33b   :  { %4162 = vmatmul.mubr.f32.vlgmr.msra.gmra.mxu1 %v4561_v57  ;;  %4128 = vmatprep.mubr.f32.mxu0 %v4648_v63  ;;  %7021 = vst [vmem:[#allocation12_spill] sm:$0xff] %v4746_v12  ;;  %v4772_v49 = vpop.permute.xlu0 %2561  ;;  %v4786_v63 = vsub.f32 %v1417_v10, %v4759_v22 }
 0x33c   :  { %4188 = vmatpush3.msra.mxu1 %v1615_v51  ;;  %4164 = vmatprep.mubr.f32.mxu1 %v4578_v1  ;;  %7022 = vst [vmem:[#allocation13_spill] sm:$0xff] %v4772_v49 }
 0x33d   :  { %4215 = vmatprep.subr.mxu1 %v4624_v27  ;;  %3281 = vbcast.lane.b32.xlu1 %v4484_v37, 360  ;;  %v1522_v15 = vand.u32 4294901760, %v4786_v63 }
 0x33e   :  { %2759 = vbcast.lane.b32.xlu0 %v4733_v60, 256  ;;  %4129 = vmatmul.mubr.f32.gmra.mxu0 %v768_v23  ;;  %v4780_v34 = vpop.permute.xlu1 %2538 }
 0x33f   :  { %4165 = vmatmul.mubr.f32.gmra.mxu1 %v4593_v8  ;;  %4147 = vmatprep.mubr.f32.mxu0 %v4552_v53  ;;  %v4768_v53 = vsub.f32 %v1414_v46, %v4750_v44  ;;  %7023 = vst [vmem:[#allocation14_spill] sm:$0xff] %v4780_v34  ;;  %v4812_v14 = vpop.permute.xlu0 %2569  ;;  %v1523_v35 = vsub.f32 %v4786_v63, %v1522_v15 }
 0x340   :  { %4167 = vmatprep.mubr.f32.mxu1 %v4607_v16  ;;  %7024 = vst [vmem:[#allocation15_spill] sm:$0xff] %v4812_v14 }
 0x341   :  { %3417 = vbcast.lane.b32.xlu1 %v4517_v45, 344  ;;  %v1524_v48 = vand.u32 4294901760, %v1523_v35 }
 0x342   :  { %2666 = vbcast.lane.b32.xlu0 %v4680_v36, 280  ;;  %4148 = vmatmul.mubr.f32.vlgmr.msra.gmra.mxu0 %v4561_v57  ;;  %v1426_v57 = vsel %vm606_vm8, %v4565_v59, 0  ;;  %v1512_v59 = vand.u32 4294901760, %v4768_v53  ;;  %v4817_v23 = vpop.permute.xlu1 %2549 }
 0x343   :  { %4168 = vmatmul.mubr.f32.gmra.mxu1 %v4626_v29  ;;  %4174 = vmatpush3.msra.mxu0 %v4624_v27  ;;  %v4798_v3 = vand.u32 4294901760, %v1426_v57  ;;  %7025 = vst [vmem:[#allocation16_spill] sm:$0xff] %v4817_v23  ;;  %v4845_v58 = vpop.permute.xlu0 %2577 }
 0x344   :  { %4150 = vmatprep.mubr.f32.mxu0 %v4578_v1  ;;  %4170 = vmatprep.mubr.f32.mxu1 %v4643_v61  ;;  %v1429_v1 = vsel %vm606_vm8, %v4591_v7, 0  ;;  %7026 = vst [vmem:[#allocation17_spill] sm:$0xff] %v4845_v58 }
 0x345   :  { %4201 = vmatprep.subr.mxu0 %v4639_v55  ;;  %3317 = vbcast.lane.b32.xlu1 %v4492_v39, 360  ;;  %v4804_v7 = vand.u32 4294901760, %v1429_v1 }
 0x346   :  { %2635 = vbcast.lane.b32.xlu0 %v4663_v13, 288  ;;  %4151 = vmatmul.mubr.f32.gmra.mxu0 %v4593_v8  ;;  %v1432_v8 = vsel %vm606_vm8, %v4612_v21, 0  ;;  %v4825_v21 = vsub.f32 %v1426_v57, %v4798_v3  ;;  %v4850_v10 = vpop.permute.xlu1 %2557 }
 0x347   :  { %4171 = vmatmul.mubr.f32.gmra.mxu1 %v4657_v9  ;;  %4153 = vmatprep.mubr.f32.mxu0 %v4607_v16  ;;  %v1503_v16 = vsub.f32 %v4754_v47, %v1502_v41  ;;  %v4827_v25 = vand.u32 4294901760, %v1432_v8  ;;  %v4833_v26 = vsub.f32 %v1429_v1, %v4804_v7  ;;  %7027 = vst [vmem:[#allocation18_spill] sm:$0xff] %v4850_v10 }
 0x348   :  { %4189 = vmatprep.mubr.f32.mxu1 %v4735_v0  ;;  %v1552_v46 = vand.u32 4294901760, %v4825_v21 }
 0x349   :  { %3181 = vbcast.lane.b32.xlu1 %v4468_v33, 376  ;;  %v1513_v33 = vsub.f32 %v4768_v53, %v1512_v59  ;;  %v4843_v51 = vsub.f32 %v1432_v8, %v4827_v25  ;;  %v1562_v19 = vand.u32 4294901760, %v4833_v26 }
 0x34a   :  { %2767 = vbcast.lane.b32.xlu0 %v4733_v60, 272  ;;  %4154 = vmatmul.mubr.f32.gmra.mxu0 %v4626_v29  ;;  %v1532_v29 = vand.u32 4294901760, %v4796_v2  ;;  %v1553_v1 = vsub.f32 %v4825_v21, %v1552_v46 }
 0x34b   :  { %4190 = vmatmul.mubr.f32.vlgmr.msra.gmra.mxu1 %v4750_v44  ;;  %4156 = vmatprep.mubr.f32.mxu0 %v4643_v61  ;;  %v1504_v61 = vand.u32 4294901760, %v1503_v16  ;;  %v1514_v50 = vand.u32 4294901760, %v1513_v33  ;;  %v1572_v8 = vand.u32 4294901760, %v4843_v51  ;;  %v1563_v33 = vsub.f32 %v4833_v26, %v1562_v19 }
 0x34c   :  { %4216 = vmatpush3.msra.mxu1 %v4624_v27  ;;  %4192 = vmatprep.mubr.f32.mxu1 %v4759_v22  ;;  %v1533_v42 = vsub.f32 %v4796_v2, %v1532_v29  ;;  %v1554_v35 = vand.u32 4294901760, %v1553_v1 }
 0x34d   :  { %4243 = vmatprep.subr.mxu1 %v4624_v27  ;;  %3285 = vbcast.lane.b32.xlu1 %v4484_v37, 368 }
 0x34e   :  { %2670 = vbcast.lane.b32.xlu0 %v4680_v36, 288  ;;  %4157 = vmatmul.mubr.f32.gmra.mxu0 %v4657_v9  ;;  %v1543_v9 = vsub.f32 %v4802_v5, %v1542_v30  ;;  %v1534_v57 = vand.u32 4294901760, %v1533_v42 }
 0x34f   :  { %4193 = vmatmul.mubr.f32.gmra.mxu1 %v4770_v31  ;;  %4175 = vmatprep.mubr.f32.mxu0 %v1504_v61  ;;  %v4864_v61 = vpop.permute.xlu0 %2588 }
 0x350   :  { %4195 = vmatprep.mubr.f32.mxu1 %v4776_v52  ;;  %v1544_v16 = vand.u32 4294901760, %v1543_v9  ;;  %7028 = vst [vmem:[#allocation19_spill] sm:$0xff] %v4864_v61 }
 0x351   :  { %3421 = vbcast.lane.b32.xlu1 %v4517_v45, 352 }
 0x352   :  { %2639 = vbcast.lane.b32.xlu0 %v4663_v13, 296  ;;  %4176 = vmatmul.mubr.f32.vlgmr.msra.gmra.mxu0 %v1514_v50  ;;  %v1573_v50 = vsub.f32 %v4843_v51, %v1572_v8 }
 0x353   :  { %4196 = vmatmul.mubr.f32.gmra.mxu1 %v4798_v3  ;;  %4202 = vmatpush3.msra.mxu0 %v4639_v55  ;;  %v4867_v55 = vpop.permute.xlu1 %2565  ;;  %v4877_v42 = vpop.permute.xlu0 %2596 }
 0x354   :  { %4178 = vmatprep.mubr.f32.mxu0 %v1524_v48  ;;  %4198 = vmatprep.mubr.f32.mxu1 %v4804_v7  ;;  %7029 = vst [vmem:[#allocation20_spill] sm:$0xff] %v4867_v55  ;;  %7030 = vst [vmem:[#allocation21_spill] sm:$0xff] %v4877_v42  ;;  %v1574_v9 = vand.u32 4294901760, %v1573_v50 }
 0x355   :  { %4229 = vmatprep.subr.mxu0 %v4655_v6  ;;  %3321 = vbcast.lane.b32.xlu1 %v4492_v39, 368  ;;  %v1564_v39 = vand.u32 4294901760, %v1563_v33 }
 0x356   :  { %2771 = vbcast.lane.b32.xlu0 %v4733_v60, 280  ;;  %4179 = vmatmul.mubr.f32.gmra.mxu0 %v1534_v57 }
 0x357   :  { %4199 = vmatmul.mubr.f32.gmra.mxu1 %v4827_v25  ;;  %4181 = vmatprep.mubr.f32.mxu0 %v1544_v16 }
 0x358   :  { %4217 = vmatprep.mubr.f32.mxu1 %v1502_v41  ;;  %v4880_v41 = vpop.permute.xlu1 %2573 }
 0x359   :  { %3289 = vbcast.lane.b32.xlu1 %v4484_v37, 376  ;;  %7031 = vst [vmem:[#allocation22_spill] sm:$0xff] %v4880_v41  ;;  %v4886_v37 = vpop.permute.xlu0 %3153 }
 0x35a   :  { %2674 = vbcast.lane.b32.xlu0 %v4680_v36, 296  ;;  %4182 = vmatmul.mubr.f32.gmra.mxu0 %v1554_v35  ;;  %7032 = vst [vmem:[#allocation23_spill] sm:$0xff] %v4886_v37 }
 0x35b   :  { %4218 = vmatmul.mubr.f32.vlgmr.msra.gmra.mxu1 %v1512_v59  ;;  %4184 = vmatprep.mubr.f32.mxu0 %v1564_v39 }
 0x35c   :  { %4244 = vmatpush3.msra.mxu1 %v4624_v27  ;;  %4220 = vmatprep.mubr.f32.mxu1 %v1522_v15  ;;  %v4890_v27 = vpop.permute.xlu1 %2584 }
 0x35d   :  { %3425 = vbcast.lane.b32.xlu1 %v4517_v45, 360  ;;  %7033 = vst [vmem:[#allocation24_spill] sm:$0xff] %v4890_v27 }
 0x35e   :  { %2643 = vbcast.lane.b32.xlu0 %v4663_v13, 304  ;;  %4185 = vmatmul.mubr.f32.gmra.mxu0 %v1574_v9 }
 0x35f   :  { %4221 = vmatmul.mubr.f32.gmra.mxu1 %v1532_v29  ;;  %4203 = vmatprep.mubr.f32.mxu0 %v4754_v47 }
 0x360   :  { %4223 = vmatprep.mubr.f32.mxu1 %v1542_v30  ;;  %v4901_v47 = vpop.permute.xlu1 %2592 }
 0x361   :  { %3393 = vbcast.lane.b32.xlu1 %v4508_v43, 368  ;;  %v4898_v43 = vpop.permute.xlu0 %3189  ;;  %7035 = vst [vmem:[#allocation26_spill] sm:$0xff] %v4901_v47 }
 0x362   :  { %2775 = vbcast.lane.b32.xlu0 %v4733_v60, 288  ;;  %4204 = vmatmul.mubr.f32.vlgmr.msra.gmra.mxu0 %v4768_v53  ;;  %7034 = vst [vmem:[#allocation25_spill] sm:$0xff] %v4898_v43 }
 0x363   :  { %4224 = vmatmul.mubr.f32.gmra.mxu1 %v1552_v46  ;;  %4230 = vmatpush3.msra.mxu0 %v4655_v6 }
 0x364   :  { %4206 = vmatprep.mubr.f32.mxu0 %v4786_v63  ;;  %4226 = vmatprep.mubr.f32.mxu1 %v1562_v19  ;;  %v4914_v53 = vpop.permute.xlu1 %2600 }
 0x365   :  { %3429 = vbcast.lane.b32.xlu1 %v4517_v45, 368  ;;  %v4910_v6 = vpop.permute.xlu0 %3225  ;;  %7037 = vst [vmem:[#allocation28_spill] sm:$0xff] %v4914_v53 }
 0x366   :  { %2678 = vbcast.lane.b32.xlu0 %v4680_v36, 304  ;;  %4207 = vmatmul.mubr.f32.gmra.mxu0 %v4796_v2  ;;  %7036 = vst [vmem:[#allocation27_spill] sm:$0xff] %v4910_v6 }
 0x367   :  { %4227 = vmatmul.mubr.f32.gmra.mxu1 %v1572_v8  ;;  %4209 = vmatprep.mubr.f32.mxu0 %v4802_v5 }
 0x368   :  { %4245 = vmatprep.mubr.f32.mxu1 %v4735_v0 }
 0x369   :  { %3433 = vbcast.lane.b32.xlu1 %v4517_v45, 376  ;;  %v4924_v45 = vpop.permute.xlu0 %3161 }
 0x36a   :  { %2647 = vbcast.lane.b32.xlu0 %v4663_v13, 312  ;;  %4210 = vmatmul.mubr.f32.gmra.mxu0 %v4825_v21  ;;  %7038 = vst [vmem:[#allocation29_spill] sm:$0xff] %v4924_v45 }
 0x36b   :  { %4246 = vmatmul.mubr.f32.vlgmr.msra.gmra.mxu1 %v4750_v44  ;;  %4212 = vmatprep.mubr.f32.mxu0 %v4833_v26 }
 0x36c   :  { %4248 = vmatprep.mubr.f32.mxu1 %v4759_v22 }
 0x36d   :  { %2623 = vbcast.lane.b32.xlu1 %v4663_v13, 264  ;;  %v4927_v13 = vpop.permute.xlu1 %3157 }
 0x36e   :  { %2779 = vbcast.lane.b32.xlu0 %v4733_v60, 296  ;;  %4213 = vmatmul.mubr.f32.gmra.mxu0 %v4843_v51  ;;  %7039 = vst [vmem:[#allocation30_spill] sm:$0xff] %v4927_v13 }
 0x36f   :  { %4249 = vmatmul.mubr.f32.gmra.mxu1 %v4770_v31  ;;  %4231 = vmatprep.mubr.f32.mxu0 %v4735_v0  ;;  %v4935_v0 = vpop.permute.xlu0 %3261 }
 0x370   :  { %4251 = vmatprep.mubr.f32.mxu1 %v4776_v52  ;;  %7040 = vst [vmem:[#allocation31_spill] sm:$0xff] %v4935_v0 }
 0x371   :  { %2658 = vbcast.lane.b32.xlu1 %v4680_v36, 264 }
 0x372   :  { %2748 = vbcast.lane.b32.xlu0 %v4710_v54, 304  ;;  %4232 = vmatmul.mubr.f32.vlgmr.msra.gmra.mxu0 %v4750_v44  ;;  %v4939_v44 = vpop.permute.xlu1 %3193 }
 0x373   :  { %4252 = vmatmul.mubr.f32.gmra.mxu1 %v4798_v3  ;;  %4234 = vmatprep.mubr.f32.mxu0 %v4759_v22  ;;  %7041 = vst [vmem:[#allocation32_spill] sm:$0xff] %v4939_v44  ;;  %v4961_v2 = vpop.permute.xlu0 %3233 }
 0x374   :  { %4254 = vmatprep.mubr.f32.mxu1 %v4804_v7  ;;  %7047 = vst [vmem:[#allocation38_spill] sm:$0xff] %v4961_v2 }
 0x375   :  { %2689 = vbcast.lane.b32.xlu1 %v4698_v24, 256 }
 0x376   :  { %2783 = vbcast.lane.b32.xlu0 %v4733_v60, 304  ;;  %4235 = vmatmul.mubr.f32.gmra.mxu0 %v4770_v31  ;;  %v4944_v22 = vpop.permute.xlu1 %3229 }
 0x377   :  { %4255 = vmatmul.mubr.f32.gmra.mxu1 %v4827_v25  ;;  %4237 = vmatprep.mubr.f32.mxu0 %v4776_v52  ;;  %7042 = vst [vmem:[#allocation33_spill] sm:$0xff] %v4944_v22 }
 0x379   :  { %2662 = vbcast.lane.b32.xlu1 %v4680_v36, 272 }
 0x37a   :  { %2787 = vbcast.lane.b32.xlu0 %v4733_v60, 312  ;;  %4238 = vmatmul.mubr.f32.gmra.mxu0 %v4798_v3  ;;  %v4948_v31 = vpop.permute.xlu1 %3197  ;;  %v4966_v3 = vpop.permute.xlu0 %3301 }
 0x37b   :  { %4240 = vmatprep.mubr.f32.mxu0 %v4804_v7  ;;  %7043 = vst [vmem:[#allocation34_spill] sm:$0xff] %v4948_v31  ;;  %7049 = vst [vmem:[#allocation40_spill] sm:$0xff] %v4966_v3 }
 0x37d   :  { %2728 = vbcast.lane.b32.xlu1 %v4710_v54, 264 }
 0x37e   :  { %4241 = vmatmul.mubr.f32.gmra.mxu0 %v4827_v25  ;;  %v4951_v52 = vpop.permute.xlu1 %3265  ;;  %v4972_v7 = vpop.permute.xlu0 %3201 }
 0x37f   :  { %7044 = vst [vmem:[#allocation35_spill] sm:$0xff] %v4951_v52  ;;  %7051 = vst [vmem:[#allocation42_spill] sm:$0xff] %v4972_v7 }
 0x381   :  { %2697 = vbcast.lane.b32.xlu1 %v4698_v24, 272 }
 0x382   :  { %v4955_v63 = vpop.permute.xlu1 %3297  ;;  %v4977_v21 = vpop.permute.xlu0 %3333 }
 0x383   :  { %7045 = vst [vmem:[#allocation36_spill] sm:$0xff] %v4955_v63  ;;  %7053 = vst [vmem:[#allocation44_spill] sm:$0xff] %v4977_v21 }
 0x385   :  { %2763 = vbcast.lane.b32.xlu1 %v4733_v60, 264 }
 0x386   :  { %v4958_v59 = vpop.permute.xlu1 %3165  ;;  %v4983_v29 = vpop.permute.xlu0 %3237 }
 0x387   :  { %7046 = vst [vmem:[#allocation37_spill] sm:$0xff] %v4958_v59  ;;  %7055 = vst [vmem:[#allocation46_spill] sm:$0xff] %v4983_v29 }
 0x389   :  { %2732 = vbcast.lane.b32.xlu1 %v4710_v54, 272 }
 0x38a   :  { %v4964_v60 = vpop.permute.xlu1 %3269  ;;  %v4988_v30 = vpop.permute.xlu0 %3369 }
 0x38b   :  { %7048 = vst [vmem:[#allocation39_spill] sm:$0xff] %v4964_v60  ;;  %7057 = vst [vmem:[#allocation48_spill] sm:$0xff] %v4988_v30 }
 0x38d   :  { %2701 = vbcast.lane.b32.xlu1 %v4698_v24, 280 }
 0x38e   :  { %v4969_v5 = vpop.permute.xlu1 %3337  ;;  %v4994_v51 = vpop.permute.xlu0 %3169 }
 0x38f   :  { %7050 = vst [vmem:[#allocation41_spill] sm:$0xff] %v4969_v5  ;;  %7059 = vst [vmem:[#allocation50_spill] sm:$0xff] %v4994_v51 }
 0x391   :  { %2604 = vbcast.lane.b32.xlu1 %v4463_v32, 296 }
 0x392   :  { %v4975_v15 = vpop.permute.xlu1 %3305  ;;  %v4998_v19 = vpop.permute.xlu0 %3273 }
 0x393   :  { %7052 = vst [vmem:[#allocation43_spill] sm:$0xff] %v4975_v15  ;;  %7061 = vst [vmem:[#allocation52_spill] sm:$0xff] %v4998_v19 }
 0x395   :  { %2736 = vbcast.lane.b32.xlu1 %v4710_v54, 280 }
 0x396   :  { %v4980_v25 = vpop.permute.xlu1 %3373  ;;  %v5002_v57 = vpop.permute.xlu0 %3405 }
 0x397   :  { %7054 = vst [vmem:[#allocation45_spill] sm:$0xff] %v4980_v25  ;;  %7063 = vst [vmem:[#allocation54_spill] sm:$0xff] %v5002_v57 }
 0x399   :  { %2705 = vbcast.lane.b32.xlu1 %v4698_v24, 288 }
 0x39a   :  { %v4986_v26 = vpop.permute.xlu1 %3205  ;;  %v5006_v1 = vpop.permute.xlu0 %3241 }
 0x39b   :  { %7056 = vst [vmem:[#allocation47_spill] sm:$0xff] %v4986_v26  ;;  %7065 = vst [vmem:[#allocation56_spill] sm:$0xff] %v5006_v1 }
 0x39d   :  { %2608 = vbcast.lane.b32.xlu1 %v4463_v32, 304 }
 0x39e   :  { %v5012_v16 = vpop.permute.xlu0 %3377 }
 0x39f   :  { %7067 = vst [vmem:[#allocation58_spill] sm:$0xff] %v5012_v16 }
 0x3a1   :  { %2740 = vbcast.lane.b32.xlu1 %v4710_v54, 288 }
 0x3a2   :  { %v5020_v39 = vpop.permute.xlu0 %3209 }
 0x3a3   :  { %7069 = vst [vmem:[#allocation60_spill] sm:$0xff] %v5020_v39 }
 0x3a5   :  { %2709 = vbcast.lane.b32.xlu1 %v4698_v24, 296 }
 0x3a6   :  { %v5030_v27 = vpop.permute.xlu0 %3345 }
 0x3a7   :  { %7071 = vst [vmem:[#allocation62_spill] sm:$0xff] %v5030_v27 }
 0x3a9   :  { %2612 = vbcast.lane.b32.xlu1 %v4463_v32, 312  ;;  %v4991_v32 = vpop.permute.xlu1 %3341 }
 0x3aa   :  { %7058 = vst [vmem:[#allocation49_spill] sm:$0xff] %v4991_v32  ;;  %v5036_v10 = vpop.permute.xlu0 %3245 }
 0x3ab   :  { %7073 = vst [vmem:[#allocation64_spill] sm:$0xff] %v5036_v10 }
 0x3ad   :  { %2744 = vbcast.lane.b32.xlu1 %v4710_v54, 296  ;;  %v4996_v46 = vpop.permute.xlu1 %3409 }
 0x3ae   :  { %7060 = vst [vmem:[#allocation51_spill] sm:$0xff] %v4996_v46 }
 0x3b1   :  { %2713 = vbcast.lane.b32.xlu1 %v4698_v24, 304  ;;  %v5000_v48 = vpop.permute.xlu1 %3309 }
 0x3b2   :  { %7062 = vst [vmem:[#allocation53_spill] sm:$0xff] %v5000_v48 }
 0x3b5   :  { %2682 = vbcast.lane.b32.xlu1 %v4680_v36, 312  ;;  %v5004_v36 = vpop.permute.xlu1 %3173 }
 0x3b6   :  { %7064 = vst [vmem:[#allocation55_spill] sm:$0xff] %v5004_v36 }
 0x3b9   :  { %2717 = vbcast.lane.b32.xlu1 %v4698_v24, 312  ;;  %v5008_v8 = vpop.permute.xlu1 %3277 }
 0x3ba   :  { %7066 = vst [vmem:[#allocation57_spill] sm:$0xff] %v5008_v8 }
 0x3bd   :  { %2752 = vbcast.lane.b32.xlu1 %v4710_v54, 312  ;;  %v5018_v35 = vpop.permute.xlu1 %3413 }
 0x3be   :  { %7068 = vst [vmem:[#allocation59_spill] sm:$0xff] %v5018_v35 }
 0x3c1   :  { %v5026_v42 = vpop.permute.xlu1 %3313 }
 0x3c2   :  { %7070 = vst [vmem:[#allocation61_spill] sm:$0xff] %v5026_v42 }
 0x3c5   :  { %v5032_v14 = vpop.permute.xlu1 %3177 }
 0x3c6   :  { %7072 = vst [vmem:[#allocation63_spill] sm:$0xff] %v5032_v14 }
 0x3c9   :  { %v5042_v38 = vpop.permute.xlu1 %3281 }
 0x3ca   :  { %7074 = vst [vmem:[#allocation65_spill] sm:$0xff] %v5042_v38 }
 0x3ce   :  { %v5010_v24 = vpop.f32.mrf.mxu1 }
 0x3d0   :  { %v5016_v33 = vpop.f32.mrf.mxu1 }
 0x3d6   :  { %v5014_v54 = vpop.f32.mrf.mxu0 }
 0x3d7   :  { %v4110_v50 = vpop.f32.mrf.mxu1 }
 0x3d8   :  { %v5022_v9 = vpop.f32.mrf.mxu0 }
 0x3d9   :  { %v861_v18 = vpop.f32.mrf.mxu1  ;;  %v850_v36 = vadd.f32 %v5016_v33, %v5022_v9 }
 0x3de   :  { %v4096_v11 = vpop.f32.mrf.mxu0 }
 0x3df   :  { %v5024_v20 = vadd.f32 %v4110_v50, %v4096_v11  ;;  %v4113_v47 = vpop.f32.mrf.mxu1 }
 0x3e0   :  { %v723_v53 = vpop.f32.mrf.mxu0 }
 0x3e1   :  { %v5028_v61 = vadd.f32 %v861_v18, %v723_v53  ;;  %v873_v58 = vpop.f32.mrf.mxu1  ;;  %v5046_v53 = vpop.permute.xlu0 %3381 }
 0x3e2   :  { %7075 = vst [vmem:[#allocation66_spill] sm:$0xff] %v5046_v53 }
 0x3e5   :  { %v5058_v4 = vpop.permute.xlu0 %3213 }
 0x3e6   :  { %v4099_v41 = vpop.f32.mrf.mxu0  ;;  %7077 = vst [vmem:[#allocation68_spill] sm:$0xff] %v5058_v4 }
 0x3e7   :  { %v4116_v55 = vpop.f32.mrf.mxu1  ;;  %v5034_v49 = vadd.f32 %v4113_v47, %v4099_v41 }
 0x3e8   :  { %v743_v28 = vpop.f32.mrf.mxu0 }
 0x3e9   :  { %v5038_v11 = vadd.f32 %v873_v58, %v743_v28  ;;  %v885_v50 = vpop.f32.mrf.mxu1  ;;  %v5054_v58 = vpop.permute.xlu1 %3417 }
 0x3ea   :  { %7076 = vst [vmem:[#allocation67_spill] sm:$0xff] %v5054_v58 }
 0x3eb   :  { %v5040_v34 = vpop.f32.mrf.mxu1 }
 0x3ed   :  { %v5044_v18 = vpop.f32.mrf.mxu1 }
 0x3ee   :  { %v4102_v12 = vpop.f32.mrf.mxu0 }
 0x3ef   :  { %v5048_v62 = vpop.f32.mrf.mxu1  ;;  %v892_v17 = vadd.f32 %v4116_v55, %v4102_v12  ;;  %v5066_v12 = vpop.permute.xlu1 %3317 }
 0x3f0   :  { %v763_v41 = vpop.f32.mrf.mxu0  ;;  %7078 = vst [vmem:[#allocation69_spill] sm:$0xff] %v5066_v12 }
 0x3f1   :  { %v5050_v47 = vadd.f32 %v885_v50, %v763_v41  ;;  %v5052_v23 = vpop.f32.mrf.mxu1  ;;  %v5070_v50 = vpop.permute.xlu0 %3349 }
 0x3f2   :  { %v4121_v28 = vpop.f32.mrf.mxu0  ;;  %7079 = vst [vmem:[#allocation70_spill] sm:$0xff] %v5070_v50 }
 0x3f3   :  { %v5056_v56 = vpop.f32.mrf.mxu1  ;;  %v5080_v27 = vpop.permute.xlu1 %3181 }
 0x3f4   :  { %v965_v40 = vpop.f32.mrf.mxu0  ;;  %7080 = vst [vmem:[#allocation71_spill] sm:$0xff] %v5080_v27 }
 0x3f5   :  { %v5060_v35 = vpop.f32.mrf.mxu1  ;;  %v5084_v21 = vpop.permute.xlu0 %3249 }
 0x3f6   :  { %v5062_v46 = vpop.f32.mrf.mxu0  ;;  %7081 = vst [vmem:[#allocation72_spill] sm:$0xff] %v5084_v21 }
 0x3f7   :  { %v4144_v57 = vpop.f32.mrf.mxu1  ;;  %v5094_v63 = vpop.permute.xlu1 %3285 }
 0x3f8   :  { %v5064_v53 = vpop.f32.mrf.mxu0  ;;  %7082 = vst [vmem:[#allocation73_spill] sm:$0xff] %v5094_v63 }
 0x3f9   :  { %v5068_v55 = vpop.f32.mrf.mxu1  ;;  %v5098_v8 = vpop.permute.xlu0 %3385 }
 0x3fa   :  { %v5072_v41 = vpop.f32.mrf.mxu0  ;;  %7083 = vst [vmem:[#allocation74_spill] sm:$0xff] %v5098_v8 }
 0x3fb   :  { %v5074_v58 = vpop.f32.mrf.mxu1 }
 0x3fc   :  { %v5076_v16 = vpop.f32.mrf.mxu0 }
 0x3fd   :  { %v5078_v25 = vpop.f32.mrf.mxu1  ;;  %v5112_v0 = vpop.permute.xlu0 %3217 }
 0x3fe   :  { %v4130_v30 = vpop.f32.mrf.mxu0  ;;  %7085 = vst [vmem:[#allocation76_spill] sm:$0xff] %v5112_v0 }
 0x3ff   :  { %v5082_v32 = vpop.f32.mrf.mxu1  ;;  %v1015_v5 = vadd.f32 %v4130_v30, %v892_v17 }
 0x400   :  { %v5086_v12 = vpop.f32.mrf.mxu0 }
 0x401   :  { %v5088_v42 = vpop.f32.mrf.mxu1  ;;  %v5090_v50 = vadd.f32 %v4144_v57, %v1015_v5  ;;  %v5108_v5 = vpop.permute.xlu1 %3421 }
 0x402   :  { %v4149_v48 = vpop.f32.mrf.mxu0  ;;  %7084 = vst [vmem:[#allocation75_spill] sm:$0xff] %v5108_v5  ;;  %v5128_v22 = vpop.permute.xlu0 %3353 }
 0x403   :  { %v5092_v15 = vpop.f32.mrf.mxu1  ;;  %7087 = vst [vmem:[#allocation78_spill] sm:$0xff] %v5128_v22 }
 0x404   :  { %v1218_v3 = vpop.f32.mrf.mxu0 }
 0x405   :  { %v5096_v38 = vpop.f32.mrf.mxu1  ;;  %v5124_v29 = vpop.permute.xlu1 %3321 }
 0x406   :  { %v4152_v19 = vpop.f32.mrf.mxu0  ;;  %7086 = vst [vmem:[#allocation77_spill] sm:$0xff] %v5124_v29  ;;  %v5140_v31 = vpop.permute.xlu0 %3253  ;;  %v856_v29 = vadd.f32 %v5010_v24, %v5014_v54 }
 0x407   :  { %v5100_v17 = vpop.f32.mrf.mxu1  ;;  %7089 = vst [vmem:[#allocation80_spill] sm:$0xff] %v5140_v31  ;;  %v966_v31 = vadd.f32 %v965_v40, %v850_v36  ;;  %v987_v40 = vadd.f32 %v5062_v46, %v5024_v20  ;;  %v994_v20 = vadd.f32 %v5076_v16, %v5038_v11 }
 0x408   :  { %v5102_v30 = vpop.f32.mrf.mxu0  ;;  %v973_v51 = vadd.f32 %v4121_v28, %v856_v29 }
 0x409   :  { %v5104_v60 = vpop.f32.mrf.mxu1  ;;  %v5136_v26 = vpop.permute.xlu1 %3289  ;;  %v1089_v33 = vadd.f32 %v5044_v18, %v966_v31  ;;  %v980_v31 = vadd.f32 %v5064_v53, %v5028_v61  ;;  %v1008_v18 = vadd.f32 %v5086_v12, %v5050_v47  ;;  %v1121_v47 = vadd.f32 %v5060_v35, %v994_v20 }
 0x40a   :  { %v5106_v52 = vpop.f32.mrf.mxu0  ;;  %7088 = vst [vmem:[#allocation79_spill] sm:$0xff] %v5136_v26  ;;  %v5160_v37 = vpop.permute.xlu0 %3389  ;;  %v1097_v54 = vadd.f32 %v5040_v34, %v973_v51 }
 0x40b   :  { %v5110_v57 = vpop.f32.mrf.mxu1  ;;  %7092 = vst [vmem:[#allocation83_spill] sm:$0xff] %v5160_v37 }
 0x40c   :  { %v5114_v63 = vpop.f32.mrf.mxu0  ;;  %v1225_v29 = vadd.f32 %v4149_v48, %v1097_v54  ;;  %v1001_v48 = vadd.f32 %v5072_v41, %v5034_v49 }
 0x40d   :  { %v5116_v21 = vpop.f32.mrf.mxu1  ;;  %v5156_v45 = vpop.permute.xlu1 %3425 }
 0x40e   :  { %v5118_v8 = vpop.f32.mrf.mxu0  ;;  %7091 = vst [vmem:[#allocation82_spill] sm:$0xff] %v5156_v45  ;;  %v1219_v45 = vadd.f32 %v1218_v3, %v1089_v33  ;;  %v1339_v51 = vadd.f32 %v5074_v58, %v1225_v29  ;;  %v1113_v3 = vadd.f32 %v5048_v62, %v987_v40  ;;  %v1105_v62 = vadd.f32 %v5052_v23, %v980_v31 }
 0x40f   :  { %v5120_v10 = vpop.f32.mrf.mxu1  ;;  %v1129_v11 = vadd.f32 %v5056_v56, %v1001_v48  ;;  %v1261_v56 = vadd.f32 %v5118_v8, %v5090_v50 }
 0x410   :  { %v5122_v1 = vpop.f32.mrf.mxu0  ;;  %v1333_v58 = vadd.f32 %v5078_v25, %v1219_v45  ;;  %v1237_v33 = vadd.f32 %v4152_v19, %v1113_v3  ;;  %v1137_v45 = vadd.f32 %v5068_v55, %v1008_v18  ;;  %v1231_v41 = vadd.f32 %v5102_v30, %v1105_v62  ;;  %v2214_v62 = vld [vmem:[%s6910_s3 + $0xc8] sm:$0xff] }
 0x411   :  { %v5126_v2 = vpop.f32.mrf.mxu1  ;;  %v5174_v28 = vpop.permute.xlu1 %3393 }
 0x412   :  { %v4177_v5 = vpop.f32.mrf.mxu0  ;;  %7094 = vst [vmem:[#allocation85_spill] sm:$0xff] %v5174_v28  ;;  %v1351_v40 = vadd.f32 %v5082_v32, %v1237_v33  ;;  %v1255_v23 = vadd.f32 %v5122_v1, %v1137_v45  ;;  %v1345_v32 = vadd.f32 %v5088_v42, %v1231_v41 }
 0x413   :  { %v5130_v6 = vpop.f32.mrf.mxu1  ;;  %v1517_v54 = vadd.f32 %v4177_v5, %v1339_v51  ;;  %v1243_v5 = vadd.f32 %v5114_v63, %v1121_v47 }
 0x414   :  { %v1506_v0 = vpop.f32.mrf.mxu0 }
 0x415   :  { %v5132_v4 = vpop.f32.mrf.mxu1  ;;  %v5197_v61 = vpop.permute.xlu1 %3429  ;;  %v1507_v49 = vadd.f32 %v1506_v0, %v1333_v58  ;;  %v1659_v25 = vadd.f32 %v5110_v57, %v1517_v54  ;;  %v1249_v0 = vadd.f32 %v5106_v52, %v1129_v11  ;;  %v1357_v8 = vadd.f32 %v5096_v38, %v1243_v5 }
 0x416   :  { %v5134_v39 = vpop.f32.mrf.mxu0  ;;  %7096 = vst [vmem:[#allocation87_spill] sm:$0xff] %v5197_v61 }
 0x417   :  { %v5138_v7 = vpop.f32.mrf.mxu1  ;;  %v1653_v55 = vadd.f32 %v5116_v21, %v1507_v49  ;;  %v1537_v57 = vadd.f32 %v5134_v39, %v1351_v40  ;;  %v1363_v20 = vadd.f32 %v5092_v15, %v1249_v0  ;;  %v1375_v21 = vadd.f32 %v5100_v17, %v1261_v56 }
 0x418   :  { %v5142_v27 = vpop.f32.mrf.mxu0  ;;  %v1369_v39 = vadd.f32 %v5104_v60, %v1255_v23 }
 0x419   :  { %v5146_v22 = vpop.f32.mrf.mxu1  ;;  %v5219_v30 = vpop.permute.xlu1 %3433  ;;  %v1671_v42 = vadd.f32 %v5120_v10, %v1537_v57 }
 0x41a   :  { %7090 = vst [vmem:[#allocation81_spill] sm:$0xff] %v5146_v22  ;;  %v5148_v14 = vpop.f32.mrf.mxu0  ;;  %v5178_v22 = vpop.permute.xlu0 %3357  ;;  %7098 = vst [vmem:[#allocation89_spill] sm:$0xff] %v5219_v30 }
 0x41b   :  { %v5152_v59 = vpop.f32.mrf.mxu1  ;;  %7095 = vst [vmem:[#allocation86_spill] sm:$0xff] %v5178_v22 }
 0x41c   :  { %v5154_v26 = vpop.f32.mrf.mxu0 }
 0x41d   :  { %v5158_v43 = vpop.f32.mrf.mxu1  ;;  %v1547_v3 = vadd.f32 %v5154_v26, %v1357_v8  ;;  %v5240_v33 = vpop.permute.xlu1 %2623  ;;  %v2213_v8 = vld [vmem:[%s6910_s3 + $0xc0] sm:$0xff] }
 0x41e   :  { %v5162_v24 = vpop.f32.mrf.mxu0  ;;  %v5201_v16 = vpop.permute.xlu0 %3325  ;;  %7100 = vst [vmem:[#allocation91_spill] sm:$0xff] %v5240_v33 }
 0x41f   :  { %v5165_v44 = vpop.f32.mrf.mxu1  ;;  %7097 = vst [vmem:[#allocation88_spill] sm:$0xff] %v5201_v16  ;;  %v1577_v15 = vadd.f32 %v5162_v24, %v1375_v21  ;;  %v1677_v49 = vadd.f32 %v5132_v4, %v1547_v3 }
 0x420   :  { %7093 = vst [vmem:[#allocation84_spill] sm:$0xff] %v5165_v44  ;;  %v5167_v13 = vpop.f32.mrf.mxu0 }
 0x421   :  { %v5170_v9 = vpop.f32.mrf.mxu1  ;;  %v1567_v38 = vadd.f32 %v5167_v13, %v1369_v39  ;;  %v1695_v47 = vadd.f32 %v5138_v7, %v1577_v15  ;;  %v2221_v15 = vld [vmem:[%s6910_s3 + $0x100] sm:$0xff] }
 0x422   :  { %v4205_v36 = vpop.f32.mrf.mxu0  ;;  %v5221_v63 = vpop.permute.xlu0 %3361 }
 0x423   :  { %v5176_v37 = vpop.f32.mrf.mxu1  ;;  %v1776_v35 = vadd.f32 %v4205_v36, %v1659_v25  ;;  %7099 = vst [vmem:[#allocation90_spill] sm:$0xff] %v5221_v63  ;;  %v1527_v36 = vadd.f32 %v5142_v27, %v1345_v32  ;;  %v2222_v25 = vld [vmem:[%s6910_s3 + $0x108] sm:$0xff] }
 0x424   :  { %v1768_v34 = vpop.f32.mrf.mxu0 }
 0x425   :  { %v5181_v44 = vpop.f32.mrf.mxu1  ;;  %v1769_v52 = vadd.f32 %v1768_v34, %v1653_v55  ;;  %v1900_v50 = vadd.f32 %v5152_v59, %v1776_v35  ;;  %v1557_v34 = vadd.f32 %v5148_v14, %v1363_v20  ;;  %v2190_v14 = vld [vmem:[%s6910_s3 + $0x8] sm:$0xff]  ;;  %v1665_v24 = vadd.f32 %v5126_v2, %v1527_v36  ;;  %v7102_v2 = vld [vmem:[#allocation81_spill] sm:$0xff]  ;;  %v2205_v20 = vld [vmem:[%s6910_s3 + $0x80] sm:$0xff] }
 0x426   :  { %v4208_v46 = vpop.f32.mrf.mxu0  ;;  %v5245_v26 = vpop.permute.xlu0 %3397  ;;  %v1689_v45 = vadd.f32 %v7102_v2, %v1567_v38  ;;  %v2229_v38 = vld [vmem:[%s6910_s3 + $0x140] sm:$0xff] }
 0x427   :  { %v5193_v29 = vpop.f32.mrf.mxu1  ;;  %v1892_v60 = vadd.f32 %v5158_v43, %v1769_v52  ;;  %v1790_v58 = vadd.f32 %v4208_v46, %v1671_v42  ;;  %7101 = vst [vmem:[#allocation92_spill] sm:$0xff] %v5245_v26  ;;  %v1683_v13 = vadd.f32 %v5130_v6, %v1557_v34  ;;  %v2198_v43 = vld [vmem:[%s6910_s3 + $0x48] sm:$0xff]  ;;  %v7103_v7 = vld [vmem:[#allocation84_spill] sm:$0xff] }
 0x428   :  { %v5195_v28 = vpop.f32.mrf.mxu0  ;;  %v2206_v46 = vld [vmem:[%s6910_s3 + $0x88] sm:$0xff] }
 0x429   :  { %v5199_v53 = vpop.f32.mrf.mxu1  ;;  %v1783_v0 = vadd.f32 %v5195_v28, %v1665_v24  ;;  %v1916_v56 = vadd.f32 %v7103_v7, %v1790_v58  ;;  %v2197_v28 = vld [vmem:[%s6910_s3 + $0x40] sm:$0xff] }
 0x42a   :  { %v4211_v12 = vpop.f32.mrf.mxu0 }
 0x42b   :  { %v4247_v19 = vpop.f32.mrf.mxu1  ;;  %v1804_v5 = vadd.f32 %v4211_v12, %v1683_v13 }
 0x42c   :  { %v1796_v51 = vpop.f32.mrf.mxu0 }
 0x42d   :  { %v2135_v48 = vpop.f32.mrf.mxu1  ;;  %v1797_v40 = vadd.f32 %v1796_v51, %v1677_v49 }
 0x42e   :  { %v5217_v31 = vpop.f32.mrf.mxu0 }
 0x42f   :  { %v5237_v54 = vpop.f32.mrf.mxu1 }
 0x430   :  { %v5226_v1 = vpop.f32.mrf.mxu0 }
 0x431   :  { %v5261_v6 = vpop.f32.mrf.mxu1  ;;  %v1811_v24 = vadd.f32 %v5226_v1, %v1689_v45  ;;  %v1932_v1 = vadd.f32 %v5176_v37, %v1804_v5 }
 0x432   :  { %v4233_v18 = vpop.f32.mrf.mxu0 }
 0x433   :  { %v2028_v17 = vadd.f32 %v4233_v18, %v1900_v50  ;;  %v5297_v50 = vpop.permute.xlu1 %2658  ;;  %v5307_v18 = vpop.f32.mrf.mxu1 }
 0x434   :  { %v2021_v59 = vpop.f32.mrf.mxu0  ;;  %7104 = vst [vmem:[#allocation81_spill] sm:$0xff] %v5297_v50 }
 0x435   :  { %v2142_v27 = vadd.f32 %v4247_v19, %v2028_v17  ;;  %v2022_v10 = vadd.f32 %v2021_v59, %v1892_v60  ;;  %v2230_v19 = vld [vmem:[%s6910_s3 + $0x148] sm:$0xff]  ;;  %v5315_v17 = vpop.permute.xlu0 %2619  ;;  %v2159_v2 = vpop.f32.mrf.mxu1 }
 0x436   :  { %v4236_v11 = vpop.f32.mrf.mxu0  ;;  %7109 = vst [vmem:[#allocation96_spill] sm:$0xff] %v5315_v17 }
 0x437   :  { %v5263_v4 = vmul.f32 0.000125, %v2142_v27  ;;  %v2136_v41 = vadd.f32 %v2135_v48, %v2022_v10  ;;  %v2189_v48 = vld [vmem:[%s6910_s3] sm:$0xff]  ;;  %v2040_v21 = vadd.f32 %v4236_v11, %v1916_v56  ;;  %v1818_v10 = vadd.f32 %v5217_v31, %v1695_v47 }
 0x438   :  { %v5273_v23 = vpop.f32.mrf.mxu0  ;;  %v1908_v31 = vadd.f32 %v5170_v9, %v1783_v0 }
 0x439   :  { %v2254_v35 = vadd.f32 %v2190_v14, %v5263_v4  ;;  %v2262_v55 = vadd.f32 %v2198_v43, %v5263_v4  ;;  %v2270_v57 = vadd.f32 %v2206_v46, %v5263_v4  ;;  %v2278_v52 = vadd.f32 %v2214_v62, %v5263_v4 }
 0x43a   :  { %v2286_v12 = vadd.f32 %v2222_v25, %v5263_v4  ;;  %v2294_v51 = vadd.f32 %v2230_v19, %v5263_v4  ;;  %v5287_v32 = vmul.f32 0.000125, %v2136_v41  ;;  %v5295_v39 = vpop.f32.mrf.mxu0  ;;  %v2154_v45 = vadd.f32 %v5237_v54, %v2040_v21 }
 0x43b   :  { %v5299_v36 = vclamps-f32 %v2254_v35, 1.0  ;;  %v5301_v34 = vclamps-f32 %v2262_v55, 1.0  ;;  %v5303_v3 = vclamps-f32 %v2270_v57, 1.0  ;;  %v5305_v42 = vclamps-f32 %v2278_v52, 1.0  ;;  %v5390_v55 = vpop.permute.xlu1 %2689 }
 0x43c   :  { %v5317_v60 = vclamps-f32 %v2286_v12, 1.0  ;;  %v5319_v58 = vclamps-f32 %v2294_v51, 1.0  ;;  %v2253_v59 = vadd.f32 %v2189_v48, %v5287_v32  ;;  %v2261_v27 = vadd.f32 %v2197_v28, %v5287_v32  ;;  %v2045_v14 = vpop.f32.mrf.mxu0  ;;  %7118 = vst [vmem:[#allocation105_spill] sm:$0xff] %v5390_v55  ;;  %v5419_v51 = vpop.permute.xlu0 %2654 }
 0x43d   :  { %7105 = vst [vmem:[#allocation84_spill] sm:$0xff] %v5299_v36  ;;  %7106 = vst [vmem:[#allocation93_spill] sm:$0xff] %v5301_v34  ;;  %v2269_v9 = vadd.f32 %v2205_v20, %v5287_v32  ;;  %v2277_v49 = vadd.f32 %v2213_v8, %v5287_v32  ;;  %v2285_v43 = vadd.f32 %v2221_v15, %v5287_v32  ;;  %v4256_v15 = vpop.f32.mrf.mxu1 }
 0x43e   :  { %7107 = vst [vmem:[#allocation94_spill] sm:$0xff] %v5303_v3  ;;  %7108 = vst [vmem:[#allocation95_spill] sm:$0xff] %v5305_v42  ;;  %v2293_v46 = vadd.f32 %v2229_v38, %v5287_v32  ;;  %v4242_v62 = vpop.f32.mrf.mxu0  ;;  %v5367_v11 = vclamps-f32 %v2253_v59, 1.0  ;;  %v5369_v47 = vclamps-f32 %v2261_v27, 1.0  ;;  %v1924_v19 = vadd.f32 %v5181_v44, %v1797_v40 }
 0x43f   :  { %7110 = vst [vmem:[#allocation97_spill] sm:$0xff] %v5317_v60  ;;  %7111 = vst [vmem:[#allocation98_spill] sm:$0xff] %v5319_v58  ;;  %v5376_v41 = vclamps-f32 %v2269_v9, 1.0  ;;  %v5378_v0 = vclamps-f32 %v2277_v49, 1.0  ;;  %v5380_v5 = vclamps-f32 %v2285_v43, 1.0  ;;  %v1948_v28 = vadd.f32 %v5193_v29, %v1818_v10 }
 0x440   :  { %2446 = vst.msk [vmem:[%s6911_s5 + $0x8] sm:$0xff] %vm539_vm3, %v5299_v36  ;;  %2454 = vst.msk [vmem:[%s6911_s5 + $0x48] sm:$0xff] %vm539_vm3, %v5301_v34  ;;  %v5382_v7 = vclamps-f32 %v2293_v46, 1.0  ;;  %v2057_v56 = vpop.f32.mrf.mxu0  ;;  %v1940_v12 = vadd.f32 %v5199_v53, %v1811_v24  ;;  %v2184_v29 = vmul.f32 0.000125, %v2154_v45  ;;  %v2034_v20 = vadd.f32 %v5273_v23, %v1908_v31 }
 0x441   :  { %2462 = vst.msk [vmem:[%s6911_s5 + $0x88] sm:$0xff] %vm539_vm3, %v5303_v3  ;;  %2470 = vst.msk [vmem:[%s6911_s5 + $0xc8] sm:$0xff] %vm539_vm3, %v5305_v42  ;;  %v2052_v8 = vadd.f32 %v5295_v39, %v1932_v1  ;;  %v2046_v21 = vadd.f32 %v2045_v14, %v1924_v19  ;;  %v2064_v38 = vadd.f32 %v4242_v62, %v1948_v28 }
 0x442   :  { %7112 = vst [vmem:[#allocation99_spill] sm:$0xff] %v5367_v11  ;;  %7113 = vst [vmem:[#allocation100_spill] sm:$0xff] %v5369_v47  ;;  %v2058_v59 = vadd.f32 %v2057_v56, %v1940_v12 }
 0x443   :  { %7114 = vst [vmem:[#allocation101_spill] sm:$0xff] %v5376_v41  ;;  %7115 = vst [vmem:[#allocation102_spill] sm:$0xff] %v5378_v0  ;;  %v2166_v45 = vadd.f32 %v5307_v18, %v2052_v8  ;;  %v2178_v12 = vadd.f32 %v4256_v15, %v2064_v38 }
 0x444   :  { %7116 = vst [vmem:[#allocation103_spill] sm:$0xff] %v5380_v5  ;;  %7117 = vst [vmem:[#allocation104_spill] sm:$0xff] %v5382_v7 }
 0x445   :  { %7119 = vst [vmem:[#allocation106_spill] sm:$0xff] %v5419_v51 }
 0x448   :  { %v2238_v13 = vld [vmem:[%s6910_s3 + $0x188] sm:$0xff] }
 0x449   :  { %2478 = vst.msk [vmem:[%s6911_s5 + $0x108] sm:$0xff] %vm539_vm3, %v5317_v60  ;;  %2486 = vst.msk [vmem:[%s6911_s5 + $0x148] sm:$0xff] %vm539_vm3, %v5319_v58  ;;  %v5393_v44 = vadd.f32 %v2238_v13, %v5263_v4 }
 0x450   :  { %v2237_v37 = vld [vmem:[%s6910_s3 + $0x180] sm:$0xff]  ;;  %v2192_v25 = vld [vmem:[%s6910_s3 + $0x18] sm:$0xff]  ;;  %v2246_v54 = vld [vmem:[%s6910_s3 + $0x1c8] sm:$0xff] }
 0x451   :  { %v2245_v35 = vld [vmem:[%s6910_s3 + $0x1c0] sm:$0xff]  ;;  %v5396_v40 = vadd.f32 %v2237_v37, %v5287_v32  ;;  %v5459_v39 = vadd.f32 %v2246_v54, %v5263_v4  ;;  %v2256_v14 = vadd.f32 %v2192_v25, %v2184_v29  ;;  %v2148_v4 = vadd.f32 %v5261_v6, %v2034_v20 }
 0x452   :  { %2445 = vst.msk [vmem:[%s6911_s5] sm:$0xff] %vm539_vm3, %v5367_v11  ;;  %2453 = vst.msk [vmem:[%s6911_s5 + $0x40] sm:$0xff] %vm539_vm3, %v5369_v47  ;;  %v5456_v23 = vadd.f32 %v2245_v35, %v5287_v32  ;;  %v2160_v25 = vadd.f32 %v2159_v2, %v2046_v21  ;;  %v2171_v2 = vpop.f32.mrf.mxu1 }
 0x453   :  { %v5483_v19 = vclamps-f32 %v2256_v14, 1.0  ;;  %v5499_v18 = vmul.f32 0.000125, %v2148_v4  ;;  %v2172_v20 = vadd.f32 %v2171_v2, %v2058_v59 }
 0x454   :  { %v5503_v28 = vmul.f32 0.000125, %v2160_v25 }
 0x455   :  { %7120 = vst [vmem:[#allocation107_spill] sm:$0xff] %v5483_v19 }
 0x459   :  { %v2200_v57 = vld [vmem:[%s6910_s3 + $0x58] sm:$0xff] }
 0x45a   :  { %v2208_v52 = vld [vmem:[%s6910_s3 + $0x98] sm:$0xff]  ;;  %v2264_v31 = vadd.f32 %v2200_v57, %v2184_v29 }
 0x45b   :  { %v2216_v48 = vld [vmem:[%s6910_s3 + $0xd8] sm:$0xff]  ;;  %v2272_v1 = vadd.f32 %v2208_v52, %v2184_v29  ;;  %v5497_v52 = vpop.permute.xlu1 %2662 }
 0x45c   :  { %2461 = vst.msk [vmem:[%s6911_s5 + $0x80] sm:$0xff] %vm539_vm3, %v5376_v41  ;;  %2469 = vst.msk [vmem:[%s6911_s5 + $0xc0] sm:$0xff] %vm539_vm3, %v5378_v0  ;;  %v2280_v13 = vadd.f32 %v2216_v48, %v2184_v29  ;;  %v5485_v56 = vclamps-f32 %v2264_v31, 1.0  ;;  %v5501_v48 = vmul.f32 0.000125, %v2166_v45 }
 0x45d   :  { %2477 = vst.msk [vmem:[%s6911_s5 + $0x100] sm:$0xff] %vm539_vm3, %v5380_v5  ;;  %2485 = vst.msk [vmem:[%s6911_s5 + $0x140] sm:$0xff] %vm539_vm3, %v5382_v7  ;;  %v5487_v6 = vclamps-f32 %v2272_v1, 1.0 }
 0x45e   :  { %7121 = vst [vmem:[#allocation108_spill] sm:$0xff] %v5485_v56  ;;  %v5489_v35 = vclamps-f32 %v2280_v13, 1.0  ;;  %7124 = vst [vmem:[#allocation111_spill] sm:$0xff] %v5497_v52 }
 0x45f   :  { %7122 = vst [vmem:[#allocation109_spill] sm:$0xff] %v5487_v6 }
 0x460   :  { %7123 = vst [vmem:[#allocation110_spill] sm:$0xff] %v5489_v35 }
 0x464   :  { %v2224_v53 = vld [vmem:[%s6910_s3 + $0x118] sm:$0xff]  ;;  %v2191_v37 = vld [vmem:[%s6910_s3 + $0x10] sm:$0xff]  ;;  %v2194_v54 = vld [vmem:[%s6910_s3 + $0x28] sm:$0xff] }
 0x465   :  { %v2232_v27 = vld [vmem:[%s6910_s3 + $0x158] sm:$0xff]  ;;  %v2199_v9 = vld [vmem:[%s6910_s3 + $0x50] sm:$0xff]  ;;  %v5470_v49 = vadd.f32 %v2224_v53, %v2184_v29  ;;  %v2202_v57 = vld [vmem:[%s6910_s3 + $0x68] sm:$0xff]  ;;  %v5505_v53 = vpop.permute.xlu0 %2627  ;;  %v2255_v38 = vadd.f32 %v2191_v37, %v5499_v18 }
 0x466   :  { %v2240_v10 = vld [vmem:[%s6910_s3 + $0x198] sm:$0xff]  ;;  %v2207_v32 = vld [vmem:[%s6910_s3 + $0x90] sm:$0xff]  ;;  %7125 = vst [vmem:[#allocation112_spill] sm:$0xff] %v5505_v53  ;;  %v5527_v8 = vadd.f32 %v2232_v27, %v2184_v29  ;;  %v2263_v14 = vadd.f32 %v2199_v9, %v5499_v18 }
 0x467   :  { %v2248_v24 = vld [vmem:[%s6910_s3 + $0x1d8] sm:$0xff]  ;;  %v2215_v43 = vld [vmem:[%s6910_s3 + $0xd0] sm:$0xff]  ;;  %v5529_v21 = vadd.f32 %v2240_v10, %v2184_v29  ;;  %v2271_v31 = vadd.f32 %v2207_v32, %v5499_v18  ;;  %v2258_v10 = vadd.f32 %v2194_v54, %v5501_v48  ;;  %v5558_v4 = vclamps-f32 %v2255_v38, 1.0 }
 0x468   :  { %v2223_v46 = vld [vmem:[%s6910_s3 + $0x110] sm:$0xff]  ;;  %v5531_v15 = vadd.f32 %v2248_v24, %v2184_v29  ;;  %v2279_v1 = vadd.f32 %v2215_v43, %v5499_v18  ;;  %v2266_v24 = vadd.f32 %v2202_v57, %v5501_v48  ;;  %v5560_v43 = vclamps-f32 %v2263_v14, 1.0 }
 0x469   :  { %v2231_v62 = vld [vmem:[%s6910_s3 + $0x150] sm:$0xff]  ;;  %v2287_v27 = vadd.f32 %v2223_v46, %v5499_v18  ;;  %7126 = vst [vmem:[#allocation113_spill] sm:$0xff] %v5558_v4  ;;  %v5562_v46 = vclamps-f32 %v2271_v31, 1.0  ;;  %v5575_v2 = vclamps-f32 %v2258_v10, 1.0 }
 0x46a   :  { %2448 = vst.msk [vmem:[%s6911_s5 + $0x18] sm:$0xff] %vm539_vm3, %v5483_v19  ;;  %2456 = vst.msk [vmem:[%s6911_s5 + $0x58] sm:$0xff] %vm539_vm3, %v5485_v56  ;;  %v5545_v29 = vadd.f32 %v2231_v62, %v5499_v18  ;;  %v5564_v62 = vclamps-f32 %v2279_v1, 1.0  ;;  %v5577_v38 = vclamps-f32 %v2266_v24, 1.0 }
 0x46b   :  { %2464 = vst.msk [vmem:[%s6911_s5 + $0x98] sm:$0xff] %vm539_vm3, %v5487_v6  ;;  %2472 = vst.msk [vmem:[%s6911_s5 + $0xd8] sm:$0xff] %vm539_vm3, %v5489_v35  ;;  %v5572_v54 = vclamps-f32 %v2287_v27, 1.0  ;;  %v5588_v27 = vpop.permute.xlu1 %2728 }
 0x46c   :  { %7127 = vst [vmem:[#allocation114_spill] sm:$0xff] %v5560_v43  ;;  %7128 = vst [vmem:[#allocation115_spill] sm:$0xff] %v5562_v46 }
 0x46d   :  { %7129 = vst [vmem:[#allocation116_spill] sm:$0xff] %v5564_v62  ;;  %7130 = vst [vmem:[#allocation117_spill] sm:$0xff] %v5572_v54 }
 0x46e   :  { %7131 = vst [vmem:[#allocation118_spill] sm:$0xff] %v5575_v2  ;;  %7132 = vst [vmem:[#allocation119_spill] sm:$0xff] %v5577_v38 }
 0x46f   :  { %7133 = vst [vmem:[#allocation120_spill] sm:$0xff] %v5588_v27 }
 0x472   :  { %v2210_v13 = vld [vmem:[%s6910_s3 + $0xa8] sm:$0xff]  ;;  %v2193_v59 = vld [vmem:[%s6910_s3 + $0x20] sm:$0xff]  ;;  %v2196_v45 = vld [vmem:[%s6910_s3 + $0x38] sm:$0xff] }
 0x473   :  { %v2201_v37 = vld [vmem:[%s6910_s3 + $0x60] sm:$0xff]  ;;  %v2218_v25 = vld [vmem:[%s6910_s3 + $0xe8] sm:$0xff]  ;;  %v2274_v57 = vadd.f32 %v2210_v13, %v5501_v48  ;;  %v2204_v14 = vld [vmem:[%s6910_s3 + $0x78] sm:$0xff]  ;;  %v2257_v13 = vadd.f32 %v2193_v59, %v5503_v28 }
 0x474   :  { %v2209_v9 = vld [vmem:[%s6910_s3 + $0xa0] sm:$0xff]  ;;  %v2212_v31 = vld [vmem:[%s6910_s3 + $0xb8] sm:$0xff]  ;;  %v2265_v10 = vadd.f32 %v2201_v37, %v5503_v28  ;;  %v5626_v37 = vpop.permute.xlu0 %2693  ;;  %v2282_v53 = vadd.f32 %v2218_v25, %v5501_v48 }
 0x475   :  { %v2217_v32 = vld [vmem:[%s6910_s3 + $0xe0] sm:$0xff]  ;;  %v2220_v1 = vld [vmem:[%s6910_s3 + $0xf8] sm:$0xff]  ;;  %v2273_v24 = vadd.f32 %v2209_v9, %v5503_v28  ;;  %7134 = vst [vmem:[#allocation121_spill] sm:$0xff] %v5626_v37  ;;  %v5633_v9 = vclamps-f32 %v2274_v57, 1.0  ;;  %v2187_v37 = vmul.f32 0.000125, %v2172_v20 }
 0x476   :  { %2447 = vst.msk [vmem:[%s6911_s5 + $0x10] sm:$0xff] %vm539_vm3, %v5558_v4  ;;  %2455 = vst.msk [vmem:[%s6911_s5 + $0x50] sm:$0xff] %vm539_vm3, %v5560_v43  ;;  %v2281_v27 = vadd.f32 %v2217_v32, %v5503_v28  ;;  %v2188_v32 = vmul.f32 0.000125, %v2178_v12  ;;  %v5652_v33 = vclamps-f32 %v2257_v13, 1.0  ;;  %v5654_v17 = vclamps-f32 %v2265_v10, 1.0 }
 0x477   :  { %2463 = vst.msk [vmem:[%s6911_s5 + $0x90] sm:$0xff] %vm539_vm3, %v5562_v46  ;;  %2471 = vst.msk [vmem:[%s6911_s5 + $0xd0] sm:$0xff] %vm539_vm3, %v5564_v62  ;;  %v5656_v30 = vclamps-f32 %v2273_v24, 1.0 }
 0x478   :  { %7135 = vst [vmem:[#allocation122_spill] sm:$0xff] %v5633_v9  ;;  %7136 = vst [vmem:[#allocation123_spill] sm:$0xff] %v5652_v33  ;;  %v5658_v61 = vclamps-f32 %v2281_v27, 1.0  ;;  %v2260_v22 = vadd.f32 %v2196_v45, %v2188_v32  ;;  %v2268_v58 = vadd.f32 %v2204_v14, %v2188_v32  ;;  %v2276_v7 = vadd.f32 %v2212_v31, %v2188_v32  ;;  %v5730_v31 = vpop.permute.xlu1 %2697 }
 0x479   :  { %7137 = vst [vmem:[#allocation124_spill] sm:$0xff] %v5654_v17  ;;  %7138 = vst [vmem:[#allocation125_spill] sm:$0xff] %v5656_v30 }
 0x47a   :  { %7139 = vst [vmem:[#allocation126_spill] sm:$0xff] %v5658_v61  ;;  %7142 = vst [vmem:[#allocation129_spill] sm:$0xff] %v5730_v31 }
 0x47e   :  { %v2195_v55 = vld [vmem:[%s6910_s3 + $0x30] sm:$0xff]  ;;  %v2226_v59 = vld [vmem:[%s6910_s3 + $0x128] sm:$0xff] }
 0x47f   :  { %v2203_v52 = vld [vmem:[%s6910_s3 + $0x70] sm:$0xff]  ;;  %v2259_v27 = vadd.f32 %v2195_v55, %v2187_v37 }
 0x480   :  { %v2211_v50 = vld [vmem:[%s6910_s3 + $0xb0] sm:$0xff]  ;;  %v2267_v13 = vadd.f32 %v2203_v52, %v2187_v37 }
 0x481   :  { %2479 = vst.msk [vmem:[%s6911_s5 + $0x110] sm:$0xff] %vm539_vm3, %v5572_v54  ;;  %2450 = vst.msk [vmem:[%s6911_s5 + $0x28] sm:$0xff] %vm539_vm3, %v5575_v2  ;;  %v2275_v14 = vadd.f32 %v2211_v50, %v2187_v37  ;;  %v2284_v54 = vadd.f32 %v2220_v1, %v2188_v32  ;;  %v5715_v60 = vclamps-f32 %v2259_v27, 1.0 }
 0x482   :  { %2458 = vst.msk [vmem:[%s6911_s5 + $0x68] sm:$0xff] %vm539_vm3, %v5577_v38  ;;  %v5717_v5 = vclamps-f32 %v2267_v13, 1.0 }
 0x483   :  { %7140 = vst [vmem:[#allocation127_spill] sm:$0xff] %v5715_v60 }
 0x484   :  { %7141 = vst [vmem:[#allocation128_spill] sm:$0xff] %v5717_v5 }
 0x489   :  { %v2219_v51 = vld [vmem:[%s6910_s3 + $0xf0] sm:$0xff]  ;;  %v2234_v57 = vld [vmem:[%s6910_s3 + $0x168] sm:$0xff]  ;;  %v2225_v12 = vld [vmem:[%s6910_s3 + $0x120] sm:$0xff] }
 0x48a   :  { %v2233_v20 = vld [vmem:[%s6910_s3 + $0x160] sm:$0xff]  ;;  %v2239_v25 = vld [vmem:[%s6910_s3 + $0x190] sm:$0xff]  ;;  %v2283_v16 = vadd.f32 %v2219_v51, %v2187_v37  ;;  %v2289_v50 = vadd.f32 %v2225_v12, %v5503_v28  ;;  %v2290_v51 = vadd.f32 %v2226_v59, %v5501_v48  ;;  %v2298_v59 = vadd.f32 %v2234_v57, %v5501_v48 }
 0x48b   :  { %2466 = vst.msk [vmem:[%s6911_s5 + $0xa8] sm:$0xff] %vm539_vm3, %v5633_v9  ;;  %v2297_v12 = vadd.f32 %v2233_v20, %v5503_v28  ;;  %v5743_v9 = vpop.permute.xlu0 %2724  ;;  %v2303_v20 = vadd.f32 %v2239_v25, %v5499_v18  ;;  %v5767_v25 = vclamps-f32 %v2276_v7, 1.0 }
 0x48c   :  { %7143 = vst [vmem:[#allocation130_spill] sm:$0xff] %v5743_v9 }
 0x48d   :  { %7147 = vst [vmem:[#allocation134_spill] sm:$0xff] %v5767_v25  ;;  %v5816_v7 = vclamps-f32 %v2297_v12, 1.0  ;;  %v7186_v12 = vld [vmem:[#allocation29_spill] sm:$0xff] }
 0x48f   :  { %7160 = vst [vmem:[#allocation147_spill] sm:$0xff] %v5816_v7 }
 0x492   :  { %v2227_v10 = vld [vmem:[%s6910_s3 + $0x130] sm:$0xff]  ;;  %v2228_v24 = vld [vmem:[%s6910_s3 + $0x138] sm:$0xff] }
 0x493   :  { %v2236_v26 = vld [vmem:[%s6910_s3 + $0x178] sm:$0xff]  ;;  %v2247_v63 = vld [vmem:[%s6910_s3 + $0x1d0] sm:$0xff]  ;;  %v2291_v42 = vadd.f32 %v2227_v10, %v2187_v37  ;;  %v2292_v0 = vadd.f32 %v2228_v24, %v2188_v32 }
 0x494   :  { %2449 = vst.msk [vmem:[%s6911_s5 + $0x20] sm:$0xff] %vm539_vm3, %v5652_v33  ;;  %2457 = vst.msk [vmem:[%s6911_s5 + $0x60] sm:$0xff] %vm539_vm3, %v5654_v17  ;;  %v2300_v24 = vadd.f32 %v2236_v26, %v2188_v32  ;;  %v2311_v6 = vadd.f32 %v2247_v63, %v5499_v18  ;;  %v5761_v17 = vclamps-f32 %v2260_v22, 1.0  ;;  %v5765_v26 = vclamps-f32 %v2275_v14, 1.0  ;;  %v5778_v18 = vpop.permute.xlu1 %2763 }
 0x495   :  { %2465 = vst.msk [vmem:[%s6911_s5 + $0xa0] sm:$0xff] %vm539_vm3, %v5656_v30  ;;  %2473 = vst.msk [vmem:[%s6911_s5 + $0xe0] sm:$0xff] %vm539_vm3, %v5658_v61  ;;  %v5776_v63 = vclamps-f32 %v5470_v49, 1.0  ;;  %v5782_v22 = vclamps-f32 %v2290_v51, 1.0  ;;  %v5818_v49 = vclamps-f32 %v2298_v59, 1.0  ;;  %v3437_v59 = vmul.f32 %v5558_v4, %v7186_v12  ;;  %v7201_v4 = vld [vmem:[#allocation101_spill] sm:$0xff] }
 0x496   :  { %7144 = vst [vmem:[#allocation131_spill] sm:$0xff] %v5761_v17  ;;  %7146 = vst [vmem:[#allocation133_spill] sm:$0xff] %v5765_v26 }
 0x497   :  { %7151 = vst [vmem:[#allocation138_spill] sm:$0xff] %v5776_v63  ;;  %7152 = vst [vmem:[#allocation139_spill] sm:$0xff] %v5778_v18  ;;  %v7191_v18 = vld [vmem:[#allocation71_spill] sm:$0xff] }
 0x498   :  { %7154 = vst [vmem:[#allocation141_spill] sm:$0xff] %v5782_v22  ;;  %7161 = vst [vmem:[#allocation148_spill] sm:$0xff] %v5818_v49 }
 0x49c   :  { %v2235_v55 = vld [vmem:[%s6910_s3 + $0x170] sm:$0xff]  ;;  %v2241_v52 = vld [vmem:[%s6910_s3 + $0x1a0] sm:$0xff]  ;;  %v2242_v45 = vld [vmem:[%s6910_s3 + $0x1a8] sm:$0xff] }
 0x49d   :  { %v2243_v61 = vld [vmem:[%s6910_s3 + $0x1b0] sm:$0xff]  ;;  %v2244_v35 = vld [vmem:[%s6910_s3 + $0x1b8] sm:$0xff]  ;;  %v2249_v62 = vld [vmem:[%s6910_s3 + $0x1e0] sm:$0xff]  ;;  %v2299_v10 = vadd.f32 %v2235_v55, %v2187_v37  ;;  %v2305_v57 = vadd.f32 %v2241_v52, %v5503_v28  ;;  %v2306_v9 = vadd.f32 %v2242_v45, %v5501_v48  ;;  %v5763_v55 = vclamps-f32 %v2268_v58, 1.0 }
 0x49e   :  { %v2250_v1 = vld [vmem:[%s6910_s3 + $0x1e8] sm:$0xff]  ;;  %v2251_v27 = vld [vmem:[%s6910_s3 + $0x1f0] sm:$0xff]  ;;  %v2252_v13 = vld [vmem:[%s6910_s3 + $0x1f8] sm:$0xff]  ;;  %v2307_v31 = vadd.f32 %v2243_v61, %v2187_v37  ;;  %v2308_v30 = vadd.f32 %v2244_v35, %v2188_v32  ;;  %v2313_v46 = vadd.f32 %v2249_v62, %v5503_v28  ;;  %v5769_v52 = vclamps-f32 %v2282_v53, 1.0 }
 0x49f   :  { %2451 = vst.msk [vmem:[%s6911_s5 + $0x30] sm:$0xff] %vm539_vm3, %v5715_v60  ;;  %2459 = vst.msk [vmem:[%s6911_s5 + $0x70] sm:$0xff] %vm539_vm3, %v5717_v5  ;;  %v2314_v3 = vadd.f32 %v2250_v1, %v5501_v48  ;;  %v2315_v41 = vadd.f32 %v2251_v27, %v2187_v37  ;;  %v2316_v38 = vadd.f32 %v2252_v13, %v2188_v32  ;;  %v5771_v61 = vclamps-f32 %v2283_v16, 1.0  ;;  %v5808_v16 = vpop.permute.xlu0 %2631  ;;  %v7185_v27 = vld [vmem:[#allocation25_spill] sm:$0xff] }
 0x4a0   :  { %7145 = vst [vmem:[#allocation132_spill] sm:$0xff] %v5763_v55  ;;  %7148 = vst [vmem:[#allocation135_spill] sm:$0xff] %v5769_v52  ;;  %v5773_v35 = vclamps-f32 %v2284_v54, 1.0  ;;  %v5780_v48 = vclamps-f32 %v2289_v50, 1.0  ;;  %v5784_v58 = vclamps-f32 %v2291_v42, 1.0  ;;  %v5786_v28 = vclamps-f32 %v2292_v0, 1.0 }
 0x4a1   :  { %7149 = vst [vmem:[#allocation136_spill] sm:$0xff] %v5771_v61  ;;  %2452 = vst.msk [vmem:[%s6911_s5 + $0x38] sm:$0xff] %vm539_vm3, %v5761_v17  ;;  %v5811_v42 = vclamps-f32 %v5545_v29, 1.0  ;;  %v5814_v0 = vclamps-f32 %v5527_v8, 1.0  ;;  %v5840_v53 = vclamps-f32 %v2299_v10, 1.0  ;;  %v5842_v8 = vclamps-f32 %v2300_v24, 1.0 }
 0x4a2   :  { %7150 = vst [vmem:[#allocation137_spill] sm:$0xff] %v5773_v35  ;;  %7153 = vst [vmem:[#allocation140_spill] sm:$0xff] %v5780_v48  ;;  %v5845_v29 = vclamps-f32 %v5396_v40, 1.0  ;;  %v5848_v62 = vclamps-f32 %v5393_v44, 1.0  ;;  %v5870_v44 = vclamps-f32 %v2303_v20, 1.0  ;;  %v5873_v40 = vclamps-f32 %v5529_v21, 1.0 }
 0x4a3   :  { %7155 = vst [vmem:[#allocation142_spill] sm:$0xff] %v5784_v58  ;;  %7156 = vst [vmem:[#allocation143_spill] sm:$0xff] %v5786_v28  ;;  %v5875_v54 = vclamps-f32 %v2305_v57, 1.0  ;;  %v5877_v37 = vclamps-f32 %v2306_v9, 1.0  ;;  %v5899_v21 = vclamps-f32 %v2307_v31, 1.0  ;;  %v5901_v9 = vclamps-f32 %v2308_v30, 1.0 }
 0x4a4   :  { %2460 = vst.msk [vmem:[%s6911_s5 + $0x78] sm:$0xff] %vm539_vm3, %v5763_v55  ;;  %2467 = vst.msk [vmem:[%s6911_s5 + $0xb0] sm:$0xff] %vm539_vm3, %v5765_v26  ;;  %v5904_v32 = vclamps-f32 %v5456_v23, 1.0  ;;  %v5907_v45 = vclamps-f32 %v5459_v39, 1.0  ;;  %v5929_v30 = vclamps-f32 %v2311_v6, 1.0  ;;  %v5932_v23 = vclamps-f32 %v5531_v15, 1.0 }
 0x4a5   :  { %2468 = vst.msk [vmem:[%s6911_s5 + $0xb8] sm:$0xff] %vm539_vm3, %v5767_v25  ;;  %7157 = vst [vmem:[#allocation144_spill] sm:$0xff] %v5808_v16  ;;  %v5934_v39 = vclamps-f32 %v2313_v46, 1.0  ;;  %v5936_v14 = vclamps-f32 %v2314_v3, 1.0  ;;  %v5958_v3 = vpop.permute.xlu1 %2732  ;;  %v5960_v6 = vclamps-f32 %v2315_v41, 1.0  ;;  %v5962_v15 = vclamps-f32 %v2316_v38, 1.0  ;;  %v5984_v41 = vpop.permute.xlu0 %2759 }
 0x4a6   :  { %7158 = vst [vmem:[#allocation145_spill] sm:$0xff] %v5811_v42  ;;  %7159 = vst [vmem:[#allocation146_spill] sm:$0xff] %v5814_v0  ;;  %v7182_v46 = vld [vmem:[#allocation30_spill] sm:$0xff]  ;;  %v7183_v50 = vld [vmem:[#allocation32_spill] sm:$0xff]  ;;  %v6018_v13 = vmul.f32 %v5369_v47, %v7185_v27 }
 0x4a7   :  { %2474 = vst.msk [vmem:[%s6911_s5 + $0xe8] sm:$0xff] %vm539_vm3, %v5769_v52  ;;  %2475 = vst.msk [vmem:[%s6911_s5 + $0xf0] sm:$0xff] %vm539_vm3, %v5771_v61  ;;  %v5988_v38 = vmul.f32 %v5299_v36, %v7182_v46  ;;  %v5992_v51 = vmul.f32 %v5301_v34, %v7183_v50  ;;  %v7184_v31 = vld [vmem:[#allocation23_spill] sm:$0xff]  ;;  %v7187_v10 = vld [vmem:[#allocation37_spill] sm:$0xff] }
 0x4a8   :  { %2476 = vst.msk [vmem:[%s6911_s5 + $0xf8] sm:$0xff] %vm539_vm3, %v5773_v35  ;;  %2480 = vst.msk [vmem:[%s6911_s5 + $0x118] sm:$0xff] %vm539_vm3, %v5776_v63  ;;  %v3435_v1 = vmul.f32 %v5367_v11, %v7184_v31  ;;  %v3438_v24 = vmul.f32 %v5483_v19, %v7187_v10  ;;  %v7188_v20 = vld [vmem:[#allocation50_spill] sm:$0xff]  ;;  %v7189_v46 = vld [vmem:[#allocation55_spill] sm:$0xff] }
 0x4a9   :  { %7162 = vst [vmem:[#allocation149_spill] sm:$0xff] %v5840_v53  ;;  %7163 = vst [vmem:[#allocation150_spill] sm:$0xff] %v5842_v8  ;;  %v3439_v57 = vmul.f32 %v5652_v33, %v7188_v20  ;;  %v3440_v50 = vmul.f32 %v5575_v2, %v7189_v46  ;;  %v7190_v31 = vld [vmem:[#allocation63_spill] sm:$0xff]  ;;  %v7193_v16 = vld [vmem:[#allocation42_spill] sm:$0xff] }
 0x4aa   :  { %7164 = vst [vmem:[#allocation151_spill] sm:$0xff] %v5845_v29  ;;  %7165 = vst [vmem:[#allocation152_spill] sm:$0xff] %v5848_v62  ;;  %v6040_v27 = vmul.f32 %v5715_v60, %v7190_v31  ;;  %v6052_v10 = vmul.f32 %v5485_v56, %v7193_v16  ;;  %v7194_v20 = vld [vmem:[#allocation47_spill] sm:$0xff]  ;;  %v7195_v33 = vld [vmem:[#allocation124_spill] sm:$0xff] }
 0x4ab   :  { %2481 = vst.msk [vmem:[%s6911_s5 + $0x120] sm:$0xff] %vm539_vm3, %v5780_v48  ;;  %2482 = vst.msk [vmem:[%s6911_s5 + $0x128] sm:$0xff] %vm539_vm3, %v5782_v22  ;;  %v6056_v19 = vmul.f32 %v7195_v33, %v7194_v20  ;;  %v7196_v46 = vld [vmem:[#allocation60_spill] sm:$0xff]  ;;  %v7197_v2 = vld [vmem:[#allocation119_spill] sm:$0xff]  ;;  %v6078_v33 = vpop.permute.xlu1 %2701 }
 0x4ac   :  { %2483 = vst.msk [vmem:[%s6911_s5 + $0x130] sm:$0xff] %vm539_vm3, %v5784_v58  ;;  %2484 = vst.msk [vmem:[%s6911_s5 + $0x138] sm:$0xff] %vm539_vm3, %v5786_v28  ;;  %v6060_v31 = vmul.f32 %v7197_v2, %v7196_v46  ;;  %v7198_v60 = vld [vmem:[#allocation68_spill] sm:$0xff]  ;;  %v7202_v56 = vld [vmem:[#allocation33_spill] sm:$0xff] }
 0x4ad   :  { %7166 = vst [vmem:[#allocation153_spill] sm:$0xff] %v5870_v44  ;;  %7167 = vst [vmem:[#allocation154_spill] sm:$0xff] %v5873_v40  ;;  %v7203_v47 = vld [vmem:[#allocation94_spill] sm:$0xff]  ;;  %v7206_v2 = vld [vmem:[#allocation115_spill] sm:$0xff] }
 0x4ae   :  { %7168 = vst [vmem:[#allocation155_spill] sm:$0xff] %v5875_v54  ;;  %7169 = vst [vmem:[#allocation156_spill] sm:$0xff] %v5877_v37  ;;  %v6076_v20 = vmul.f32 %v7203_v47, %v7202_v56  ;;  %v7205_v46 = vld [vmem:[#allocation38_spill] sm:$0xff]  ;;  %v6096_v56 = vpop.permute.xlu0 %2666  ;;  %v7214_v47 = vld [vmem:[#allocation72_spill] sm:$0xff] }
 0x4af   :  { %2487 = vst.msk [vmem:[%s6911_s5 + $0x150] sm:$0xff] %vm539_vm3, %v5811_v42  ;;  %2488 = vst.msk [vmem:[%s6911_s5 + $0x158] sm:$0xff] %vm539_vm3, %v5814_v0  ;;  %v6082_v11 = vmul.f32 %v7206_v2, %v7205_v46  ;;  %v7215_v46 = vld [vmem:[#allocation80_spill] sm:$0xff] }
 0x4b0   :  { %2489 = vst.msk [vmem:[%s6911_s5 + $0x160] sm:$0xff] %vm539_vm3, %v5816_v7  ;;  %2490 = vst.msk [vmem:[%s6911_s5 + $0x168] sm:$0xff] %vm539_vm3, %v5818_v49  ;;  %v6104_v2 = vmul.f32 %v5767_v25, %v7215_v46  ;;  %v7229_v25 = vld [vmem:[#allocation65_spill] sm:$0xff] }
 0x4b1   :  { %7170 = vst [vmem:[#allocation157_spill] sm:$0xff] %v5899_v21  ;;  %7171 = vst [vmem:[#allocation158_spill] sm:$0xff] %v5901_v9 }
 0x4b2   :  { %7172 = vst [vmem:[#allocation159_spill] sm:$0xff] %v5904_v32  ;;  %7173 = vst [vmem:[#allocation160_spill] sm:$0xff] %v5907_v45 }
 0x4b3   :  { %2491 = vst.msk [vmem:[%s6911_s5 + $0x170] sm:$0xff] %vm539_vm3, %v5840_v53  ;;  %2492 = vst.msk [vmem:[%s6911_s5 + $0x178] sm:$0xff] %vm539_vm3, %v5842_v8 }
 0x4b4   :  { %2493 = vst.msk [vmem:[%s6911_s5 + $0x180] sm:$0xff] %vm539_vm3, %v5845_v29  ;;  %2494 = vst.msk [vmem:[%s6911_s5 + $0x188] sm:$0xff] %vm539_vm3, %v5848_v62 }
 0x4b5   :  { %7174 = vst [vmem:[#allocation161_spill] sm:$0xff] %v5929_v30  ;;  %7175 = vst [vmem:[#allocation162_spill] sm:$0xff] %v5932_v23 }
 0x4b6   :  { %7176 = vst [vmem:[#allocation163_spill] sm:$0xff] %v5934_v39  ;;  %7177 = vst [vmem:[#allocation164_spill] sm:$0xff] %v5936_v14 }
 0x4b7   :  { %2495 = vst.msk [vmem:[%s6911_s5 + $0x190] sm:$0xff] %vm539_vm3, %v5870_v44  ;;  %2496 = vst.msk [vmem:[%s6911_s5 + $0x198] sm:$0xff] %vm539_vm3, %v5873_v40 }
 0x4b8   :  { %2497 = vst.msk [vmem:[%s6911_s5 + $0x1a0] sm:$0xff] %vm539_vm3, %v5875_v54  ;;  %2498 = vst.msk [vmem:[%s6911_s5 + $0x1a8] sm:$0xff] %vm539_vm3, %v5877_v37 }
 0x4b9   :  { %7178 = vst [vmem:[#allocation165_spill] sm:$0xff] %v5958_v3  ;;  %7179 = vst [vmem:[#allocation166_spill] sm:$0xff] %v5960_v6  ;;  %v7192_v3 = vld [vmem:[#allocation34_spill] sm:$0xff] }
 0x4ba   :  { %7180 = vst [vmem:[#allocation167_spill] sm:$0xff] %v5962_v15  ;;  %2499 = vst.msk [vmem:[%s6911_s5 + $0x1b0] sm:$0xff] %vm539_vm3, %v5899_v21  ;;  %v6048_v12 = vmul.f32 %v5560_v43, %v7192_v3  ;;  %v7200_v43 = vld [vmem:[#allocation27_spill] sm:$0xff] }
 0x4bb   :  { %2500 = vst.msk [vmem:[%s6911_s5 + $0x1b8] sm:$0xff] %vm539_vm3, %v5901_v9  ;;  %2501 = vst.msk [vmem:[%s6911_s5 + $0x1c0] sm:$0xff] %vm539_vm3, %v5904_v32  ;;  %v6072_v16 = vmul.f32 %v7201_v4, %v7200_v43  ;;  %v7211_v43 = vld [vmem:[#allocation64_spill] sm:$0xff]  ;;  %v7212_v4 = vld [vmem:[#allocation122_spill] sm:$0xff] }
 0x4bc   :  { %2502 = vst.msk [vmem:[%s6911_s5 + $0x1c8] sm:$0xff] %vm539_vm3, %v5907_v45  ;;  %7181 = vst [vmem:[#allocation168_spill] sm:$0xff] %v5984_v41  ;;  %v6044_v41 = vmul.f32 %v5761_v17, %v7191_v18  ;;  %v6064_v18 = vmul.f32 %v5717_v5, %v7198_v60  ;;  %v7199_v17 = vld [vmem:[#allocation76_spill] sm:$0xff]  ;;  %v7207_v60 = vld [vmem:[#allocation46_spill] sm:$0xff] }
 0x4bd   :  { %2503 = vst.msk [vmem:[%s6911_s5 + $0x1d0] sm:$0xff] %vm539_vm3, %v5929_v30  ;;  %2504 = vst.msk [vmem:[%s6911_s5 + $0x1d8] sm:$0xff] %vm539_vm3, %v5932_v23  ;;  %v6068_v3 = vmul.f32 %v5763_v55, %v7199_v17  ;;  %v7208_v5 = vld [vmem:[#allocation109_spill] sm:$0xff]  ;;  %v7209_v17 = vld [vmem:[#allocation56_spill] sm:$0xff] }
 0x4be   :  { %2505 = vst.msk [vmem:[%s6911_s5 + $0x1e0] sm:$0xff] %vm539_vm3, %v5934_v39  ;;  %2506 = vst.msk [vmem:[%s6911_s5 + $0x1e8] sm:$0xff] %vm539_vm3, %v5936_v14  ;;  %v6086_v34 = vmul.f32 %v7208_v5, %v7207_v60  ;;  %v7210_v55 = vld [vmem:[#allocation125_spill] sm:$0xff]  ;;  %v7217_v60 = vld [vmem:[#allocation31_spill] sm:$0xff] }
 0x4bf   :  { %2507 = vst.msk [vmem:[%s6911_s5 + $0x1f0] sm:$0xff] %vm539_vm3, %v5960_v6  ;;  %2508 = vst.msk [vmem:[%s6911_s5 + $0x1f8] sm:$0xff] %vm539_vm3, %v5962_v15  ;;  %v6090_v36 = vmul.f32 %v7210_v55, %v7209_v17  ;;  %v6094_v15 = vmul.f32 %v7212_v4, %v7211_v43  ;;  %v7218_v5 = vld [vmem:[#allocation102_spill] sm:$0xff]  ;;  %v7219_v17 = vld [vmem:[#allocation35_spill] sm:$0xff] }
 0x4c0   :  { %7204 = vst [vmem:[#allocation30_spill] sm:$0xff] %v6078_v33  ;;  %7213 = vst [vmem:[#allocation32_spill] sm:$0xff] %v6096_v56  ;;  %v6100_v33 = vmul.f32 %v5765_v26, %v7214_v47  ;;  %v6108_v6 = vmul.f32 %v7218_v5, %v7217_v60  ;;  %v7220_v55 = vld [vmem:[#allocation95_spill] sm:$0xff]  ;;  %v7222_v4 = vld [vmem:[#allocation116_spill] sm:$0xff]  ;;  %v6128_v60 = vmul.f32 %v5769_v52, %v7229_v25 }
 0x4c1   :  { %7216 = vst [vmem:[#allocation23_spill] sm:$0xff] %v6104_v2  ;;  %v6112_v14 = vmul.f32 %v7220_v55, %v7219_v17  ;;  %v7221_v43 = vld [vmem:[#allocation39_spill] sm:$0xff]  ;;  %v7223_v56 = vld [vmem:[#allocation52_spill] sm:$0xff]  ;;  %v7224_v23 = vld [vmem:[#allocation110_spill] sm:$0xff] }
 0x4c2   :  { %v6116_v39 = vmul.f32 %v7222_v4, %v7221_v43  ;;  %v6120_v47 = vmul.f32 %v7224_v23, %v7223_v56  ;;  %v7226_v26 = vld [vmem:[#allocation57_spill] sm:$0xff]  ;;  %v7227_v30 = vld [vmem:[#allocation126_spill] sm:$0xff]  ;;  %v7231_v55 = vld [vmem:[#allocation79_spill] sm:$0xff] }
 0x4c3   :  { %v6124_v46 = vmul.f32 %v7227_v30, %v7226_v26  ;;  %v7230_v5 = vld [vmem:[#allocation73_spill] sm:$0xff]  ;;  %v6136_v43 = vmul.f32 %v5773_v35, %v7231_v55  ;;  %v7233_v4 = vld [vmem:[#allocation36_spill] sm:$0xff]  ;;  %v7234_v2 = vld [vmem:[#allocation103_spill] sm:$0xff] }
 0x4c4   :  { %7225 = vst [vmem:[#allocation25_spill] sm:$0xff] %v6120_v47  ;;  %v6132_v17 = vmul.f32 %v5771_v61, %v7230_v5  ;;  %v6140_v56 = vmul.f32 %v7234_v2, %v7233_v4  ;;  %v7235_v23 = vld [vmem:[#allocation40_spill] sm:$0xff]  ;;  %v7236_v47 = vld [vmem:[#allocation97_spill] sm:$0xff]  ;;  %v7237_v30 = vld [vmem:[#allocation43_spill] sm:$0xff] }
 0x4c5   :  { %7228 = vst [vmem:[#allocation29_spill] sm:$0xff] %v6124_v46  ;;  %7232 = vst [vmem:[#allocation37_spill] sm:$0xff] %v6136_v43  ;;  %v6144_v26 = vmul.f32 %v7236_v47, %v7235_v23  ;;  %v7238_v46 = vld [vmem:[#allocation117_spill] sm:$0xff]  ;;  %v7244_v47 = vld [vmem:[#allocation88_spill] sm:$0xff] }
 0x4c6   :  { %v6148_v25 = vmul.f32 %v7238_v46, %v7237_v30  ;;  %v7239_v52 = vld [vmem:[#allocation53_spill] sm:$0xff]  ;;  %v6168_v30 = vmul.f32 %v5786_v28, %v7244_v47  ;;  %v7245_v46 = vld [vmem:[#allocation44_spill] sm:$0xff]  ;;  %v7252_v47 = vld [vmem:[#allocation70_spill] sm:$0xff] }
 0x4c7   :  { %v6152_v5 = vmul.f32 %v5776_v63, %v7239_v52  ;;  %v7241_v61 = vld [vmem:[#allocation61_spill] sm:$0xff]  ;;  %v7246_v43 = vld [vmem:[#allocation104_spill] sm:$0xff]  ;;  %v6190_v28 = vmul.f32 %v5816_v7, %v7252_v47 }
 0x4c8   :  { %v6156_v55 = vmul.f32 %v5780_v48, %v7241_v61  ;;  %v7242_v35 = vld [vmem:[#allocation69_spill] sm:$0xff]  ;;  %v6172_v52 = vmul.f32 %v7246_v43, %v7245_v46  ;;  %v6178_v48 = vpop.permute.xlu1 %2604  ;;  %v7253_v46 = vld [vmem:[#allocation78_spill] sm:$0xff] }
 0x4c9   :  { %7240 = vst [vmem:[#allocation50_spill] sm:$0xff] %v6152_v5  ;;  %v6160_v4 = vmul.f32 %v5782_v22, %v7242_v35  ;;  %v7243_v2 = vld [vmem:[#allocation77_spill] sm:$0xff]  ;;  %v7248_v5 = vld [vmem:[#allocation98_spill] sm:$0xff]  ;;  %7249 = vst [vmem:[#allocation55_spill] sm:$0xff] %v6178_v48  ;;  %v6194_v43 = vmul.f32 %v5818_v49, %v7253_v46 }
 0x4ca   :  { %v6164_v23 = vmul.f32 %v5784_v58, %v7243_v2  ;;  %v7247_v63 = vld [vmem:[#allocation41_spill] sm:$0xff]  ;;  %v7251_v2 = vld [vmem:[#allocation62_spill] sm:$0xff] }
 0x4cb   :  { %v6176_v61 = vmul.f32 %v7248_v5, %v7247_v63  ;;  %v7250_v35 = vld [vmem:[#allocation49_spill] sm:$0xff]  ;;  %v6186_v58 = vmul.f32 %v5814_v0, %v7251_v2  ;;  %v6196_v63 = vpop.permute.xlu0 %2635  ;;  %v7255_v5 = vld [vmem:[#allocation86_spill] sm:$0xff]  ;;  %v7257_v2 = vld [vmem:[#allocation48_spill] sm:$0xff] }
 0x4cc   :  { %v6182_v22 = vmul.f32 %v5811_v42, %v7250_v35  ;;  %7254 = vst [vmem:[#allocation63_spill] sm:$0xff] %v6196_v63  ;;  %v6200_v48 = vmul.f32 %v5840_v53, %v7255_v5  ;;  %v7256_v35 = vld [vmem:[#allocation90_spill] sm:$0xff]  ;;  %v6208_v0 = vmul.f32 %v5845_v29, %v7257_v2  ;;  %v7258_v47 = vld [vmem:[#allocation45_spill] sm:$0xff] }
 0x4cd   :  { %v6204_v42 = vmul.f32 %v5842_v8, %v7256_v35  ;;  %v6212_v7 = vmul.f32 %v5848_v62, %v7258_v47  ;;  %v7259_v46 = vld [vmem:[#allocation58_spill] sm:$0xff]  ;;  %v7262_v8 = vld [vmem:[#allocation83_spill] sm:$0xff]  ;;  %v7263_v29 = vld [vmem:[#allocation85_spill] sm:$0xff] }
 0x4ce   :  { %v6216_v49 = vmul.f32 %v5870_v44, %v7259_v46  ;;  %v7260_v63 = vld [vmem:[#allocation66_spill] sm:$0xff]  ;;  %v6228_v2 = vmul.f32 %v5877_v37, %v7262_v8  ;;  %v6232_v47 = vmul.f32 %v5899_v21, %v7263_v29  ;;  %v7264_v62 = vld [vmem:[#allocation92_spill] sm:$0xff]  ;;  %v3499_v44 = vsel %vm539_vm3, %v3435_v1, 0.0 }
 0x4cf   :  { %v6220_v5 = vmul.f32 %v5873_v40, %v7260_v63  ;;  %v7261_v53 = vld [vmem:[#allocation74_spill] sm:$0xff]  ;;  %v6236_v46 = vmul.f32 %v5901_v9, %v7264_v62  ;;  %v3500_v63 = vsel %vm539_vm3, %v5988_v38, 0.0  ;;  %v3502_v29 = vsel %vm539_vm3, %v3437_v59, 0.0  ;;  %v6255_v9 = vpop.permute.xlu1 %2736  ;;  %v6263_v59 = vpop.permute.xlu0 %2767 }
 0x4d0   :  { %v6224_v35 = vmul.f32 %v5875_v54, %v7261_v53  ;;  %v7265_v40 = vld [vmem:[#allocation54_spill] sm:$0xff]  ;;  %v7266_v54 = vld [vmem:[#allocation51_spill] sm:$0xff]  ;;  %v3501_v37 = vadd.f32 %v3500_v63, %v3499_v44  ;;  %v3504_v21 = vsel %vm539_vm3, %v3438_v24, 0.0  ;;  %v3506_v62 = vsel %vm539_vm3, %v3439_v57, 0.0  ;;  %7267 = vst [vmem:[#allocation71_spill] sm:$0xff] %v6263_v59 }
 0x4d1   :  { %v6243_v53 = vmul.f32 %v5904_v32, %v7265_v40  ;;  %v6247_v8 = vmul.f32 %v5907_v45, %v7266_v54  ;;  %v3508_v1 = vsel %vm539_vm3, %v3440_v50, 0.0  ;;  %v3520_v38 = vsel %vm539_vm3, %v6018_v13, 0.0  ;;  %v7371_v45 = vld [vmem:[#allocation129_spill] sm:$0xff] }
 0x4d2   :  { %v3503_v40 = vadd.f32 %v3502_v29, %v3501_v37  ;;  %v3510_v32 = vsel %vm539_vm3, %v6040_v27, 0.0  ;;  %v3521_v44 = vsel %vm539_vm3, %v5992_v51, 0.0  ;;  %v3523_v54 = vsel %vm539_vm3, %v6048_v12, 0.0 }
 0x4d3   :  { %v3512_v24 = vsel %vm539_vm3, %v6044_v41, 0.0  ;;  %v3522_v57 = vadd.f32 %v3521_v44, %v3520_v38  ;;  %v3525_v13 = vsel %vm539_vm3, %v6052_v10, 0.0  ;;  %v3527_v37 = vsel %vm539_vm3, %v6056_v19, 0.0  ;;  %v6291_v44 = vpop.permute.xlu1 %2705 }
 0x4d4   :  { %v3505_v50 = vadd.f32 %v3504_v21, %v3503_v40  ;;  %v3529_v27 = vsel %vm539_vm3, %v6060_v31, 0.0  ;;  %v3541_v51 = vsel %vm539_vm3, %v6072_v16, 0.0  ;;  %v3542_v12 = vsel %vm539_vm3, %v6076_v20, 0.0 }
 0x4d5   :  { %v3524_v63 = vadd.f32 %v3523_v54, %v3522_v57  ;;  %v3531_v41 = vsel %vm539_vm3, %v6064_v18, 0.0  ;;  %v3543_v29 = vadd.f32 %v3542_v12, %v3541_v51  ;;  %v3544_v10 = vsel %vm539_vm3, %v6082_v11, 0.0  ;;  %v7269_v51 = vld [vmem:[#allocation25_spill] sm:$0xff] }
 0x4d6   :  { %v3507_v38 = vadd.f32 %v3506_v62, %v3505_v50  ;;  %v3533_v19 = vsel %vm539_vm3, %v6068_v3, 0.0  ;;  %v3546_v21 = vsel %vm539_vm3, %v6086_v34, 0.0  ;;  %v3548_v31 = vsel %vm539_vm3, %v6090_v36, 0.0  ;;  %v6299_v62 = vpop.permute.xlu0 %2670  ;;  %v7270_v12 = vld [vmem:[#allocation29_spill] sm:$0xff] }
 0x4d7   :  { %v3526_v16 = vadd.f32 %v3525_v13, %v3524_v63  ;;  %v3545_v20 = vadd.f32 %v3544_v10, %v3543_v29  ;;  %v3550_v40 = vsel %vm539_vm3, %v6094_v15, 0.0  ;;  %v3562_v18 = vsel %vm539_vm3, %v6108_v6, 0.0  ;;  %v7268_v15 = vld [vmem:[#allocation23_spill] sm:$0xff] }
 0x4d8   :  { %v3509_v11 = vadd.f32 %v3508_v1, %v3507_v38  ;;  %v3552_v3 = vsel %vm539_vm3, %v6100_v33, 0.0  ;;  %v3563_v34 = vsel %vm539_vm3, %v6112_v14, 0.0  ;;  %v3565_v36 = vsel %vm539_vm3, %v6116_v39, 0.0 }
 0x4d9   :  { %v3528_v54 = vadd.f32 %v3527_v37, %v3526_v16  ;;  %v3547_v57 = vadd.f32 %v3546_v21, %v3545_v20  ;;  %v3554_v13 = vsel %vm539_vm3, %v7268_v15, 0.0  ;;  %v3564_v6 = vadd.f32 %v3563_v34, %v3562_v18 }
 0x4da   :  { %v3511_v50 = vadd.f32 %v3510_v32, %v3509_v11  ;;  %v3567_v1 = vsel %vm539_vm3, %v7269_v51, 0.0  ;;  %v3569_v33 = vsel %vm539_vm3, %v7270_v12, 0.0  ;;  %v3571_v14 = vsel %vm539_vm3, %v6128_v60, 0.0  ;;  %v7271_v11 = vld [vmem:[#allocation37_spill] sm:$0xff] }
 0x4db   :  { %v3530_v63 = vadd.f32 %v3529_v27, %v3528_v54  ;;  %v3549_v39 = vadd.f32 %v3548_v31, %v3547_v57  ;;  %v3566_v29 = vadd.f32 %v3565_v36, %v3564_v6  ;;  %v3583_v37 = vsel %vm539_vm3, %v6140_v56, 0.0  ;;  %v6317_v27 = vpop.permute.xlu1 %2608 }
 0x4dc   :  { %v3513_v10 = vadd.f32 %v3512_v24, %v3511_v50  ;;  %v3573_v38 = vsel %vm539_vm3, %v6132_v17, 0.0  ;;  %v3584_v32 = vsel %vm539_vm3, %v6144_v26, 0.0  ;;  %v3586_v21 = vsel %vm539_vm3, %v6148_v25, 0.0  ;;  %v7272_v24 = vld [vmem:[#allocation50_spill] sm:$0xff]  ;;  %v6325_v26 = vpop.permute.xlu0 %2639 }
 0x4dd   :  { %v3532_v16 = vadd.f32 %v3531_v41, %v3530_v63  ;;  %v3551_v20 = vadd.f32 %v3550_v40, %v3549_v39  ;;  %v3568_v18 = vadd.f32 %v3567_v1, %v3566_v29  ;;  %v3585_v60 = vadd.f32 %v3584_v32, %v3583_v37 }
 0x4de   :  { %v3514_v31 = vrot.slane %v3513_v10, 4  ;;  %v3575_v56 = vsel %vm539_vm3, %v7271_v11, 0.0  ;;  %v3588_v34 = vsel %vm539_vm3, %v7272_v24, 0.0  ;;  %v3590_v17 = vsel %vm539_vm3, %v6156_v55, 0.0 }
 0x4df   :  { %v3534_v36 = vadd.f32 %v3533_v19, %v3532_v16  ;;  %v3553_v25 = vadd.f32 %v3552_v3, %v3551_v20  ;;  %v3570_v41 = vadd.f32 %v3569_v33, %v3568_v18  ;;  %v3587_v40 = vadd.f32 %v3586_v21, %v3585_v60  ;;  %v7274_v16 = vld [vmem:[#allocation59_spill] sm:$0xff]  ;;  %v7275_v20 = vld [vmem:[#allocation161_spill] sm:$0xff] }
 0x4e0   :  { %v3515_v54 = vadd.f32 %v3514_v31, %v3513_v10  ;;  %v3592_v57 = vsel %vm539_vm3, %v6160_v4, 0.0  ;;  %v3604_v15 = vsel %vm539_vm3, %v6172_v52, 0.0  ;;  %v3605_v6 = vsel %vm539_vm3, %v6176_v61, 0.0  ;;  %v6337_v52 = vpop.permute.xlu1 %2740  ;;  %v6343_v10 = vpop.permute.xlu0 %2771 }
 0x4e1   :  { %v3535_v50 = vrot.slane %v3534_v36, 4  ;;  %v3555_v51 = vadd.f32 %v3554_v13, %v3553_v25  ;;  %v3572_v1 = vadd.f32 %v3571_v14, %v3570_v41  ;;  %v3589_v55 = vadd.f32 %v3588_v34, %v3587_v40  ;;  %7273 = vst [vmem:[#allocation34_spill] sm:$0xff] %v6343_v10  ;;  %v7355_v10 = vld [vmem:[#allocation97_spill] sm:$0xff] }
 0x4e2   :  { %v3516_v12 = vrot.slane %v3515_v54, 2  ;;  %v3594_v19 = vsel %vm539_vm3, %v6164_v23, 0.0  ;;  %v3606_v3 = vadd.f32 %v3605_v6, %v3604_v15  ;;  %v3607_v33 = vsel %vm539_vm3, %v6182_v22, 0.0 }
 0x4e3   :  { %v3536_v63 = vadd.f32 %v3535_v50, %v3534_v36  ;;  %v3556_v4 = vrot.slane %v3555_v51, 4  ;;  %v3574_v39 = vadd.f32 %v3573_v38, %v3572_v1  ;;  %v3591_v29 = vadd.f32 %v3590_v17, %v3589_v55  ;;  %v7279_v1 = vld [vmem:[#allocation163_spill] sm:$0xff] }
 0x4e4   :  { %v3517_v37 = vadd.f32 %v3516_v12, %v3515_v54  ;;  %v3608_v61 = vadd.f32 %v3607_v33, %v3606_v3  ;;  %v3609_v13 = vsel %vm539_vm3, %v6186_v58, 0.0  ;;  %v3611_v14 = vsel %vm539_vm3, %v6190_v28, 0.0  ;;  %v7276_v54 = vld [vmem:[#allocation67_spill] sm:$0xff] }
 0x4e5   :  { %v3537_v23 = vrot.slane %v3536_v63, 2  ;;  %v3557_v32 = vadd.f32 %v3556_v4, %v3555_v51  ;;  %v3576_v21 = vadd.f32 %v3575_v56, %v3574_v39  ;;  %v3593_v22 = vadd.f32 %v3592_v57, %v3591_v29  ;;  %v7277_v57 = vld [vmem:[#allocation162_spill] sm:$0xff]  ;;  %v6363_v51 = vpop.permute.xlu0 %2674 }
 0x4e6   :  { %v3493_v38 = vmul.f32 %v7275_v20, %v7274_v16  ;;  %v3596_v18 = vsel %vm539_vm3, %v6168_v30, 0.0  ;;  %v3610_v60 = vadd.f32 %v3609_v13, %v3608_v61  ;;  %v3613_v31 = vsel %vm539_vm3, %v6194_v43, 0.0  ;;  %v6357_v43 = vpop.permute.xlu1 %2709 }
 0x4e7   :  { %v3538_v58 = vadd.f32 %v3537_v23, %v3536_v63  ;;  %v3558_v11 = vrot.slane %v3557_v32, 2  ;;  %v3577_v24 = vrot.slane %v3576_v21, 4  ;;  %v3595_v28 = vadd.f32 %v3594_v19, %v3593_v22 }
 0x4e8   :  { %v3518_v34 = vrot.slane %v3517_v37, 1  ;;  %v3612_v17 = vadd.f32 %v3611_v14, %v3610_v60  ;;  %v3615_v56 = vsel %vm539_vm3, %v6200_v48, 0.0  ;;  %v3625_v36 = vsel %vm539_vm3, %v6208_v0, 0.0  ;;  %v7278_v0 = vld [vmem:[#allocation75_spill] sm:$0xff] }
 0x4e9   :  { %v3559_v25 = vadd.f32 %v3558_v11, %v3557_v32  ;;  %v3578_v41 = vadd.f32 %v3577_v24, %v3576_v21  ;;  %v3597_v30 = vadd.f32 %v3596_v18, %v3595_v28  ;;  %v3626_v40 = vsel %vm539_vm3, %v6212_v7, 0.0  ;;  %v7283_v18 = vld [vmem:[#allocation164_spill] sm:$0xff]  ;;  %v6386_v24 = vpop.permute.xlu0 %2643 }
 0x4ea   :  { %v3494_v15 = vmul.f32 %v7277_v57, %v7276_v54  ;;  %v3614_v6 = vadd.f32 %v3613_v31, %v3612_v17  ;;  %v3627_v50 = vadd.f32 %v3626_v40, %v3625_v36  ;;  %v3628_v48 = vsel %vm539_vm3, %v6216_v49, 0.0  ;;  %v6382_v16 = vpop.permute.xlu1 %2612  ;;  %v7285_v36 = vld [vmem:[#allocation87_spill] sm:$0xff] }
 0x4eb   :  { %v3495_v55 = vmul.f32 %v7279_v1, %v7278_v0  ;;  %v3539_v12 = vrot.slane %v3538_v58, 1  ;;  %v3579_v19 = vrot.slane %v3578_v41, 2  ;;  %v3598_v3 = vrot.slane %v3597_v30, 4  ;;  %v7353_v57 = vld [vmem:[#allocation103_spill] sm:$0xff] }
 0x4ec   :  { %v6367_v7 = vadd.f32 %v3518_v34, %v3517_v37  ;;  %v3616_v33 = vadd.f32 %v3615_v56, %v3614_v6  ;;  %v3617_v63 = vsel %vm539_vm3, %v6204_v42, 0.0  ;;  %v3629_v4 = vadd.f32 %v3628_v48, %v3627_v50  ;;  %v7288_v48 = vld [vmem:[#allocation167_spill] sm:$0xff] }
 0x4ed   :  { %v3560_v39 = vrot.slane %v3559_v25, 1  ;;  %v3599_v29 = vadd.f32 %v3598_v3, %v3597_v30  ;;  %v3630_v49 = vsel %vm539_vm3, %v6220_v5, 0.0  ;;  %v3632_v61 = vsel %vm539_vm3, %v6224_v35, 0.0  ;;  %v7282_v5 = vld [vmem:[#allocation82_spill] sm:$0xff] }
 0x4ee   :  { %7280 = vst [vmem:[#allocation42_spill] sm:$0xff] %v6367_v7  ;;  %v3580_v13 = vadd.f32 %v3579_v19, %v3578_v41  ;;  %v3618_v14 = vadd.f32 %v3617_v63, %v3616_v33  ;;  %v3631_v23 = vadd.f32 %v3630_v49, %v3629_v4  ;;  %v3646_v37 = vsel %vm539_vm3, %v6243_v53, 0.0  ;;  %v7286_v41 = vld [vmem:[#allocation166_spill] sm:$0xff]  ;;  %v6407_v3 = vpop.permute.xlu1 %2744  ;;  %v7292_v49 = vld [vmem:[#allocation84_spill] sm:$0xff] }
 0x4ef   :  { %v6377_v32 = vadd.f32 %v3539_v12, %v3538_v58  ;;  %v3600_v21 = vrot.slane %v3599_v29, 2  ;;  %v3647_v42 = vsel %vm539_vm3, %v6247_v8, 0.0  ;;  %v3649_v22 = vsel %vm539_vm3, %v3493_v38, 0.0 }
 0x4f0   :  { %v3496_v60 = vmul.f32 %v7283_v18, %v7282_v5  ;;  %v3619_v35 = vrot.slane %v3618_v14, 4  ;;  %v3633_v31 = vadd.f32 %v3632_v61, %v3631_v23  ;;  %v3648_v11 = vadd.f32 %v3647_v42, %v3646_v37  ;;  %v7293_v23 = vld [vmem:[#allocation11_spill] sm:$0xff]  ;;  %v7294_v37 = vld [vmem:[#allocation93_spill] sm:$0xff] }
 0x4f1   :  { %7281 = vst [vmem:[#allocation47_spill] sm:$0xff] %v6377_v32  ;;  %v6388_v28 = vadd.f32 %v3560_v39, %v3559_v25  ;;  %v3601_v53 = vadd.f32 %v3600_v21, %v3599_v29  ;;  %v3634_v58 = vsel %vm539_vm3, %v6228_v2, 0.0  ;;  %v3636_v8 = vsel %vm539_vm3, %v6232_v47, 0.0  ;;  %v7287_v47 = vld [vmem:[#allocation89_spill] sm:$0xff]  ;;  %v6411_v39 = vpop.permute.xlu0 %2775  ;;  %v7291_v29 = vld [vmem:[#allocation10_spill] sm:$0xff] }
 0x4f2   :  { %v3581_v38 = vrot.slane %v3580_v13, 1  ;;  %v3620_v34 = vadd.f32 %v3619_v35, %v3618_v14  ;;  %v3635_v17 = vadd.f32 %v3634_v58, %v3633_v31  ;;  %v3650_v56 = vadd.f32 %v3649_v22, %v3648_v11  ;;  %7290 = vst [vmem:[#allocation76_spill] sm:$0xff] %v6411_v39  ;;  %v7295_v5 = vld [vmem:[#allocation5_spill] sm:$0xff]  ;;  %v7296_v35 = vld [vmem:[#allocation99_spill] sm:$0xff]  ;;  %v7297_v11 = vld [vmem:[#allocation16_spill] sm:$0xff] }
 0x4f3   :  { %7284 = vst [vmem:[#allocation60_spill] sm:$0xff] %v6388_v28  ;;  %v3497_v30 = vmul.f32 %v7286_v41, %v7285_v36  ;;  %v3651_v40 = vsel %vm539_vm3, %v3494_v15, 0.0  ;;  %v3653_v54 = vsel %vm539_vm3, %v3495_v55, 0.0  ;;  %v3675_v25 = vsel %vm3029_vm9, %v6377_v32, %v6367_v7  ;;  %v7298_v58 = vld [vmem:[#allocation100_spill] sm:$0xff]  ;;  %v7300_v36 = vld [vmem:[#allocation6_spill] sm:$0xff]  ;;  %v7334_v7 = vld [vmem:[#allocation125_spill] sm:$0xff] }
 0x4f4   :  { %v3621_v2 = vrot.slane %v3620_v34, 2  ;;  %v3637_v6 = vadd.f32 %v3636_v8, %v3635_v17  ;;  %v3652_v50 = vadd.f32 %v3651_v40, %v3650_v56  ;;  %v3498_v0 = vmul.f32 %v7288_v48, %v7287_v47  ;;  %v7305_v47 = vld [vmem:[#allocation123_spill] sm:$0xff]  ;;  %v7346_v48 = vld [vmem:[#allocation110_spill] sm:$0xff] }
 0x4f5   :  { %v3602_v12 = vrot.slane %v3601_v53, 1  ;;  %v3638_v19 = vsel %vm539_vm3, %v6236_v46, 0.0  ;;  %v3676_v15 = vsel %vm3031_vm10, %v6388_v28, %v3675_v25  ;;  %v6409_v55 = vadd.f32 %v3581_v38, %v3580_v13  ;;  %v7302_v25 = vld [vmem:[#allocation7_spill] sm:$0xff]  ;;  %v7352_v39 = vld [vmem:[#allocation106_spill] sm:$0xff] }
 0x4f6   :  { %v3622_v33 = vadd.f32 %v3621_v2, %v3620_v34  ;;  %v3639_v63 = vadd.f32 %v3638_v19, %v3637_v6  ;;  %v3654_v4 = vadd.f32 %v3653_v54, %v3652_v50  ;;  %v6415_v61 = vmul.f32 %v7292_v49, %v7291_v29  ;;  %v7303_v2 = vld [vmem:[#allocation107_spill] sm:$0xff]  ;;  %v7304_v50 = vld [vmem:[#allocation12_spill] sm:$0xff]  ;;  %v7308_v29 = vld [vmem:[#allocation14_spill] sm:$0xff] }
 0x4f7   :  { %7289 = vst [vmem:[#allocation68_spill] sm:$0xff] %v6409_v55  ;;  %v3655_v14 = vsel %vm539_vm3, %v3496_v60, 0.0  ;;  %v3657_v46 = vsel %vm539_vm3, %v3497_v30, 0.0  ;;  %v6421_v21 = vmul.f32 %v7294_v37, %v7293_v23  ;;  %v3677_v22 = vsel %vm3033_vm11, %v6409_v55, %v3676_v15  ;;  %v7301_v30 = vld [vmem:[#allocation113_spill] sm:$0xff]  ;;  %v2714_v15 = vpop.permute.xlu1 %2713  ;;  %v7309_v49 = vld [vmem:[#allocation127_spill] sm:$0xff] }
 0x4f8   :  { %v3640_v13 = vrot.slane %v3639_v63, 4  ;;  %v3656_v42 = vadd.f32 %v3655_v14, %v3654_v4  ;;  %v6427_v31 = vmul.f32 %v7296_v35, %v7295_v5  ;;  %v6431_v8 = vmul.f32 %v7298_v58, %v7297_v11  ;;  %v7311_v23 = vld [vmem:[#allocation131_spill] sm:$0xff]  ;;  %v7314_v35 = vld [vmem:[#allocation13_spill] sm:$0xff]  ;;  %v7315_v11 = vld [vmem:[#allocation108_spill] sm:$0xff] }
 0x4f9   :  { %v6433_v60 = vadd.f32 %v3602_v12, %v3601_v53  ;;  %v3659_v38 = vsel %vm539_vm3, %v3498_v0, 0.0  ;;  %v3623_v34 = vrot.slane %v3622_v33, 1  ;;  %v6438_v40 = vmul.f32 %v7301_v30, %v7300_v36  ;;  %v7306_v12 = vld [vmem:[#allocation8_spill] sm:$0xff]  ;;  %v7307_v0 = vld [vmem:[#allocation118_spill] sm:$0xff] }
 0x4fa   :  { %v3641_v17 = vadd.f32 %v3640_v13, %v3639_v63  ;;  %v3658_v56 = vadd.f32 %v3657_v46, %v3656_v42  ;;  %v6444_v6 = vmul.f32 %v7303_v2, %v7302_v25  ;;  %v6448_v53 = vmul.f32 %v7305_v47, %v7304_v50  ;;  %v7310_v46 = vld [vmem:[#allocation9_spill] sm:$0xff]  ;;  %v2679_v13 = vpop.permute.xlu0 %2678  ;;  %v7312_v42 = vld [vmem:[#allocation18_spill] sm:$0xff]  ;;  %v7316_v36 = vld [vmem:[#allocation20_spill] sm:$0xff] }
 0x4fb   :  { %7299 = vst [vmem:[#allocation27_spill] sm:$0xff] %v6433_v60  ;;  %v3678_v54 = vsel %vm3035_vm12, %v6433_v60, %v3677_v22  ;;  %v6452_v19 = vmul.f32 %v7307_v0, %v7306_v12  ;;  %v6456_v14 = vmul.f32 %v7309_v49, %v7308_v29  ;;  %v6460_v37 = vmul.f32 %v7311_v23, %v7310_v46  ;;  %v7313_v22 = vld [vmem:[#allocation114_spill] sm:$0xff]  ;;  %v7317_v30 = vld [vmem:[#allocation124_spill] sm:$0xff]  ;;  %v7319_v25 = vld [vmem:[#allocation119_spill] sm:$0xff] }
 0x4fc   :  { %v3642_v63 = vrot.slane %v3641_v17, 2  ;;  %v3660_v4 = vadd.f32 %v3659_v38, %v3658_v56  ;;  %v6464_v5 = vmul.f32 %v7313_v22, %v7312_v42  ;;  %v6468_v58 = vmul.f32 %v7315_v11, %v7314_v35  ;;  %v7318_v56 = vld [vmem:[#allocation15_spill] sm:$0xff]  ;;  %v7321_v0 = vld [vmem:[#allocation22_spill] sm:$0xff]  ;;  %v7322_v29 = vld [vmem:[#allocation128_spill] sm:$0xff] }
 0x4fd   :  { %v6472_v38 = vmul.f32 %v7317_v30, %v7316_v36  ;;  %v6476_v2 = vmul.f32 %v7319_v25, %v7318_v56  ;;  %v6478_v50 = vadd.f32 %v3623_v34, %v3622_v33  ;;  %v6482_v49 = vmul.f32 %v7322_v29, %v7321_v0  ;;  %v7323_v46 = vld [vmem:[#allocation17_spill] sm:$0xff]  ;;  %v7324_v23 = vld [vmem:[#allocation132_spill] sm:$0xff]  ;;  %v7327_v36 = vld [vmem:[#allocation19_spill] sm:$0xff] }
 0x4fe   :  { %v3643_v47 = vadd.f32 %v3642_v63, %v3641_v17  ;;  %v3661_v12 = vrot.slane %v3660_v4, 4  ;;  %v6486_v42 = vmul.f32 %v7324_v23, %v7323_v46  ;;  %v7325_v22 = vld [vmem:[#allocation24_spill] sm:$0xff]  ;;  %v7326_v35 = vld [vmem:[#allocation101_spill] sm:$0xff]  ;;  %v7328_v30 = vld [vmem:[#allocation94_spill] sm:$0xff] }
 0x4ff   :  { %7320 = vst [vmem:[#allocation33_spill] sm:$0xff] %v6478_v50  ;;  %v6490_v11 = vmul.f32 %v7326_v35, %v7325_v22  ;;  %v6494_v56 = vmul.f32 %v7328_v30, %v7327_v36  ;;  %v7329_v33 = vld [vmem:[#allocation26_spill] sm:$0xff]  ;;  %v7330_v34 = vld [vmem:[#allocation115_spill] sm:$0xff]  ;;  %v3679_v25 = vsel %vm3037_vm13, %v6478_v50, %v3678_v54  ;;  %v7331_v0 = vld [vmem:[#allocation21_spill] sm:$0xff] }
 0x500   :  { %v6498_v17 = vmul.f32 %v7330_v34, %v7329_v33  ;;  %v3662_v63 = vadd.f32 %v3661_v12, %v3660_v4  ;;  %v7332_v29 = vld [vmem:[#allocation109_spill] sm:$0xff]  ;;  %v7333_v23 = vld [vmem:[#allocation28_spill] sm:$0xff]  ;;  %v3644_v35 = vrot.slane %v3643_v47, 1  ;;  %v7335_v60 = vld [vmem:[#allocation55_spill] sm:$0xff]  ;;  %v2683_v12 = vpop.permute.xlu1 %2682 }
 0x501   :  { %v6504_v46 = vmul.f32 %v7332_v29, %v7331_v0  ;;  %v6508_v22 = vmul.f32 %v7334_v7, %v7333_v23  ;;  %v7336_v36 = vld [vmem:[#allocation122_spill] sm:$0xff]  ;;  %v7337_v33 = vld [vmem:[#allocation133_spill] sm:$0xff]  ;;  %v7339_v29 = vld [vmem:[#allocation96_spill] sm:$0xff] }
 0x502   :  { %v6512_v30 = vmul.f32 %v7336_v36, %v7335_v60  ;;  %v6516_v34 = vmul.f32 %v7337_v33, %v6317_v27  ;;  %v7338_v4 = vld [vmem:[#allocation134_spill] sm:$0xff]  ;;  %v3663_v0 = vrot.slane %v3662_v63, 2  ;;  %v7341_v7 = vld [vmem:[#allocation91_spill] sm:$0xff]  ;;  %v7343_v60 = vld [vmem:[#allocation112_spill] sm:$0xff]  ;;  %v2648_v27 = vpop.permute.xlu0 %2647 }
 0x503   :  { %v6520_v54 = vmul.f32 %v7338_v4, %v6382_v16  ;;  %v7340_v50 = vld [vmem:[#allocation102_spill] sm:$0xff]  ;;  %v7342_v23 = vld [vmem:[#allocation95_spill] sm:$0xff]  ;;  %v7344_v36 = vld [vmem:[#allocation116_spill] sm:$0xff] }
 0x504   :  { %v6524_v55 = vmul.f32 %v7340_v50, %v7339_v29  ;;  %v6528_v28 = vmul.f32 %v7342_v23, %v7341_v7  ;;  %v6532_v32 = vmul.f32 %v7344_v36, %v7343_v60  ;;  %v7345_v33 = vld [vmem:[#allocation144_spill] sm:$0xff]  ;;  %v7347_v16 = vld [vmem:[#allocation63_spill] sm:$0xff]  ;;  %v7348_v4 = vld [vmem:[#allocation126_spill] sm:$0xff]  ;;  %v3664_v1 = vadd.f32 %v3663_v0, %v3662_v63 }
 0x505   :  { %v6536_v41 = vmul.f32 %v7346_v48, %v7345_v33  ;;  %v6540_v18 = vmul.f32 %v7348_v4, %v7347_v16  ;;  %v7349_v50 = vld [vmem:[#allocation135_spill] sm:$0xff]  ;;  %v7350_v7 = vld [vmem:[#allocation136_spill] sm:$0xff]  ;;  %v7351_v60 = vld [vmem:[#allocation137_spill] sm:$0xff]  ;;  %v6555_v48 = vmul.f32 %v7353_v57, %v7352_v39  ;;  %v6561_v4 = vadd.f32 %v3644_v35, %v3643_v47 }
 0x506   :  { %v6544_v29 = vmul.f32 %v7349_v50, %v6325_v26  ;;  %v6548_v23 = vmul.f32 %v7350_v7, %v6386_v24  ;;  %v6551_v36 = vmul.f32 %v7351_v60, %v2648_v27  ;;  %v7354_v33 = vld [vmem:[#allocation81_spill] sm:$0xff]  ;;  %v7357_v26 = vld [vmem:[#allocation111_spill] sm:$0xff]  ;;  %v7359_v24 = vld [vmem:[#allocation32_spill] sm:$0xff]  ;;  %v3665_v57 = vrot.slane %v3664_v1, 1 }
 0x507   :  { %v6559_v16 = vmul.f32 %v7355_v10, %v7354_v33  ;;  %7356 = vst [vmem:[#allocation38_spill] sm:$0xff] %v6561_v4  ;;  %v7358_v50 = vld [vmem:[#allocation117_spill] sm:$0xff]  ;;  %v7360_v7 = vld [vmem:[#allocation138_spill] sm:$0xff]  ;;  %v7361_v0 = vld [vmem:[#allocation140_spill] sm:$0xff] }
 0x508   :  { %v6565_v20 = vmul.f32 %v7358_v50, %v7357_v26  ;;  %v6569_v63 = vmul.f32 %v7360_v7, %v7359_v24  ;;  %v6573_v27 = vmul.f32 %v7361_v0, %v6299_v62  ;;  %v7362_v39 = vld [vmem:[#allocation141_spill] sm:$0xff]  ;;  %v7363_v10 = vld [vmem:[#allocation142_spill] sm:$0xff]  ;;  %v7365_v35 = vld [vmem:[#allocation143_spill] sm:$0xff]  ;;  %v3680_v26 = vsel %vm3039_vm14, %v6561_v4, %v3679_v25 }
 0x509   :  { %v6577_v60 = vmul.f32 %v7362_v39, %v6363_v51  ;;  %v6580_v47 = vmul.f32 %v7363_v10, %v2679_v13  ;;  %v6583_v33 = vmul.f32 %v7365_v35, %v2683_v12  ;;  %v7367_v50 = vld [vmem:[#allocation105_spill] sm:$0xff]  ;;  %v7368_v24 = vld [vmem:[#allocation104_spill] sm:$0xff]  ;;  %v7370_v0 = vld [vmem:[#allocation98_spill] sm:$0xff]  ;;  %v2718_v13 = vpop.permute.xlu1 %2717  ;;  %v6599_v10 = vadd.f32 %v3665_v57, %v3664_v1 }
 0x50a   :  { %v6589_v7 = vmul.f32 %v7368_v24, %v7367_v50  ;;  %v7369_v62 = vld [vmem:[#allocation121_spill] sm:$0xff]  ;;  %v7373_v12 = vld [vmem:[#allocation30_spill] sm:$0xff]  ;;  %v7376_v25 = vld [vmem:[#allocation147_spill] sm:$0xff] }
 0x50b   :  { %7364 = vst [vmem:[#allocation46_spill] sm:$0xff] %v6580_v47  ;;  %7366 = vst [vmem:[#allocation56_spill] sm:$0xff] %v6583_v33  ;;  %v6593_v59 = vmul.f32 %v7370_v0, %v7369_v62  ;;  %v7372_v51 = vld [vmem:[#allocation145_spill] sm:$0xff]  ;;  %v7374_v35 = vld [vmem:[#allocation146_spill] sm:$0xff]  ;;  %v6607_v4 = vmul.f32 %v7376_v25, %v6291_v44  ;;  %v3681_v44 = vsel %vm3041_vm15, %v6599_v10, %v3680_v26 }
 0x50c   :  { %v6597_v39 = vmul.f32 %v7372_v51, %v7371_v45  ;;  %v6603_v33 = vmul.f32 %v7374_v35, %v7373_v12  ;;  %v7377_v50 = vld [vmem:[#allocation148_spill] sm:$0xff]  ;;  %v7378_v62 = vld [vmem:[#allocation149_spill] sm:$0xff]  ;;  %v7379_v45 = vld [vmem:[#allocation150_spill] sm:$0xff]  ;;  %v3683_v25 = vsel %vm539_vm3, %v3681_v44, 0.0  ;;  %v2874_v44 = vsel %vm539_vm3, %v6431_v8, 0.0 }
 0x50d   :  { %v6611_v24 = vmul.f32 %v7377_v50, %v6357_v43  ;;  %v6614_v0 = vmul.f32 %v7378_v62, %v2714_v15  ;;  %v6617_v51 = vmul.f32 %v7379_v45, %v2718_v13  ;;  %v7380_v1 = vld [vmem:[#allocation130_spill] sm:$0xff]  ;;  %v7381_v57 = vld [vmem:[#allocation151_spill] sm:$0xff]  ;;  %v7382_v12 = vld [vmem:[#allocation120_spill] sm:$0xff]  ;;  %v2853_v43 = vsel %vm539_vm3, %v6427_v31, 0.0  ;;  %3684 = vadd.xlane.f32.xlu1 %v3683_v25 }
 0x50e   :  { %7375 = vst [vmem:[#allocation64_spill] sm:$0xff] %v6603_v33  ;;  %v6621_v47 = vmul.f32 %v7381_v57, %v7380_v1  ;;  %v7383_v35 = vld [vmem:[#allocation152_spill] sm:$0xff]  ;;  %v2854_v15 = vsel %vm539_vm3, %v6415_v61, 0.0  ;;  %v2856_v13 = vsel %vm539_vm3, %v6438_v40, 0.0  ;;  %v7384_v50 = vld [vmem:[#allocation165_spill] sm:$0xff]  ;;  %v7386_v1 = vld [vmem:[#allocation154_spill] sm:$0xff] }
 0x50f   :  { %v6625_v33 = vmul.f32 %v7383_v35, %v7382_v12  ;;  %v7385_v62 = vld [vmem:[#allocation153_spill] sm:$0xff]  ;;  %v6642_v57 = vmul.f32 %v7386_v1, %v6255_v9  ;;  %v2855_v26 = vadd.f32 %v2854_v15, %v2853_v43  ;;  %v7387_v31 = vld [vmem:[#allocation155_spill] sm:$0xff]  ;;  %v7388_v61 = vld [vmem:[#allocation156_spill] sm:$0xff]  ;;  %v2858_v40 = vsel %vm539_vm3, %v6444_v6, 0.0 }
 0x510   :  { %v6638_v45 = vmul.f32 %v7385_v62, %v7384_v50  ;;  %v6646_v12 = vmul.f32 %v7387_v31, %v6337_v52  ;;  %v6650_v35 = vmul.f32 %v7388_v61, %v6407_v3  ;;  %v2860_v9 = vsel %vm539_vm3, %v6448_v53, 0.0 }
 0x511   :  { %v2857_v50 = vadd.f32 %v2856_v13, %v2855_v26  ;;  %v2875_v43 = vsel %vm539_vm3, %v6421_v21, 0.0  ;;  %v2877_v52 = vsel %vm539_vm3, %v6464_v5, 0.0  ;;  %v2862_v3 = vsel %vm539_vm3, %v6452_v19, 0.0 }
 0x512   :  { %v2864_v15 = vsel %vm539_vm3, %v6456_v14, 0.0  ;;  %v2866_v6 = vsel %vm539_vm3, %v6460_v37, 0.0  ;;  %v2876_v8 = vadd.f32 %v2875_v43, %v2874_v44  ;;  %v2879_v53 = vsel %vm539_vm3, %v6468_v58, 0.0 }
 0x513   :  { %v2859_v13 = vadd.f32 %v2858_v40, %v2857_v50  ;;  %v2895_v21 = vsel %vm539_vm3, %v6490_v11, 0.0  ;;  %v2896_v5 = vsel %vm539_vm3, %v6494_v56, 0.0  ;;  %v2881_v19 = vsel %vm539_vm3, %v6472_v38, 0.0 }
 0x514   :  { %v2878_v25 = vadd.f32 %v2877_v52, %v2876_v8  ;;  %v2897_v62 = vadd.f32 %v2896_v5, %v2895_v21  ;;  %v2898_v14 = vsel %vm539_vm3, %v6498_v17, 0.0  ;;  %v2883_v1 = vsel %vm539_vm3, %v6476_v2, 0.0 }
 0x515   :  { %v2861_v37 = vadd.f32 %v2860_v9, %v2859_v13  ;;  %v2885_v58 = vsel %vm539_vm3, %v6482_v49, 0.0  ;;  %v2887_v11 = vsel %vm539_vm3, %v6486_v42, 0.0  ;;  %v2900_v31 = vsel %vm539_vm3, %v6504_v46, 0.0 }
 0x516   :  { %v2880_v26 = vadd.f32 %v2879_v53, %v2878_v25  ;;  %v2899_v56 = vadd.f32 %v2898_v14, %v2897_v62  ;;  %v2916_v38 = vsel %vm539_vm3, %v6524_v55, 0.0  ;;  %v2902_v17 = vsel %vm539_vm3, %v6508_v22, 0.0 }
 0x517   :  { %v2863_v61 = vadd.f32 %v2862_v3, %v2861_v37  ;;  %v2917_v2 = vsel %vm539_vm3, %v6528_v28, 0.0  ;;  %v2919_v49 = vsel %vm539_vm3, %v6532_v32, 0.0  ;;  %v2904_v44 = vsel %vm539_vm3, %v6512_v30, 0.0  ;;  %v6702_v28 = vpop.permute.xlu0 %2779 }
 0x518   :  { %v2882_v40 = vadd.f32 %v2881_v19, %v2880_v26  ;;  %v2901_v42 = vadd.f32 %v2900_v31, %v2899_v56  ;;  %v2918_v50 = vadd.f32 %v2917_v2, %v2916_v38  ;;  %v2906_v55 = vsel %vm539_vm3, %v6516_v34, 0.0 }
 0x519   :  { %v2865_v46 = vadd.f32 %v2864_v15, %v2863_v61  ;;  %v2908_v9 = vsel %vm539_vm3, %v6520_v54, 0.0  ;;  %v2921_v22 = vsel %vm539_vm3, %v6536_v41, 0.0  ;;  %v2937_v3 = vsel %vm539_vm3, %v6555_v48, 0.0 }
 0x51a   :  { %v2884_v43 = vadd.f32 %v2883_v1, %v2882_v40  ;;  %v2903_v32 = vadd.f32 %v2902_v17, %v2901_v42  ;;  %v2920_v52 = vadd.f32 %v2919_v49, %v2918_v50  ;;  %v2923_v15 = vsel %vm539_vm3, %v6540_v18, 0.0  ;;  %v7390_v49 = vld [vmem:[#allocation46_spill] sm:$0xff] }
 0x51b   :  { %v2867_v30 = vadd.f32 %v2866_v6, %v2865_v46  ;;  %v2938_v34 = vsel %vm539_vm3, %v6559_v16, 0.0  ;;  %v2940_v54 = vsel %vm539_vm3, %v6565_v20, 0.0  ;;  %v2925_v5 = vsel %vm539_vm3, %v6544_v29, 0.0  ;;  %v2749_v37 = vpop.permute.xlu0 %2748 }
 0x51c   :  { %v2886_v8 = vadd.f32 %v2885_v58, %v2884_v43  ;;  %v2905_v41 = vadd.f32 %v2904_v44, %v2903_v32  ;;  %v2922_v13 = vadd.f32 %v2921_v22, %v2920_v52  ;;  %v2939_v53 = vadd.f32 %v2938_v34, %v2937_v3  ;;  %v2753_v44 = vpop.permute.xlu1 %2752  ;;  %v7393_v43 = vld [vmem:[#allocation168_spill] sm:$0xff]  ;;  %v7394_v32 = vld [vmem:[#allocation159_spill] sm:$0xff] }
 0x51d   :  { %v2868_v21 = vrot.slane %v2867_v30, 4  ;;  %v2927_v48 = vsel %vm539_vm3, %v6548_v23, 0.0  ;;  %v2942_v18 = vsel %vm539_vm3, %v6569_v63, 0.0  ;;  %v2944_v20 = vsel %vm539_vm3, %v6573_v27, 0.0  ;;  %v7389_v63 = vld [vmem:[#allocation157_spill] sm:$0xff] }
 0x51e   :  { %v2888_v6 = vadd.f32 %v2887_v11, %v2886_v8  ;;  %v2907_v25 = vadd.f32 %v2906_v55, %v2905_v41  ;;  %v2924_v16 = vadd.f32 %v2923_v15, %v2922_v13  ;;  %v2941_v19 = vadd.f32 %v2940_v54, %v2939_v53  ;;  %v7396_v15 = vld [vmem:[#allocation160_spill] sm:$0xff] }
 0x51f   :  { %v2869_v62 = vadd.f32 %v2868_v21, %v2867_v30  ;;  %v2958_v14 = vsel %vm539_vm3, %v6589_v7, 0.0  ;;  %v2959_v29 = vsel %vm539_vm3, %v6593_v59, 0.0  ;;  %v6725_v11 = vmul.f32 %v7389_v63, %v2749_v37  ;;  %v7395_v30 = vld [vmem:[#allocation139_spill] sm:$0xff]  ;;  %v7397_v41 = vld [vmem:[#allocation56_spill] sm:$0xff] }
 0x520   :  { %v2889_v1 = vrot.slane %v2888_v6, 4  ;;  %v2909_v23 = vadd.f32 %v2908_v9, %v2907_v25  ;;  %v2926_v58 = vadd.f32 %v2925_v5, %v2924_v16  ;;  %v2943_v26 = vadd.f32 %v2942_v18, %v2941_v19  ;;  %v7392_v9 = vld [vmem:[#allocation158_spill] sm:$0xff]  ;;  %v7403_v63 = vld [vmem:[#allocation163_spill] sm:$0xff] }
 0x521   :  { %v2929_v56 = vsel %vm539_vm3, %v6551_v36, 0.0  ;;  %v2960_v31 = vadd.f32 %v2959_v29, %v2958_v14  ;;  %v2961_v27 = vsel %vm539_vm3, %v6597_v39, 0.0  ;;  %v2870_v59 = vrot.slane %v2869_v62, 2  ;;  %v7391_v36 = vld [vmem:[#allocation64_spill] sm:$0xff]  ;;  %v7398_v14 = vld [vmem:[#allocation71_spill] sm:$0xff]  ;;  %v7399_v29 = vld [vmem:[#allocation161_spill] sm:$0xff] }
 0x522   :  { %v2890_v38 = vadd.f32 %v2889_v1, %v2888_v6  ;;  %v2910_v7 = vrot.slane %v2909_v23, 4  ;;  %v2928_v61 = vadd.f32 %v2927_v48, %v2926_v58  ;;  %v2945_v17 = vadd.f32 %v2944_v20, %v2943_v26  ;;  %v7401_v1 = vld [vmem:[#allocation162_spill] sm:$0xff]  ;;  %v7402_v26 = vld [vmem:[#allocation76_spill] sm:$0xff] }
 0x523   :  { %v2946_v2 = vsel %vm539_vm3, %v6577_v60, 0.0  ;;  %v2948_v40 = vsel %vm539_vm3, %v7390_v49, 0.0  ;;  %v2962_v42 = vadd.f32 %v2961_v27, %v2960_v31  ;;  %v2963_v55 = vsel %vm539_vm3, %v7391_v36, 0.0  ;;  %v2784_v49 = vpop.permute.xlu0 %2783 }
 0x524   :  { %v2930_v50 = vadd.f32 %v2929_v56, %v2928_v61  ;;  %v2947_v46 = vadd.f32 %v2946_v2, %v2945_v17  ;;  %v2965_v39 = vsel %vm539_vm3, %v6607_v4, 0.0  ;;  %v2844_v22 = vmul.f32 %v7392_v9, %v2753_v44 }
 0x525   :  { %v2845_v52 = vmul.f32 %v7394_v32, %v7393_v43  ;;  %v2891_v3 = vrot.slane %v2890_v38, 2  ;;  %v2964_v60 = vadd.f32 %v2963_v55, %v2962_v42  ;;  %v2846_v34 = vmul.f32 %v7396_v15, %v7395_v30 }
 0x526   :  { %v2911_v54 = vadd.f32 %v2910_v7, %v2909_v23  ;;  %v2949_v8 = vadd.f32 %v2948_v40, %v2947_v46  ;;  %v2950_v13 = vsel %vm539_vm3, %v7397_v41, 0.0  ;;  %v2871_v53 = vadd.f32 %v2870_v59, %v2869_v62 }
 0x527   :  { %v2931_v21 = vrot.slane %v2930_v50, 4  ;;  %v2966_v5 = vadd.f32 %v2965_v39, %v2964_v60  ;;  %v2979_v4 = vsel %vm539_vm3, %v6621_v47, 0.0  ;;  %v2967_v18 = vsel %vm539_vm3, %v6611_v24, 0.0  ;;  %v7400_v47 = vld [vmem:[#allocation34_spill] sm:$0xff] }
 0x528   :  { %v2951_v48 = vadd.f32 %v2950_v13, %v2949_v8  ;;  %v2969_v6 = vsel %vm539_vm3, %v6614_v0, 0.0  ;;  %v2980_v25 = vsel %vm539_vm3, %v6625_v33, 0.0  ;;  %v2892_v16 = vadd.f32 %v2891_v3, %v2890_v38 }
 0x529   :  { %v2968_v19 = vadd.f32 %v2967_v18, %v2966_v5  ;;  %v2981_v20 = vadd.f32 %v2980_v25, %v2979_v4  ;;  %v2982_v62 = vsel %vm539_vm3, %v6638_v45, 0.0  ;;  %v2847_v37 = vmul.f32 %v7399_v29, %v7398_v14 }
 0x52a   :  { %v2848_v23 = vmul.f32 %v7401_v1, %v7400_v47  ;;  %v2912_v58 = vrot.slane %v2911_v54, 2  ;;  %v2952_v24 = vrot.slane %v2951_v48, 4  ;;  %v2849_v0 = vmul.f32 %v7403_v63, %v7402_v26 }
 0x52b   :  { %v2932_v56 = vadd.f32 %v2931_v21, %v2930_v50  ;;  %v2970_v31 = vadd.f32 %v2969_v6, %v2968_v19  ;;  %v2983_v33 = vadd.f32 %v2982_v62, %v2981_v20  ;;  %v2872_v27 = vrot.slane %v2871_v53, 1 }
 0x52c   :  { %v2971_v38 = vsel %vm539_vm3, %v6617_v51, 0.0  ;;  %v2984_v45 = vsel %vm539_vm3, %v6642_v57, 0.0  ;;  %v2986_v7 = vsel %vm539_vm3, %v6646_v12, 0.0  ;;  %v2893_v61 = vrot.slane %v2892_v16, 1  ;;  %v7404_v57 = vld [vmem:[#allocation164_spill] sm:$0xff]  ;;  %v7405_v12 = vld [vmem:[#allocation166_spill] sm:$0xff] }
 0x52d   :  { %v2972_v17 = vadd.f32 %v2971_v38, %v2970_v31  ;;  %v2985_v59 = vadd.f32 %v2984_v45, %v2983_v33  ;;  %v3000_v2 = vsel %vm539_vm3, %v2845_v52, 0.0  ;;  %v2913_v40 = vadd.f32 %v2912_v58, %v2911_v54 }
 0x52e   :  { %v2953_v42 = vadd.f32 %v2952_v24, %v2951_v48  ;;  %v3001_v44 = vsel %vm539_vm3, %v2846_v34, 0.0  ;;  %v3003_v50 = vsel %vm539_vm3, %v2847_v37, 0.0  ;;  %v2933_v46 = vrot.slane %v2932_v56, 2 }
 0x52f   :  { %v2973_v51 = vrot.slane %v2972_v17, 4  ;;  %v2987_v36 = vadd.f32 %v2986_v7, %v2985_v59  ;;  %v3002_v55 = vadd.f32 %v3001_v44, %v3000_v2  ;;  %v2850_v39 = vmul.f32 %v7404_v57, %v6702_v28 }
 0x530   :  { %v2851_v9 = vmul.f32 %v7405_v12, %v2784_v49  ;;  %v2988_v43 = vsel %vm539_vm3, %v6650_v35, 0.0  ;;  %v2990_v32 = vsel %vm539_vm3, %v6725_v11, 0.0  ;;  %v6778_v52 = vadd.f32 %v2872_v27, %v2871_v53  ;;  %v2788_v35 = vpop.permute.xlu0 %2787  ;;  %v7406_v11 = vld [vmem:[#allocation167_spill] sm:$0xff] }
 0x531   :  { %v2974_v3 = vadd.f32 %v2973_v51, %v2972_v17  ;;  %v2989_v60 = vadd.f32 %v2988_v43, %v2987_v36  ;;  %v3004_v30 = vadd.f32 %v3003_v50, %v3002_v55  ;;  %v2914_v15 = vrot.slane %v2913_v40, 1 }
 0x532   :  { %v2954_v34 = vrot.slane %v2953_v42, 2  ;;  %v3005_v54 = vsel %vm539_vm3, %v2848_v23, 0.0  ;;  %v3007_v8 = vsel %vm539_vm3, %v2849_v0, 0.0  ;;  %v6782_v28 = vadd.f32 %v2893_v61, %v2892_v16 }
 0x533   :  { %v2934_v41 = vadd.f32 %v2933_v46, %v2932_v56  ;;  %v2991_v13 = vadd.f32 %v2990_v32, %v2989_v60  ;;  %v3006_v21 = vadd.f32 %v3005_v54, %v3004_v30  ;;  %v2992_v5 = vsel %vm539_vm3, %v2844_v22, 0.0  ;;  %v7408_v30 = vld [vmem:[#allocation60_spill] sm:$0xff] }
 0x534   :  { %v2852_v53 = vmul.f32 %v7406_v11, %v2788_v35  ;;  %v2975_v4 = vrot.slane %v2974_v3, 2  ;;  %v6786_v6 = vadd.f32 %v2914_v15, %v2913_v40  ;;  %v2955_v25 = vadd.f32 %v2954_v34, %v2953_v42  ;;  %v7409_v34 = vld [vmem:[#allocation68_spill] sm:$0xff]  ;;  %v7412_v35 = vld [vmem:[#allocation33_spill] sm:$0xff] }
 0x535   :  { %v2993_v48 = vadd.f32 %v2992_v5, %v2991_v13  ;;  %v3008_v18 = vadd.f32 %v3007_v8, %v3006_v21  ;;  %v3009_v19 = vsel %vm539_vm3, %v2850_v39, 0.0  ;;  %v3011_v20 = vsel %vm539_vm3, %v2851_v9, 0.0  ;;  %v7410_v8 = vld [vmem:[#allocation27_spill] sm:$0xff]  ;;  %v7411_v13 = vld [vmem:[#allocation42_spill] sm:$0xff] }
 0x536   :  { %v2935_v16 = vrot.slane %v2934_v41, 1  ;;  %v3030_v29 = vsel %vm3029_vm9, %v6782_v28, %v6778_v52  ;;  %v2976_v22 = vadd.f32 %v2975_v4, %v2974_v3  ;;  %v2956_v1 = vrot.slane %v2955_v25, 1  ;;  %v7407_v3 = vld [vmem:[#allocation47_spill] sm:$0xff]  ;;  %v7413_v4 = vld [vmem:[#allocation38_spill] sm:$0xff] }
 0x537   :  { %v2994_v62 = vrot.slane %v2993_v48, 4  ;;  %v3010_v14 = vadd.f32 %v3009_v19, %v3008_v18  ;;  %v3013_v23 = vsel %vm539_vm3, %v2852_v53, 0.0  ;;  %v3032_v58 = vsel %vm3031_vm10, %v6786_v6, %v3030_v29 }
 0x538   :  { %v6796_v24 = vadd.f32 %v2935_v16, %v2934_v41  ;;  %v2977_v0 = vrot.slane %v2976_v22, 1  ;;  %v2957_v27 = vadd.f32 %v2956_v1, %v2955_v25 }
 0x539   :  { %v2995_v37 = vadd.f32 %v2994_v62, %v2993_v48  ;;  %v3012_v47 = vadd.f32 %v3011_v20, %v3010_v14 }
 0x53a   :  { %v3034_v33 = vsel %vm3033_vm11, %v6796_v24, %v3032_v58  ;;  %v2978_v61 = vadd.f32 %v2977_v0, %v2976_v22 }
 0x53b   :  { %v2996_v26 = vrot.slane %v2995_v37, 2  ;;  %v3014_v63 = vadd.f32 %v3013_v23, %v3012_v47  ;;  %v3036_v7 = vsel %vm3035_vm12, %v2957_v27, %v3034_v33 }
 0x53c   :  { %v3038_v2 = vsel %vm3037_vm13, %v2978_v61, %v3036_v7 }
 0x53d   :  { %v2997_v56 = vadd.f32 %v2996_v26, %v2995_v37  ;;  %v3015_v31 = vrot.slane %v3014_v63, 4 }
 0x53f   :  { %v3016_v38 = vadd.f32 %v3015_v31, %v3014_v63  ;;  %v2998_v45 = vrot.slane %v2997_v56, 1 }
 0x541   :  { %v3017_v17 = vrot.slane %v3016_v38, 2  ;;  %v2999_v49 = vadd.f32 %v2998_v45, %v2997_v56 }
 0x543   :  { %v3018_v59 = vadd.f32 %v3017_v17, %v3016_v38  ;;  %v3040_v42 = vsel %vm3039_vm14, %v2999_v49, %v3038_v2  ;;  %v4275_v2 = vmov 1983009808  }
 0x545   :  { %v3019_v40 = vrot.slane %v3018_v59, 1 }
 0x547   :  { %v3020_v44 = vadd.f32 %v3019_v40, %v3018_v59  ;;  %v3100_v40 = vunpack.c.l.s4 %v4275_v2 }
 0x549   :  { %v3042_v50 = vsel %vm3041_vm15, %v3020_v44, %v3040_v42 }
 0x54a   :  { %v3044_v46 = vsel %vm539_vm3, %v3042_v50, 0.0 }
 0x54b   :  { %3045 = vadd.xlane.f32.xlu0 %v3044_v46 }
 0x596   :  { %v3685_v51 = vpop.xlane.xlu1 %3684 }
 0x597   :  { %v3686_v36 = vmul.f32 0.015625, %v3685_v51 }
 0x599   :  { %v3688_v55 = vrot.slane %v3686_v36, 1  ;;  %v3689_v57 = vrot.slane %v3686_v36, 2  ;;  %v3690_v39 = vrot.slane %v3686_v36, 3  ;;  %v3691_v12 = vrot.slane %v3686_v36, 4 }
 0x59a   :  { %v3692_v9 = vrot.slane %v3686_v36, 5  ;;  %v3693_v43 = vrot.slane %v3686_v36, 6  ;;  %v3694_v32 = vrot.slane %v3686_v36, 7  ;;  %v3703_v21 = vsub.f32 %v7411_v13, %v3686_v36 }
 0x59b   :  { %v3704_v60 = vsub.f32 %v7407_v3, %v3688_v55  ;;  %v3705_v15 = vsub.f32 %v7408_v30, %v3689_v57  ;;  %v3706_v54 = vsub.f32 %v7409_v34, %v3690_v39  ;;  %v3707_v41 = vsub.f32 %v7410_v8, %v3691_v12 }
 0x59c   :  { %v3708_v5 = vsub.f32 %v7412_v35, %v3692_v9  ;;  %v3709_v48 = vsub.f32 %v7413_v4, %v3693_v43  ;;  %v3710_v18 = vsub.f32 %v6599_v10, %v3694_v32  ;;  %v3101_v9 = vunpack.c.0.s8 %v3100_v40 }
 0x59d   :  { %v3719_v11 = vrot.slane %v3704_v60, 7  ;;  %v3721_v53 = vrot.slane %v3705_v15, 6  ;;  %v3723_v19 = vrot.slane %v3706_v54, 5  ;;  %v3725_v16 = vrot.slane %v3707_v41, 4  ;;  %v7415_v60 = vld [vmem:[#allocation3_spill] sm:$0xff] }
 0x59e   :  { %v3727_v14 = vrot.slane %v3708_v5, 3  ;;  %v3729_v22 = vrot.slane %v3709_v48, 2  ;;  %v3731_v47 = vrot.slane %v3710_v18, 1  ;;  %v7416_v5 = vld [vmem:[#allocation2_spill] sm:$0xff] }
 0x59f   :  { %v3720_v25 = vsel %vm3029_vm9, %v3719_v11, %v3703_v21 }
 0x5a0   :  { %v3722_v20 = vsel %vm3031_vm10, %v3721_v53, %v3720_v25 }
 0x5a1   :  { %v3724_v62 = vsel %vm3033_vm11, %v3723_v19, %v3722_v20 }
 0x5a2   :  { %v3726_v29 = vsel %vm3035_vm12, %v3725_v16, %v3724_v62 }
 0x5a3   :  { %v3728_v37 = vsel %vm3037_vm13, %v3727_v14, %v3726_v29 }
 0x5a4   :  { %v3730_v1 = vsel %vm3039_vm14, %v3729_v22, %v3728_v37 }
 0x5a5   :  { %v3732_v23 = vsel %vm3041_vm15, %v3731_v47, %v3730_v1 }
 0x5a6   :  { %3733 = vrot.lane.b32.xlu0 %v3732_v23, %s4274_s1 }
 0x5d4   :  { %v3046_v10 = vpop.xlane.xlu0 %3045 }
 0x5d5   :  { %v3047_v58 = vmul.f32 0.015625, %v3046_v10 }
 0x5d7   :  { %v3049_v26 = vrot.slane %v3047_v58, 1  ;;  %v3050_v63 = vrot.slane %v3047_v58, 2  ;;  %v3051_v0 = vrot.slane %v3047_v58, 3  ;;  %v3052_v56 = vrot.slane %v3047_v58, 4 }
 0x5d8   :  { %v3053_v31 = vrot.slane %v3047_v58, 5  ;;  %v3054_v33 = vrot.slane %v3047_v58, 6  ;;  %v3055_v38 = vrot.slane %v3047_v58, 7  ;;  %v3064_v42 = vsub.f32 %v6778_v52, %v3047_v58 }
 0x5d9   :  { %v3065_v45 = vsub.f32 %v6782_v28, %v3049_v26  ;;  %v3066_v7 = vsub.f32 %v6786_v6, %v3050_v63  ;;  %v3067_v17 = vsub.f32 %v6796_v24, %v3051_v0  ;;  %v3068_v59 = vsub.f32 %v2957_v27, %v3052_v56 }
 0x5da   :  { %v3069_v50 = vsub.f32 %v2978_v61, %v3053_v31  ;;  %v3070_v36 = vsub.f32 %v2999_v49, %v3054_v33  ;;  %v3071_v55 = vsub.f32 %v3020_v44, %v3055_v38  ;;  %v7414_v49 = vld [vmem:[#allocation4_spill] sm:$0xff] }
 0x5db   :  { %v3080_v46 = vrot.slane %v3065_v45, 7  ;;  %v3082_v51 = vrot.slane %v3066_v7, 6  ;;  %v3084_v39 = vrot.slane %v3067_v17, 5  ;;  %v3086_v28 = vrot.slane %v3068_v59, 4 }
 0x5dc   :  { %v3088_v24 = vrot.slane %v3069_v50, 3  ;;  %v3090_v43 = vrot.slane %v3070_v36, 2  ;;  %v3092_v61 = vrot.slane %v3071_v55, 1  ;;  %v3104_v44 = vsub.s32 %v3101_v9, %v7414_v49 }
 0x5dd   :  { %v3081_v57 = vsel %vm3029_vm9, %v3080_v46, %v3064_v42 }
 0x5de   :  { %v3083_v12 = vsel %vm3031_vm10, %v3082_v51, %v3081_v57 }
 0x5df   :  { %v3085_v6 = vsel %vm3033_vm11, %v3084_v39, %v3083_v12 }
 0x5e0   :  { %v3087_v27 = vsel %vm3035_vm12, %v3086_v28, %v3085_v6 }
 0x5e1   :  { %v3089_v52 = vsel %vm3037_vm13, %v3088_v24, %v3087_v27 }
 0x5e2   :  { %v3091_v32 = vsel %vm3039_vm14, %v3090_v43, %v3089_v52 }
 0x5e3   :  { %v3093_v3 = vsel %vm3041_vm15, %v3092_v61, %v3091_v32 }
 0x5e4   :  { %v3095_v30 = vadd.f32 %v3093_v3, %v7415_v60 }
 0x5e6   :  { %v3105_v15 = vrot.slane %v3095_v30, %v3104_v44  ;;  %3097 = vst.msk [vmem:[%s6912_s4] sm:$0x1] %vm3096_vm0, %v3095_v30  ;;  %v3122_v34 = vcombine.high %v3095_v30, %v3095_v30 }
 0x5e8   :  { %v3859_v54 = vrot.slane %v3105_v15, 9  ;;  %v3113_v8 = vcombine.high %v3105_v15, %v3105_v15  ;;  %v3129_v41 = vrot.slane %v3122_v34, %v3104_v44 }
 0x5ea   :  { %3108 = vrot.lane.b32.xlu1 %v3859_v54, %s4274_s1  ;;  %3115 = vst.msk [vmem:[%s6912_s4 + $0x2] sm:$0x1] %vm3096_vm0, %v3113_v8  ;;  %3131 = vst.msk [vmem:[%s6912_s4 + $0x4] sm:$0x1] %vm3096_vm0, %v3129_v41  ;;  %v3138_v13 = vcombine.high %v3129_v41, %v3129_v41  ;;  %v3860_v21 = vrot.slane %v3113_v8, 9  ;;  %v3861_v19 = vrot.slane %v3129_v41, 9 }
 0x5ec   :  { %3140 = vst.msk [vmem:[%s6912_s4 + $0x6] sm:$0x1] %vm3096_vm0, %v3138_v13  ;;  %v3862_v20 = vrot.slane %v3138_v13, 9 }
 0x5ee   :  { %3118 = vrot.lane.b32.xlu1 %v3860_v21, %s4274_s1 }
 0x618   :  { %v3734_v35 = vpop.permute.xlu0 %3733 }
 0x619   :  { %v3736_v11 = vadd.f32 %v3734_v35, %v7416_v5 }
 0x61b   :  { %v3744_v53 = vrot.slane %v3736_v11, %v3104_v44  ;;  %v3762_v4 = vcombine.high %v3736_v11, %v3736_v11 }
 0x61d   :  { %v3753_v48 = vcombine.high %v3744_v53, %v3744_v53  ;;  %v3769_v18 = vrot.slane %v3762_v4, %v3104_v44  ;;  %3745 = vrot.lane.b32.xlu0 %v3744_v53, %s4274_s1  ;;  %v3863_v14 = vrot.slane %v3744_v53, 9 }
 0x61f   :  { %3754 = vrot.lane.b32.xlu1 %v3753_v48, %s4274_s1  ;;  %v3778_v25 = vcombine.high %v3769_v18, %v3769_v18  ;;  %v3864_v22 = vrot.slane %v3753_v48, 9  ;;  %v3865_v47 = vrot.slane %v3769_v18, 9 }
 0x621   :  { %3770 = vrot.lane.b32.xlu0 %v3769_v18, %s4274_s1  ;;  %v3866_v23 = vrot.slane %v3778_v25, 9 }
 0x623   :  { %3779 = vrot.lane.b32.xlu1 %v3778_v25, %s4274_s1 }
 0x625   :  { %3134 = vrot.lane.b32.xlu0 %v3861_v19, %s4274_s1 }
 0x627   :  { %3143 = vrot.lane.b32.xlu1 %v3862_v20, %s4274_s1 }
 0x65c   :  { %v3109_v16 = vpop.permute.xlu1 %3108 }
 0x65d   :  { %3112 = vst.msk [vmem:[%s6912_s4] sm:$0x1] %vm3111_vm1, %v3109_v16 }
 0x660   :  { %v3119_v62 = vpop.permute.xlu1 %3118 }
 0x661   :  { %3121 = vst.msk [vmem:[%s6912_s4 + $0x2] sm:$0x1] %vm3111_vm1, %v3119_v62 }
 0x68f   :  { %v3746_v29 = vpop.permute.xlu0 %3745 }
 0x690   :  { %3748 = vst.msk [vmem:[%s6912_s4 + $0x1] sm:$0x1] %vm3096_vm0, %v3746_v29 }
 0x691   :  { %3752 = vst.msk [vmem:[%s6912_s4 + $0x1] sm:$0x1] %vm3111_vm1, %v3863_v14  ;;  %v3755_v37 = vpop.permute.xlu1 %3754 }
 0x692   :  { %3757 = vst.msk [vmem:[%s6912_s4 + $0x3] sm:$0x1] %vm3096_vm0, %v3755_v37 }
 0x693   :  { %3761 = vst.msk [vmem:[%s6912_s4 + $0x3] sm:$0x1] %vm3111_vm1, %v3864_v22  ;;  %v3771_v1 = vpop.permute.xlu0 %3770 }
 0x694   :  { %3773 = vst.msk [vmem:[%s6912_s4 + $0x5] sm:$0x1] %vm3096_vm0, %v3771_v1 }
 0x695   :  { %3777 = vst.msk [vmem:[%s6912_s4 + $0x5] sm:$0x1] %vm3111_vm1, %v3865_v47  ;;  %v3780_v10 = vpop.permute.xlu1 %3779 }
 0x696   :  { %3782 = vst.msk [vmem:[%s6912_s4 + $0x7] sm:$0x1] %vm3096_vm0, %v3780_v10 }
 0x697   :  { %3786 = vst.msk [vmem:[%s6912_s4 + $0x7] sm:$0x1] %vm3111_vm1, %v3866_v23  ;;  %v3135_v58 = vpop.permute.xlu0 %3134 }
 0x698   :  { %3137 = vst.msk [vmem:[%s6912_s4 + $0x4] sm:$0x1] %vm3111_vm1, %v3135_v58 }
 0x699   :  { %v3144_v26 = vpop.permute.xlu1 %3143 }
 0x69a   :  { %3146 = vst.msk [vmem:[%s6912_s4 + $0x6] sm:$0x1] %vm3111_vm1, %v3144_v26 }

// kernel: multilayer_hebbian_forward.3
= control target key start
LH: loop header
LB: loop body
LE: loop exit
PB: predicated region body
PF: predicated region fallthrough
CT: control target
= control target key end

     0   :  { %v3631_v9 = vmov 0   ;;  %vm43_vm0 = vcmask 588800   ;;  %s5158_s0 = inlined_call_operand.vmem [shape: f32[72,32], index: 0, kind: input, shape index: {}]   ;;  %s5159_s1 = inlined_call_operand.vmem [shape: f32[16,72], index: 1, kind: input, shape index: {}]   ;;  %s5160_s2 = inlined_call_operand.vmem [shape: f32[16,1], index: 2, kind: input, shape index: {}]   ;;  %s5161_s3 = inlined_call_operand.vmem [shape: f32[16,16,16], index: 3, kind: input, shape index: {}, may-alias: {3,5}]   ;;  %s5162_s4 = inlined_call_operand.hbm [shape: f32[2,256], index: 4, kind: output, shape index: {0}]   ;;  %s5163_s5 = inlined_call_operand.vmem [shape: f32[16,16,16], index: 5, kind: output, shape index: {1}, may-alias: {3,5}]  }
   0x1   :  { %v30_v0 = vld [vmem:[%s5158_s0 + $0x40] sm:$0xff]  ;;  %v29_v1 = vld [vmem:[%s5158_s0 + $0x38] sm:$0xff]  ;;  %v28_v2 = vld [vmem:[%s5158_s0 + $0x30] sm:$0xff]  ;;  %3592 = vset.pattern.permute.xlu0 %v3631_v9 }
   0x2   :  { %v3680_v3 = vand.u32 4294901760, %v30_v0  ;;  %v3682_v4 = vand.u32 4294901760, %v29_v1  ;;  %v3684_v5 = vand.u32 4294901760, %v28_v2  ;;  %v27_v6 = vld [vmem:[%s5158_s0 + $0x28] sm:$0xff]  ;;  %v26_v7 = vld [vmem:[%s5158_s0 + $0x20] sm:$0xff]  ;;  %v25_v8 = vld [vmem:[%s5158_s0 + $0x18] sm:$0xff] }
   0x3   :  { %v3695_v10 = vand.u32 4294901760, %v27_v6  ;;  %v3697_v11 = vand.u32 4294901760, %v26_v7  ;;  %v24_v12 = vld [vmem:[%s5158_s0 + $0x10] sm:$0xff]  ;;  %v23_v13 = vld [vmem:[%s5158_s0 + $0x8] sm:$0xff]  ;;  %v3709_v15 = vand.u32 4294901760, %v25_v8  ;;  %v20_v18 = vld [vmem:[%s5159_s1] sm:$0xff] }
   0x4   :  { %3371 = vmatprep.subr.mxu0 %v3680_v3  ;;  %v3707_v14 = vsub.f32 %v30_v0, %v3680_v3  ;;  %v3712_v16 = vsub.f32 %v29_v1, %v3682_v4  ;;  %v3715_v17 = vsub.f32 %v28_v2, %v3684_v5  ;;  %v21_v19 = vld [vmem:[%s5159_s1 + $0x8] sm:$0xff]  ;;  %v31_v20 = vld [vmem:[%s5160_s2] sm:$0xff]  ;;  %v3727_v21 = vand.u32 4294901760, %v24_v12 }
   0x5   :  { %3372 = vmatpush3.msra.mxu0 %v3680_v3  ;;  %v3729_v22 = vand.u32 4294901760, %v23_v13  ;;  %v3732_v23 = vsub.f32 %v27_v6, %v3695_v10  ;;  %v3735_v24 = vsub.f32 %v26_v7, %v3697_v11  ;;  %35 = vperm.xlu0 %3592, %v31_v20  }
   0x6   :  { %11 = vsyncpa [#allocation3], 0  ;;  %3373 = vmatprep.subr.mxu0 %v3682_v4  ;;  %v3739_v25 = vand.u32 4294901760, %v3707_v14  ;;  %v3742_v26 = vand.u32 4294901760, %v3712_v16  ;;  %v3745_v27 = vand.u32 4294901760, %v3715_v17  ;;  %v22_v28 = vld [vmem:[%s5158_s0] sm:$0xff]  ;;  %v3780_v41 = vsub.f32 %v25_v8, %v3709_v15 }
   0x7   :  { %v45_v29 = vsel %vm43_vm0, %v20_v18, 0  ;;  %3374 = vmatpush3.msra.mxu0 %v3682_v4  ;;  %v3753_v30 = vand.u32 4294901760, %v3732_v23  ;;  %v3756_v31 = vand.u32 4294901760, %v3735_v24  ;;  %v48_v32 = vsel %vm43_vm0, %v21_v19, 0  ;;  %v32_v38 = vld [vmem:[%s5160_s2 + $0x8] sm:$0xff]  ;;  %s3632_s2 = smov 112  }
   0x8   :  { %v3759_v33 = vand.u32 4294901760, %v45_v29  ;;  %3375 = vmatprep.subr.mxu0 %v3684_v5  ;;  %v162_v34 = vsub.f32 %v3707_v14, %v3739_v25  ;;  %v169_v35 = vsub.f32 %v3712_v16, %v3742_v26  ;;  %v176_v36 = vsub.f32 %v3715_v17, %v3745_v27  ;;  %s3635_s10 = smov 32   ;;  %s3636_s11 = smov 64  }
   0x9   :  { %v3768_v37 = vand.u32 4294901760, %v48_v32  ;;  %3376 = vmatpush3.msra.mxu0 %v3684_v5  ;;  %v3774_v39 = vand.u32 4294901760, %v22_v28  ;;  %v183_v44 = vsub.f32 %v3732_v23, %v3753_v30  ;;  %v190_v46 = vsub.f32 %v3735_v24, %v3756_v31  ;;  %40 = vperm.xlu0 %3592, %v32_v38   ;;  %s3637_s12 = smov 96   ;;  %s3638_s13 = smov 48  }
   0xa   :  { %v3777_v40 = vsub.f32 %v45_v29, %v3759_v33  ;;  %3377 = vmatprep.subr.mxu0 %v3695_v10  ;;  %v163_v42 = vand.u32 4294901760, %v162_v34  ;;  %v170_v43 = vand.u32 4294901760, %v169_v35  ;;  %3410 = vmatprep.mubr.f32.mxu1 %v3759_v33  ;;  %v3794_v48 = vand.u32 4294901760, %v3780_v41  ;;  %s3639_s14 = smov 80  }
   0xb   :  { %v3786_v45 = vsub.f32 %v48_v32, %v3768_v37  ;;  %3378 = vmatpush3.msra.mxu0 %v3695_v10  ;;  %v177_v49 = vand.u32 4294901760, %v176_v36  ;;  %v3799_v51 = vsub.f32 %v24_v12, %v3727_v21  ;;  %v3802_v52 = vsub.f32 %v23_v13, %v3729_v22 }
   0xc   :  { %v126_v47 = vand.u32 4294901760, %v3777_v40  ;;  %3379 = vmatprep.subr.mxu0 %v3697_v11  ;;  %3392 = vmatprep.subr.mxu1 %v163_v42  ;;  %v3806_v53 = vsub.f32 %v22_v28, %v3774_v39  ;;  %v184_v54 = vand.u32 4294901760, %v183_v44  ;;  %v197_v56 = vsub.f32 %v3780_v41, %v3794_v48 }
   0xd   :  { %v136_v50 = vand.u32 4294901760, %v3786_v45  ;;  %3380 = vmatpush3.msra.mxu0 %v3697_v11  ;;  %3393 = vmatpush3.msra.mxu1 %v163_v42  ;;  %v3815_v57 = vand.u32 4294901760, %v3799_v51  ;;  %v3822_v59 = vand.u32 4294901760, %v3802_v52  ;;  %v191_v60 = vand.u32 4294901760, %v190_v46 }
   0xe   :  { %3381 = vmatprep.subr.mxu0 %v3709_v15  ;;  %3394 = vmatprep.subr.mxu1 %v170_v43  ;;  %v127_v55 = vsub.f32 %v3777_v40, %v126_v47  ;;  %v3829_v62 = vand.u32 4294901760, %v3806_v53  ;;  %v198_v0 = vand.u32 4294901760, %v197_v56  ;;  %vm647_vm1 = vcmask 130048  }
   0xf   :  { %3382 = vmatpush3.msra.mxu0 %v3709_v15  ;;  %3395 = vmatpush3.msra.mxu1 %v170_v43  ;;  %v137_v58 = vsub.f32 %v3786_v45, %v136_v50  ;;  %v204_v61 = vsub.f32 %v3799_v51, %v3815_v57  ;;  %v211_v2 = vsub.f32 %v3802_v52, %v3822_v59  ;;  %vm2326_vm10 = vcmask 1041409  }
  0x10   :  { %3383 = vmatprep.subr.mxu0 %v3727_v21  ;;  %3396 = vmatprep.subr.mxu1 %v177_v49  ;;  %v128_v63 = vand.u32 4294901760, %v127_v55  ;;  %v218_v7 = vsub.f32 %v3806_v53, %v3829_v62  ;;  %vm2328_vm11 = vcmask 1042434   ;;  %vm2330_vm12 = vcmask 1043459  }
  0x11   :  { %3384 = vmatpush3.msra.mxu0 %v3727_v21  ;;  %3397 = vmatpush3.msra.mxu1 %v177_v49  ;;  %v138_v1 = vand.u32 4294901760, %v137_v58  ;;  %v205_v6 = vand.u32 4294901760, %v204_v61  ;;  %v212_v8 = vand.u32 4294901760, %v211_v2  ;;  %vm2332_vm13 = vcmask 1044484  }
  0x12   :  { %3385 = vmatprep.subr.mxu0 %v3729_v22  ;;  %3398 = vmatprep.subr.mxu1 %v184_v54  ;;  %v219_v9 = vand.u32 4294901760, %v218_v7  ;;  %vm2334_vm14 = vcmask 1045509   ;;  %vm2336_vm15 = vcmask 1046534   ;;  %vm2338_vm0 = vcmask 1047559  }
  0x13   :  { %3386 = vmatpush3.msra.mxu0 %v3729_v22  ;;  %3399 = vmatpush3.msra.mxu1 %v184_v54 }
  0x14   :  { %3387 = vmatprep.subr.mxu0 %v3774_v39  ;;  %3400 = vmatprep.subr.mxu1 %v191_v60 }
  0x15   :  { %3388 = vmatpush3.msra.mxu0 %v3774_v39  ;;  %3401 = vmatpush3.msra.mxu1 %v191_v60 }
  0x16   :  { %3389 = vmatprep.mubr.f32.mxu0 %v128_v63  ;;  %3402 = vmatprep.subr.mxu1 %v198_v0 }
  0x17   :  { %3413 = vmatprep.subr.mxu0 %v3707_v14  ;;  %3390 = vmatmul.mubr.f32.vlgmr.msra.gmra.mxu0 %v138_v1 }
  0x18   :  { %3403 = vmatpush3.msra.mxu1 %v198_v0  ;;  %3414 = vmatpush3.msra.mxu0 %v3707_v14 }
  0x19   :  { %3404 = vmatprep.subr.mxu1 %v205_v6  ;;  %3415 = vmatprep.subr.mxu0 %v3712_v16 }
  0x1a   :  { %3405 = vmatpush3.msra.mxu1 %v205_v6  ;;  %3416 = vmatpush3.msra.mxu0 %v3712_v16 }
  0x1b   :  { %3406 = vmatprep.subr.mxu1 %v212_v8  ;;  %3417 = vmatprep.subr.mxu0 %v3715_v17 }
  0x1c   :  { %3407 = vmatpush3.msra.mxu1 %v212_v8  ;;  %3418 = vmatpush3.msra.mxu0 %v3715_v17 }
  0x1d   :  { %3408 = vmatprep.subr.mxu1 %v219_v9  ;;  %3419 = vmatprep.subr.mxu0 %v3732_v23 }
  0x1e   :  { %3409 = vmatpush3.msra.mxu1 %v219_v9  ;;  %3420 = vmatpush3.msra.mxu0 %v3732_v23 }
  0x1f   :  { %3411 = vmatmul.mubr.f32.vlgmr.msra.gmra.mxu1 %v3768_v37  ;;  %3421 = vmatprep.subr.mxu0 %v3735_v24 }
  0x20   :  { %3434 = vmatprep.subr.mxu1 %v3680_v3  ;;  %3422 = vmatpush3.msra.mxu0 %v3735_v24 }
  0x21   :  { %3435 = vmatpush3.msra.mxu1 %v3680_v3  ;;  %3423 = vmatprep.subr.mxu0 %v3780_v41 }
  0x22   :  { %3436 = vmatprep.subr.mxu1 %v3682_v4  ;;  %3424 = vmatpush3.msra.mxu0 %v3780_v41 }
  0x23   :  { %3437 = vmatpush3.msra.mxu1 %v3682_v4  ;;  %3425 = vmatprep.subr.mxu0 %v3799_v51 }
  0x24   :  { %3438 = vmatprep.subr.mxu1 %v3684_v5  ;;  %3426 = vmatpush3.msra.mxu0 %v3799_v51 }
  0x25   :  { %3439 = vmatpush3.msra.mxu1 %v3684_v5  ;;  %3427 = vmatprep.subr.mxu0 %v3802_v52 }
  0x26   :  { %3440 = vmatprep.subr.mxu1 %v3695_v10  ;;  %3428 = vmatpush3.msra.mxu0 %v3802_v52 }
  0x27   :  { %3441 = vmatpush3.msra.mxu1 %v3695_v10  ;;  %3429 = vmatprep.subr.mxu0 %v3806_v53 }
  0x28   :  { %3442 = vmatprep.subr.mxu1 %v3697_v11  ;;  %3430 = vmatpush3.msra.mxu0 %v3806_v53 }
  0x29   :  { %3431 = vmatprep.mubr.f32.mxu0 %v3777_v40  ;;  %3443 = vmatpush3.msra.mxu1 %v3697_v11 }
  0x2a   :  { %3432 = vmatmul.mubr.f32.vlgmr.msra.gmra.mxu0 %v3786_v45  ;;  %3444 = vmatprep.subr.mxu1 %v3709_v15 }
  0x2b   :  { %3455 = vmatprep.subr.mxu0 %v3739_v25  ;;  %3445 = vmatpush3.msra.mxu1 %v3709_v15 }
  0x2c   :  { %3456 = vmatpush3.msra.mxu0 %v3739_v25  ;;  %3446 = vmatprep.subr.mxu1 %v3727_v21 }
  0x2d   :  { %3457 = vmatprep.subr.mxu0 %v3742_v26  ;;  %3447 = vmatpush3.msra.mxu1 %v3727_v21 }
  0x2e   :  { %3458 = vmatpush3.msra.mxu0 %v3742_v26  ;;  %3448 = vmatprep.subr.mxu1 %v3729_v22 }
  0x2f   :  { %3459 = vmatprep.subr.mxu0 %v3745_v27  ;;  %3449 = vmatpush3.msra.mxu1 %v3729_v22 }
  0x30   :  { %3460 = vmatpush3.msra.mxu0 %v3745_v27  ;;  %3450 = vmatprep.subr.mxu1 %v3774_v39 }
  0x31   :  { %3461 = vmatprep.subr.mxu0 %v3753_v30  ;;  %3451 = vmatpush3.msra.mxu1 %v3774_v39 }
  0x32   :  { %3452 = vmatprep.mubr.f32.mxu1 %v126_v47  ;;  %3462 = vmatpush3.msra.mxu0 %v3753_v30 }
  0x33   :  { %3453 = vmatmul.mubr.f32.vlgmr.msra.gmra.mxu1 %v136_v50  ;;  %3463 = vmatprep.subr.mxu0 %v3756_v31 }
  0x34   :  { %3476 = vmatprep.subr.mxu1 %v3680_v3  ;;  %3464 = vmatpush3.msra.mxu0 %v3756_v31 }
  0x35   :  { %3477 = vmatpush3.msra.mxu1 %v3680_v3  ;;  %3465 = vmatprep.subr.mxu0 %v3794_v48 }
  0x36   :  { %3478 = vmatprep.subr.mxu1 %v3682_v4  ;;  %3466 = vmatpush3.msra.mxu0 %v3794_v48 }
  0x37   :  { %3479 = vmatpush3.msra.mxu1 %v3682_v4  ;;  %3467 = vmatprep.subr.mxu0 %v3815_v57 }
  0x38   :  { %3480 = vmatprep.subr.mxu1 %v3684_v5  ;;  %3468 = vmatpush3.msra.mxu0 %v3815_v57 }
  0x39   :  { %3481 = vmatpush3.msra.mxu1 %v3684_v5  ;;  %3469 = vmatprep.subr.mxu0 %v3822_v59 }
  0x3a   :  { %3482 = vmatprep.subr.mxu1 %v3695_v10  ;;  %3470 = vmatpush3.msra.mxu0 %v3822_v59 }
  0x3b   :  { %3483 = vmatpush3.msra.mxu1 %v3695_v10  ;;  %3471 = vmatprep.subr.mxu0 %v3829_v62 }
  0x3c   :  { %3484 = vmatprep.subr.mxu1 %v3697_v11  ;;  %3472 = vmatpush3.msra.mxu0 %v3829_v62 }
  0x3d   :  { %3473 = vmatprep.mubr.f32.mxu0 %v3759_v33  ;;  %3485 = vmatpush3.msra.mxu1 %v3697_v11 }
  0x3e   :  { %3474 = vmatmul.mubr.f32.vlgmr.msra.gmra.mxu0 %v3768_v37  ;;  %3486 = vmatprep.subr.mxu1 %v3709_v15 }
  0x3f   :  { %3487 = vmatpush3.msra.mxu1 %v3709_v15  ;;  %3494 = vmatprep.mubr.f32.mxu1 %v3759_v33 }
  0x40   :  { %3488 = vmatprep.subr.mxu1 %v3727_v21 }
  0x41   :  { %3489 = vmatpush3.msra.mxu1 %v3727_v21 }
  0x42   :  { %3490 = vmatprep.subr.mxu1 %v3729_v22 }
  0x43   :  { %3491 = vmatpush3.msra.mxu1 %v3729_v22 }
  0x44   :  { %3492 = vmatprep.subr.mxu1 %v3774_v39 }
  0x45   :  { %3493 = vmatpush3.msra.mxu1 %v3774_v39 }
  0x46   :  { %3495 = vmatmul.mubr.f32.vlgmr.msra.gmra.mxu1 %v3768_v37 }
  0x80   :  { %v36_v3 = vpop.permute.xlu0 %35 }
  0x84   :  { %v41_v11 = vpop.permute.xlu0 %40 }
  0xd7   :  { %v3391_v4 = vpop.f32.mrf.mxu0 }
  0xd8   :  { %v141_v14 = vadd.f32 %v3391_v4, %v41_v11 }
  0xd9   :  { %v130_v5 = vpop.f32.mrf.mxu0 }
  0xda   :  { %v131_v15 = vadd.f32 %v130_v5, %v36_v3 }
  0xdf   :  { %v3412_v10 = vpop.f32.mrf.mxu1 }
  0xe0   :  { %v263_v19 = vadd.f32 %v3412_v10, %v141_v14 }
  0xe1   :  { %v256_v13 = vpop.f32.mrf.mxu1 }
  0xe2   :  { %v257_v20 = vadd.f32 %v256_v13, %v131_v15  ;;  %v1958_v15 = vlaneseq }
  0xea   :  { %v3433_v12 = vpop.f32.mrf.mxu0 }
  0xeb   :  { %v360_v22 = vadd.f32 %v3433_v12, %v263_v19 }
  0xec   :  { %v352_v16 = vpop.f32.mrf.mxu0 }
  0xed   :  { %v353_v23 = vadd.f32 %v352_v16, %v257_v20  ;;  %v3954_v16 = vshrl.u32 %v1958_v15, 7 }
  0xef   :  { %5194 = vst [vmem:[#allocation9_spill] sm:$0xff] %v3954_v16  ;;  %v3970_v20 = vsub.s32 1, %v3954_v16 }
  0xf3   :  { %v3454_v17 = vpop.f32.mrf.mxu1 }
  0xf4   :  { %v450_v25 = vadd.f32 %v3454_v17, %v360_v22  ;;  %v3957_v17 = vsub.s32 0, %v3954_v16  ;;  %v3977_v22 = vsub.s32 2, %v3954_v16 }
  0xf5   :  { %v441_v21 = vpop.f32.mrf.mxu1 }
  0xf6   :  { %v442_v26 = vadd.f32 %v441_v21, %v353_v23 }
  0xfe   :  { %v3475_v18 = vpop.f32.mrf.mxu0 }
  0xff   :  { %v554_v28 = vadd.f32 %v3475_v18, %v450_v25  ;;  %v3990_v25 = vsub.s32 3, %v3954_v16 }
 0x100   :  { %v547_v24 = vpop.f32.mrf.mxu0 }
 0x101   :  { %v548_v29 = vadd.f32 %v547_v24, %v442_v26 }
 0x106   :  { %v3496_v27 = vpop.f32.mrf.mxu1 }
 0x107   :  { %v640_v31 = vadd.f32 %v3496_v27, %v554_v28  ;;  %v4003_v28 = vsub.s32 4, %v3954_v16 }
 0x108   :  { %v633_v30 = vpop.f32.mrf.mxu1 }
 0x109   :  { %v634_v32 = vadd.f32 %v633_v30, %v548_v29  ;;  %v3924_v34 = vmax.f32 %v640_v31, 0.0  ;;  %v4016_v31 = vsub.s32 5, %v3954_v16 }
 0x10b   :  { %v3922_v33 = vmax.f32 %v634_v32, 0.0  ;;  %v646_v36 = vmul.f32 %v3924_v34, %v3924_v34 }
 0x10d   :  { %v645_v35 = vmul.f32 %v3922_v33, %v3922_v33  ;;  %v651_v42 = vsel %vm647_vm1, %v646_v36, 0.0 }
 0x10f   :  { %676 = vrot.lane.b32.xlu1 %v645_v35, %s3632_s2  ;;  %v648_v41 = vsel %vm647_vm1, %v645_v35, 0.0 }
 0x113   :  { %678 = vrot.lane.b32.xlu1 %v646_v36, %s3632_s2 }
 0x181   :  { %v677_v37 = vpop.permute.xlu1 %676 }
 0x182   :  { %v682_v38 = vsel %vm647_vm1, %v677_v37, 0.0  ;;  %v4034_v37 = vsub.s32 6, %v3954_v16 }
 0x183   :  { %683 = vadd.xlane.f32.xlu0 %v682_v38 }
 0x185   :  { %v679_v39 = vpop.permute.xlu1 %678 }
 0x186   :  { %v685_v40 = vsel %vm647_vm1, %v679_v39, 0.0 }
 0x187   :  { %686 = vadd.xlane.f32.xlu1 %v685_v40  ;;  %649 = vadd.xlane.f32.xlu0 %v648_v41 }
 0x18b   :  { %652 = vadd.xlane.f32.xlu0 %v651_v42 }
 0x20c   :  { %v684_v43 = vpop.xlane.xlu0 %683 }
 0x20d   :  { %3593 = vrsqrt.f32 %v684_v43  ;;  %vm690_vm2 = vcmp.eq.f32.partialorder %v684_v43, inf  ;;  %v693_v47 = vand.u32 2147483648, %v684_v43  ;;  %vm692_vm3 = vcmp.eq.f32.partialorder %v684_v43, 0.0 }
 0x210   :  { %v687_v44 = vpop.xlane.xlu1 %686  ;;  %v650_v51 = vpop.xlane.xlu0 %649 }
 0x211   :  { %3595 = vrsqrt.f32 %v687_v44  ;;  %vm697_vm4 = vcmp.eq.f32.partialorder %v687_v44, inf  ;;  %v700_v54 = vand.u32 2147483648, %v687_v44  ;;  %vm699_vm5 = vcmp.eq.f32.partialorder %v687_v44, 0.0 }
 0x212   :  { %vm656_vm6 = vcmp.eq.f32.partialorder %v650_v51, inf  ;;  %v659_v7 = vand.u32 2147483648, %v650_v51  ;;  %vm658_vm7 = vcmp.eq.f32.partialorder %v650_v51, 0.0 }
 0x214   :  { %v653_v58 = vpop.xlane.xlu0 %652 }
 0x215   :  { %vm663_vm8 = vcmp.eq.f32.partialorder %v653_v58, inf  ;;  %v666_v3 = vand.u32 2147483648, %v653_v58  ;;  %vm665_vm9 = vcmp.eq.f32.partialorder %v653_v58, 0.0 }
 0x21a   :  { %v3594_v45 = vpop.eup %3593 }
 0x21b   :  { %v689_v46 = vmul.f32 %v3594_v45, %v684_v43 }
 0x21d   :  { %v691_v48 = vsel %vm690_vm2, %v684_v43, %v689_v46  ;;  %v2037_v46 = vsub.s32 7, %v3954_v16  ;;  %vm2468_vm2 = vcmask 254080  }
 0x21e   :  { %v3596_v49 = vpop.eup %3595  ;;  %v694_v50 = vsel %vm692_vm3, %v693_v47, %v691_v48  ;;  %vm2474_vm3 = vcmask 385280  }
 0x21f   :  { %v702_v52 = vadd.f32 1e-06, %v694_v50  ;;  %v696_v53 = vmul.f32 %v3596_v49, %v687_v44 }
 0x221   :  { %3597 = vrcp.f32 %v702_v52  ;;  %v698_v55 = vsel %vm697_vm4, %v687_v44, %v696_v53  ;;  %vm2481_vm4 = vcmask 516480  }
 0x222   :  { %v701_v56 = vsel %vm699_vm5, %v700_v54, %v698_v55  ;;  %3599 = vrsqrt.f32 %v650_v51  ;;  %vm2494_vm5 = vcmask 647680  }
 0x223   :  { %v703_v57 = vadd.f32 1e-06, %v701_v56 }
 0x225   :  { %3601 = vrcp.f32 %v703_v57 }
 0x226   :  { %3603 = vrsqrt.f32 %v653_v58 }
 0x22e   :  { %v3598_v59 = vpop.eup %3597 }
 0x22f   :  { %v3937_v60 = vmul.f32 %v3598_v59, %v3922_v33  ;;  %v3600_v61 = vpop.eup %3599 }
 0x230   :  { %v655_v0 = vmul.f32 %v3600_v61, %v650_v51 }
 0x231   :  { %5190 = vst [vmem:[#allocation5_spill] sm:$0xff] %v3937_v60  ;;  %710 = vrot.lane.b32.xlu1 %v3937_v60, %s3632_s2  ;;  %v3961_v18 = vrot.slane %v3937_v60, %v3957_v17  ;;  %v3982_v23 = vrot.slane %v3937_v60, %v3977_v22  ;;  %v3995_v26 = vrot.slane %v3937_v60, %v3990_v25 }
 0x232   :  { %v3602_v62 = vpop.eup %3601  ;;  %v657_v2 = vsel %vm656_vm6, %v650_v51, %v655_v0  ;;  %v4008_v29 = vrot.slane %v3937_v60, %v4003_v28  ;;  %v4021_v32 = vrot.slane %v3937_v60, %v4016_v31  ;;  %v4045_v41 = vrot.slane %v3937_v60, %v4034_v37 }
 0x233   :  { %v3942_v63 = vmul.f32 %v3602_v62, %v3924_v34  ;;  %v3604_v1 = vpop.eup %3603  ;;  %v660_v8 = vsel %vm658_vm7, %v659_v7, %v657_v2  ;;  %v2658_v49 = vrot.slane %v3937_v60, %v2037_v46  ;;  %v2586_v56 = vrot.slane %v3937_v60, %v3970_v20 }
 0x234   :  { %v662_v6 = vmul.f32 %v3604_v1, %v653_v58  ;;  %v668_v4 = vadd.f32 1e-06, %v660_v8  ;;  %vm2501_vm6 = vcmask 778880   ;;  %vm2507_vm7 = vcmask 910080  }
 0x235   :  { %5191 = vst [vmem:[#allocation6_spill] sm:$0xff] %v3942_v63  ;;  %712 = vrot.lane.b32.xlu0 %v3942_v63, %s3632_s2  ;;  %v3966_v19 = vrot.slane %v3942_v63, %v3957_v17  ;;  %v3974_v21 = vrot.slane %v3942_v63, %v3970_v20  ;;  %v3987_v24 = vrot.slane %v3942_v63, %v3977_v22 }
 0x236   :  { %v664_v9 = vsel %vm663_vm8, %v653_v58, %v662_v6  ;;  %3605 = vrcp.f32 %v668_v4  ;;  %v4000_v27 = vrot.slane %v3942_v63, %v3990_v25  ;;  %v4013_v30 = vrot.slane %v3942_v63, %v4003_v28 }
 0x237   :  { %v667_v5 = vsel %vm665_vm9, %v666_v3, %v664_v9  ;;  %v4031_v36 = vrot.slane %v3942_v63, %v4016_v31  ;;  %v2742_v44 = vrot.slane %v3942_v63, %v4034_v37  ;;  %v2754_v51 = vrot.slane %v3942_v63, %v2037_v46 }
 0x238   :  { %v669_v10 = vadd.f32 1e-06, %v667_v5  ;;  %vm2514_vm8 = vcmask 1041280  }
 0x23a   :  { %3607 = vrcp.f32 %v669_v10 }
 0x243   :  { %v3606_v11 = vpop.eup %3605 }
 0x244   :  { %v3947_v12 = vmul.f32 %v3606_v11, %v3922_v33 }
 0x246   :  { %5192 = vst [vmem:[#allocation7_spill] sm:$0xff] %v3947_v12  ;;  %v1961_v52 = vrot.slane %v3947_v12, %v3957_v17  ;;  %v1972_v53 = vrot.slane %v3947_v12, %v3970_v20  ;;  %v1983_v57 = vrot.slane %v3947_v12, %v3977_v22  ;;  %v1994_v59 = vrot.slane %v3947_v12, %v3990_v25 }
 0x247   :  { %v3608_v13 = vpop.eup %3607  ;;  %v2005_v62 = vrot.slane %v3947_v12, %v4003_v28  ;;  %v4101_v1 = vrot.slane %v3947_v12, %v4016_v31  ;;  %v4113_v6 = vrot.slane %v3947_v12, %v4034_v37  ;;  %v4124_v8 = vrot.slane %v3947_v12, %v2037_v46 }
 0x248   :  { %v3951_v14 = vmul.f32 %v3608_v13, %v3924_v34  ;;  %v4140_v11 = vand.u32 4294901760, %v3947_v12 }
 0x24a   :  { %5193 = vst [vmem:[#allocation8_spill] sm:$0xff] %v3951_v14  ;;  %v2049_v54 = vrot.slane %v3951_v14, %v3957_v17  ;;  %v2060_v55 = vrot.slane %v3951_v14, %v3970_v20  ;;  %v2071_v58 = vrot.slane %v3951_v14, %v3977_v22  ;;  %v2082_v61 = vrot.slane %v3951_v14, %v3990_v25 }
 0x24b   :  { %v4095_v0 = vrot.slane %v3951_v14, %v4003_v28  ;;  %v4107_v2 = vrot.slane %v3951_v14, %v4016_v31  ;;  %v4119_v7 = vrot.slane %v3951_v14, %v4034_v37  ;;  %v4129_v9 = vrot.slane %v3951_v14, %v2037_v46 }
 0x24c   :  { %v4134_v3 = vand.u32 4294901760, %v3951_v14 }
 0x24e   :  { %v4144_v13 = vsub.f32 %v3951_v14, %v4134_v3 }
 0x250   :  { %v4156_v22 = vand.u32 4294901760, %v4144_v13 }
 0x253   :  { %1256 = vxpose.xlu0.b32.start [1/2] (short) (narrow) %v3947_v12, 16 }
 0x257   :  { %1257 = vxpose.xlu0.b32.end [2/2] (short) (narrow) %v3951_v14, 16 }
 0x280   :  { %2577 = vbcast.lane.b32.xlu0 %v3961_v18, 272 }
 0x284   :  { %2673 = vbcast.lane.b32.xlu0 %v3966_v19, 272 }
 0x288   :  { %2685 = vbcast.lane.b32.xlu0 %v3974_v21, 272 }
 0x28c   :  { %2601 = vbcast.lane.b32.xlu0 %v3982_v23, 272 }
 0x290   :  { %2697 = vbcast.lane.b32.xlu0 %v3987_v24, 272 }
 0x294   :  { %2613 = vbcast.lane.b32.xlu0 %v3995_v26, 272 }
 0x298   :  { %2709 = vbcast.lane.b32.xlu0 %v4000_v27, 272 }
 0x29c   :  { %2625 = vbcast.lane.b32.xlu0 %v4008_v29, 272 }
 0x2a0   :  { %2721 = vbcast.lane.b32.xlu0 %v4013_v30, 272 }
 0x2a3   :  { %v711_v33 = vpop.permute.xlu1 %710 }
 0x2a4   :  { %v4023_v34 = vand.u32 4294901760, %v711_v33  ;;  %716 = vxpose.xlu1.b32.start [1/2] (short) (narrow) %v711_v33, 16  ;;  %2637 = vbcast.lane.b32.xlu0 %v4021_v32, 272 }
 0x2a6   :  { %v4027_v35 = vsub.f32 %v711_v33, %v4023_v34 }
 0x2a7   :  { %v713_v38 = vpop.permute.xlu0 %712 }
 0x2a8   :  { %v4036_v39 = vand.u32 4294901760, %v713_v38  ;;  %2733 = vbcast.lane.b32.xlu0 %v4031_v36, 272  ;;  %717 = vxpose.xlu1.b32.end [2/2] (short) (narrow) %v713_v38, 16  ;;  %v4048_v42 = vand.u32 4294901760, %v4027_v35 }
 0x2aa   :  { %v4040_v40 = vsub.f32 %v713_v38, %v4036_v39  ;;  %3497 = vmatprep.subr.mxu0 %v4036_v39  ;;  %v880_v47 = vsub.f32 %v4027_v35, %v4048_v42 }
 0x2ab   :  { %3498 = vmatpush3.msra.mxu0 %v4036_v39 }
 0x2ac   :  { %2649 = vbcast.lane.b32.xlu0 %v4045_v41, 272  ;;  %3499 = vmatprep.subr.mxu0 %v4023_v34  ;;  %v4054_v43 = vand.u32 4294901760, %v4040_v40  ;;  %v881_v50 = vand.u32 4294901760, %v880_v47 }
 0x2ad   :  { %3500 = vmatpush3.msra.mxu0 %v4023_v34 }
 0x2ae   :  { %3511 = vmatprep.subr.mxu0 %v4040_v40  ;;  %v873_v45 = vsub.f32 %v4040_v40, %v4054_v43 }
 0x2b0   :  { %2745 = vbcast.lane.b32.xlu0 %v2742_v44, 272  ;;  %v874_v48 = vand.u32 4294901760, %v873_v45 }
 0x2b2   :  { %3504 = vmatprep.subr.mxu1 %v874_v48 }
 0x2b3   :  { %3505 = vmatpush3.msra.mxu1 %v874_v48 }
 0x2b4   :  { %2661 = vbcast.lane.b32.xlu0 %v2658_v49, 272  ;;  %3506 = vmatprep.subr.mxu1 %v881_v50 }
 0x2b5   :  { %3507 = vmatpush3.msra.mxu1 %v881_v50 }
 0x2b6   :  { %3518 = vmatprep.subr.mxu1 %v4036_v39 }
 0x2b8   :  { %2757 = vbcast.lane.b32.xlu0 %v2754_v51, 272 }
 0x2bc   :  { %1963 = vbcast.lane.b32.xlu0 %v1961_v52, 256 }
 0x2c0   :  { %1974 = vbcast.lane.b32.xlu0 %v1972_v53, 256 }
 0x2c4   :  { %2051 = vbcast.lane.b32.xlu0 %v2049_v54, 256 }
 0x2c6   :  { %2581 = vbcast.lane.b32.xlu1 %v3961_v18, 280 }
 0x2c8   :  { %2062 = vbcast.lane.b32.xlu0 %v2060_v55, 256 }
 0x2ca   :  { %2589 = vbcast.lane.b32.xlu1 %v2586_v56, 272 }
 0x2cc   :  { %1985 = vbcast.lane.b32.xlu0 %v1983_v57, 256 }
 0x2ce   :  { %2593 = vbcast.lane.b32.xlu1 %v2586_v56, 280 }
 0x2d0   :  { %2073 = vbcast.lane.b32.xlu0 %v2071_v58, 256 }
 0x2d2   :  { %2677 = vbcast.lane.b32.xlu1 %v3966_v19, 280 }
 0x2d4   :  { %1996 = vbcast.lane.b32.xlu0 %v1994_v59, 256 }
 0x2d6   :  { %2689 = vbcast.lane.b32.xlu1 %v3974_v21, 280  ;;  %v4153_v21 = vsub.f32 %v3947_v12, %v4140_v11 }
 0x2d8   :  { %2084 = vbcast.lane.b32.xlu0 %v2082_v61, 256  ;;  %v4163_v28 = vand.u32 4294901760, %v4153_v21 }
 0x2da   :  { %2605 = vbcast.lane.b32.xlu1 %v3982_v23, 280  ;;  %v1272_v23 = vpop.trf.xlu0  ;;  %v1420_v37 = vsub.f32 %v4153_v21, %v4163_v28 }
 0x2dc   :  { %2007 = vbcast.lane.b32.xlu0 %v2005_v62, 256  ;;  %v1421_v45 = vand.u32 4294901760, %v1420_v37 }
 0x2de   :  { %2701 = vbcast.lane.b32.xlu1 %v3987_v24, 280  ;;  %v1273_v33 = vpop.trf.xlu0 }
 0x2df   :  { %v1292_v38 = vsel %vm647_vm1, %v1273_v33, 0 }
 0x2e0   :  { %2095 = vbcast.lane.b32.xlu0 %v4095_v0, 256 }
 0x2e2   :  { %2617 = vbcast.lane.b32.xlu1 %v3995_v26, 280 }
 0x2e4   :  { %2018 = vbcast.lane.b32.xlu0 %v4101_v1, 256 }
 0x2e6   :  { %2713 = vbcast.lane.b32.xlu1 %v4000_v27, 280 }
 0x2e8   :  { %2106 = vbcast.lane.b32.xlu0 %v4107_v2, 256 }
 0x2ea   :  { %2629 = vbcast.lane.b32.xlu1 %v4008_v29, 280  ;;  %v1289_v29 = vsel %vm647_vm1, %v1272_v23, 0 }
 0x2ec   :  { %2029 = vbcast.lane.b32.xlu0 %v4113_v6, 256 }
 0x2ee   :  { %2725 = vbcast.lane.b32.xlu1 %v4013_v30, 280  ;;  %v1413_v30 = vsub.f32 %v4144_v13, %v4156_v22 }
 0x2f0   :  { %2117 = vbcast.lane.b32.xlu0 %v4119_v7, 256 }
 0x2f2   :  { %2641 = vbcast.lane.b32.xlu1 %v4021_v32, 280  ;;  %v4170_v32 = vand.u32 4294901760, %v1289_v29  ;;  %v4224_v50 = vpop.permute.xlu0 %2577 }
 0x2f4   :  { %2040 = vbcast.lane.b32.xlu0 %v4124_v8, 256 }
 0x2f6   :  { %2737 = vbcast.lane.b32.xlu1 %v4031_v36, 280 }
 0x2f8   :  { %2128 = vbcast.lane.b32.xlu0 %v4129_v9, 256 }
 0x2fa   :  { %2653 = vbcast.lane.b32.xlu1 %v4045_v41, 280  ;;  %v1414_v41 = vand.u32 4294901760, %v1413_v30 }
 0x2fe   :  { %2749 = vbcast.lane.b32.xlu1 %v2742_v44, 280  ;;  %v1371_v44 = vand.u32 4294901760, %v1292_v38 }
 0x302   :  { %2665 = vbcast.lane.b32.xlu1 %v2658_v49, 280 }
 0x306   :  { %2761 = vbcast.lane.b32.xlu1 %v2754_v51, 280 }
 0x30a   :  { %1967 = vbcast.lane.b32.xlu1 %v1961_v52, 264  ;;  %v4228_v52 = vpop.permute.xlu0 %2673 }
 0x30e   :  { %1978 = vbcast.lane.b32.xlu1 %v1972_v53, 264 }
 0x312   :  { %2055 = vbcast.lane.b32.xlu1 %v2049_v54, 264  ;;  %v4232_v54 = vpop.permute.xlu0 %2685 }
 0x316   :  { %2066 = vbcast.lane.b32.xlu1 %v2060_v55, 264  ;;  %v4236_v56 = vpop.permute.xlu0 %2601 }
 0x31a   :  { %1989 = vbcast.lane.b32.xlu1 %v1983_v57, 264 }
 0x31e   :  { %2077 = vbcast.lane.b32.xlu1 %v2071_v58, 264  ;;  %v4240_v58 = vpop.permute.xlu0 %2697 }
 0x320   :  { %v732_v4 = vpop.trf.xlu1 }
 0x321   :  { %v749_v5 = vsel %vm647_vm1, %v732_v4, 0 }
 0x322   :  { %v4137_v10 = vand.u32 4294901760, %v749_v5  ;;  %2000 = vbcast.lane.b32.xlu1 %v1994_v59, 264 }
 0x324   :  { %v822_v15 = vsub.f32 %v749_v5, %v4137_v10  ;;  %3508 = vmatprep.mubr.f32.mxu1 %v4137_v10  ;;  %v733_v17 = vpop.trf.xlu1 }
 0x325   :  { %v752_v18 = vsel %vm647_vm1, %v733_v17, 0 }
 0x326   :  { %v4149_v19 = vand.u32 4294901760, %v752_v18  ;;  %2088 = vbcast.lane.b32.xlu1 %v2082_v61, 264  ;;  %v823_v20 = vand.u32 4294901760, %v822_v15  ;;  %v4244_v61 = vpop.permute.xlu0 %2613 }
 0x328   :  { %v832_v24 = vsub.f32 %v752_v18, %v4149_v19  ;;  %3509 = vmatmul.mubr.f32.vlgmr.msra.gmra.mxu1 %v4149_v19  ;;  %v824_v25 = vsub.f32 %v822_v15, %v823_v20 }
 0x329   :  { %3519 = vmatpush3.msra.mxu1 %v4036_v39  ;;  %3522 = vmatprep.mubr.f32.mxu1 %v823_v20 }
 0x32a   :  { %v833_v26 = vand.u32 4294901760, %v832_v24  ;;  %3520 = vmatprep.subr.mxu1 %v4023_v34  ;;  %2011 = vbcast.lane.b32.xlu1 %v2005_v62, 264  ;;  %v825_v27 = vand.u32 4294901760, %v824_v25 }
 0x32b   :  { %3521 = vmatpush3.msra.mxu1 %v4023_v34 }
 0x32c   :  { %v834_v31 = vsub.f32 %v832_v24, %v833_v26  ;;  %3532 = vmatprep.subr.mxu1 %v4036_v39  ;;  %3501 = vmatprep.mubr.f32.mxu0 %v825_v27 }
 0x32d   :  { %3523 = vmatmul.mubr.f32.vlgmr.msra.gmra.mxu1 %v833_v26 }
 0x32e   :  { %3533 = vmatpush3.msra.mxu1 %v4036_v39  ;;  %3536 = vmatprep.mubr.f32.mxu1 %v4137_v10  ;;  %v835_v36 = vand.u32 4294901760, %v834_v31  ;;  %v1362_v39 = vsub.f32 %v1289_v29, %v4170_v32 }
 0x32f   :  { %3534 = vmatprep.subr.mxu1 %v4023_v34  ;;  %2099 = vbcast.lane.b32.xlu1 %v4095_v0, 264  ;;  %v4248_v0 = vpop.permute.xlu0 %2709 }
 0x330   :  { %3535 = vmatpush3.msra.mxu1 %v4023_v34  ;;  %3502 = vmatmul.mubr.f32.vlgmr.msra.gmra.mxu0 %v835_v36  ;;  %v1372_v34 = vsub.f32 %v1292_v38, %v1371_v44 }
 0x331   :  { %3546 = vmatprep.subr.mxu1 %v1414_v41  ;;  %3512 = vmatpush3.msra.mxu0 %v4040_v40  ;;  %v1363_v40 = vand.u32 4294901760, %v1362_v39 }
 0x332   :  { %3537 = vmatmul.mubr.f32.vlgmr.msra.gmra.mxu1 %v4149_v19  ;;  %3513 = vmatprep.subr.mxu0 %v4027_v35  ;;  %v1373_v46 = vand.u32 4294901760, %v1372_v34 }
 0x333   :  { %3547 = vmatpush3.msra.mxu1 %v1414_v41  ;;  %3515 = vmatprep.mubr.f32.mxu0 %v822_v15 }
 0x334   :  { %3548 = vmatprep.subr.mxu1 %v1421_v45  ;;  %3550 = vmatprep.mubr.f32.mxu1 %v4170_v32 }
 0x335   :  { %2022 = vbcast.lane.b32.xlu1 %v4101_v1, 264  ;;  %3514 = vmatpush3.msra.mxu0 %v4027_v35  ;;  %v1364_v35 = vsub.f32 %v1362_v39, %v1363_v40 }
 0x336   :  { %3549 = vmatpush3.msra.mxu1 %v1421_v45  ;;  %3525 = vmatprep.subr.mxu0 %v4054_v43 }
 0x337   :  { %3560 = vmatprep.subr.mxu1 %v4134_v3  ;;  %3516 = vmatmul.mubr.f32.vlgmr.msra.gmra.mxu0 %v832_v24  ;;  %v1365_v47 = vand.u32 4294901760, %v1364_v35 }
 0x338   :  { %3526 = vmatpush3.msra.mxu0 %v4054_v43  ;;  %3551 = vmatmul.mubr.f32.vlgmr.msra.gmra.mxu1 %v1371_v44  ;;  %v1374_v43 = vsub.f32 %v1372_v34, %v1373_v46  ;;  %v4220_v48 = vpop.permute.xlu1 %2581 }
 0x339   :  { %3561 = vmatpush3.msra.mxu1 %v4134_v3  ;;  %3527 = vmatprep.subr.mxu0 %v4048_v42 }
 0x33a   :  { %3529 = vmatprep.mubr.f32.mxu0 %v4137_v10  ;;  %3562 = vmatprep.subr.mxu1 %v4140_v11 }
 0x33b   :  { %3564 = vmatprep.mubr.f32.mxu1 %v1363_v40  ;;  %2110 = vbcast.lane.b32.xlu1 %v4107_v2, 264  ;;  %v4252_v2 = vpop.permute.xlu0 %2625 }
 0x33c   :  { %3528 = vmatpush3.msra.mxu0 %v4048_v42  ;;  %3563 = vmatpush3.msra.mxu1 %v4140_v11  ;;  %v1375_v42 = vand.u32 4294901760, %v1374_v43  ;;  %v4222_v49 = vpop.permute.xlu1 %2589 }
 0x33d   :  { %3539 = vmatprep.subr.mxu0 %v4134_v3  ;;  %3574 = vmatprep.subr.mxu1 %v4134_v3 }
 0x33e   :  { %3530 = vmatmul.mubr.f32.vlgmr.msra.gmra.mxu0 %v4149_v19  ;;  %3565 = vmatmul.mubr.f32.vlgmr.msra.gmra.mxu1 %v1373_v46 }
 0x33f   :  { %3540 = vmatpush3.msra.mxu0 %v4134_v3  ;;  %3575 = vmatpush3.msra.mxu1 %v4134_v3 }
 0x340   :  { %3541 = vmatprep.subr.mxu0 %v4140_v11  ;;  %3543 = vmatprep.mubr.f32.mxu0 %v1365_v47  ;;  %v4226_v51 = vpop.permute.xlu1 %2593 }
 0x341   :  { %3576 = vmatprep.subr.mxu1 %v4140_v11  ;;  %3578 = vmatprep.mubr.f32.mxu1 %v4170_v32 }
 0x342   :  { %2033 = vbcast.lane.b32.xlu1 %v4113_v6, 264  ;;  %3542 = vmatpush3.msra.mxu0 %v4140_v11 }
 0x343   :  { %3577 = vmatpush3.msra.mxu1 %v4140_v11  ;;  %3553 = vmatprep.subr.mxu0 %v4144_v13 }
 0x344   :  { %3544 = vmatmul.mubr.f32.vlgmr.msra.gmra.mxu0 %v1375_v42  ;;  %3579 = vmatmul.mubr.f32.vlgmr.msra.gmra.mxu1 %v1371_v44  ;;  %v4230_v53 = vpop.permute.xlu1 %2677 }
 0x345   :  { %3554 = vmatpush3.msra.mxu0 %v4144_v13  ;;  %3557 = vmatprep.mubr.f32.mxu0 %v1362_v39 }
 0x346   :  { %3555 = vmatprep.subr.mxu0 %v4153_v21  ;;  %2121 = vbcast.lane.b32.xlu1 %v4119_v7, 264  ;;  %v4256_v7 = vpop.permute.xlu0 %2721 }
 0x347   :  { %3556 = vmatpush3.msra.mxu0 %v4153_v21 }
 0x348   :  { %3567 = vmatprep.subr.mxu0 %v4156_v22  ;;  %3558 = vmatmul.mubr.f32.vlgmr.msra.gmra.mxu0 %v1372_v34  ;;  %v4234_v55 = vpop.permute.xlu1 %2689 }
 0x349   :  { %3568 = vmatpush3.msra.mxu0 %v4156_v22  ;;  %3571 = vmatprep.mubr.f32.mxu0 %v4170_v32 }
 0x34a   :  { %3569 = vmatprep.subr.mxu0 %v4163_v28  ;;  %2044 = vbcast.lane.b32.xlu1 %v4124_v8, 264 }
 0x34b   :  { %3570 = vmatpush3.msra.mxu0 %v4163_v28 }
 0x34c   :  { %3572 = vmatmul.mubr.f32.vlgmr.msra.gmra.mxu0 %v1371_v44  ;;  %v4238_v57 = vpop.permute.xlu1 %2605 }
 0x34e   :  { %2132 = vbcast.lane.b32.xlu1 %v4129_v9, 264  ;;  %v4260_v9 = vpop.permute.xlu0 %2637 }
 0x350   :  { %v4242_v59 = vpop.permute.xlu1 %2701 }
 0x352   :  { %v4264_v4 = vpop.permute.xlu0 %2733 }
 0x354   :  { %v4246_v62 = vpop.permute.xlu1 %2617 }
 0x356   :  { %v4268_v10 = vpop.permute.xlu0 %2649 }
 0x358   :  { %v4250_v1 = vpop.permute.xlu1 %2713 }
 0x35a   :  { %v4272_v17 = vpop.permute.xlu0 %2745 }
 0x35c   :  { %v4254_v6 = vpop.permute.xlu1 %2629 }
 0x35e   :  { %v4276_v22 = vpop.permute.xlu0 %2661 }
 0x360   :  { %v4258_v8 = vpop.permute.xlu1 %2725 }
 0x362   :  { %v4280_v31 = vpop.permute.xlu0 %2757 }
 0x364   :  { %v4262_v3 = vpop.permute.xlu1 %2641 }
 0x366   :  { %v4284_v44 = vpop.permute.xlu0 %1963 }
 0x368   :  { %v4266_v5 = vpop.permute.xlu1 %2737 }
 0x36c   :  { %v4270_v13 = vpop.permute.xlu1 %2653 }
 0x370   :  { %v4274_v19 = vpop.permute.xlu1 %2749 }
 0x374   :  { %v4278_v25 = vpop.permute.xlu1 %2665 }
 0x378   :  { %v4282_v36 = vpop.permute.xlu1 %2761 }
 0x37c   :  { %v4286_v46 = vpop.permute.xlu1 %1967 }
 0x3e8   :  { %v3510_v11 = vpop.f32.mrf.mxu1 }
 0x3ea   :  { %v918_v15 = vpop.f32.mrf.mxu1 }
 0x3ed   :  { %v3524_v18 = vpop.f32.mrf.mxu1 }
 0x3ef   :  { %v1082_v20 = vpop.f32.mrf.mxu1 }
 0x3f0   :  { %v3503_v21 = vpop.f32.mrf.mxu0 }
 0x3f1   :  { %v925_v26 = vadd.f32 %v3510_v11, %v3503_v21 }
 0x3f2   :  { %v827_v23 = vpop.f32.mrf.mxu0  ;;  %v3538_v24 = vpop.f32.mrf.mxu1 }
 0x3f3   :  { %v919_v28 = vadd.f32 %v918_v15, %v827_v23  ;;  %v4288_v15 = vpop.permute.xlu0 %1974 }
 0x3f4   :  { %v1246_v29 = vpop.f32.mrf.mxu1 }
 0x3f7   :  { %v3517_v27 = vpop.f32.mrf.mxu0 }
 0x3f8   :  { %v1008_v30 = vadd.f32 %v3517_v27, %v925_v26  ;;  %v3552_v38 = vpop.f32.mrf.mxu1 }
 0x3f9   :  { %v1000_v32 = vpop.f32.mrf.mxu0 }
 0x3fa   :  { %v1001_v33 = vadd.f32 %v1000_v32, %v919_v28  ;;  %v1091_v37 = vadd.f32 %v3524_v18, %v1008_v30  ;;  %v1458_v34 = vpop.f32.mrf.mxu1  ;;  %v4290_v18 = vpop.permute.xlu1 %1978 }
 0x3fb   :  { %5195 = vst [vmem:[#allocation10_spill] sm:$0xff] %v4290_v18 }
 0x3fc   :  { %v1083_v41 = vadd.f32 %v1082_v20, %v1001_v33 }
 0x3fe   :  { %v3531_v39 = vpop.f32.mrf.mxu0  ;;  %v3566_v42 = vpop.f32.mrf.mxu1 }
 0x3ff   :  { %v1174_v45 = vadd.f32 %v3531_v39, %v1091_v37  ;;  %v4292_v37 = vpop.permute.xlu0 %2051 }
 0x400   :  { %v1167_v40 = vpop.f32.mrf.mxu0  ;;  %v1622_v27 = vpop.f32.mrf.mxu1  ;;  %5196 = vst [vmem:[#allocation11_spill] sm:$0xff] %v4292_v37 }
 0x401   :  { %v1168_v35 = vadd.f32 %v1167_v40, %v1083_v41  ;;  %v1253_v43 = vadd.f32 %v3538_v24, %v1174_v45  ;;  %v4294_v45 = vpop.permute.xlu1 %2055 }
 0x402   :  { %5197 = vst [vmem:[#allocation12_spill] sm:$0xff] %v4294_v45 }
 0x403   :  { %v1247_v47 = vadd.f32 %v1246_v29, %v1168_v35 }
 0x404   :  { %v3545_v11 = vpop.f32.mrf.mxu0  ;;  %v3580_v29 = vpop.f32.mrf.mxu1 }
 0x405   :  { %v1378_v21 = vadd.f32 %v3545_v11, %v1253_v43 }
 0x406   :  { %v1367_v23 = vpop.f32.mrf.mxu0 }
 0x407   :  { %v1368_v20 = vadd.f32 %v1367_v23, %v1247_v47  ;;  %v1465_v26 = vadd.f32 %v3552_v38, %v1378_v21  ;;  %v1799_v38 = vld [vmem:[%s5161_s3 + $0x8] sm:$0xff]  ;;  %v1786_v47 = vpop.f32.mrf.mxu1  ;;  %v1801_v21 = vld [vmem:[%s5161_s3 + $0x18] sm:$0xff] }
 0x408   :  { %v3559_v28 = vpop.f32.mrf.mxu0  ;;  %v1803_v23 = vld [vmem:[%s5161_s3 + $0x28] sm:$0xff] }
 0x409   :  { %v1548_v30 = vadd.f32 %v3559_v28, %v1465_v26  ;;  %v1459_v32 = vadd.f32 %v1458_v34, %v1368_v20  ;;  %v1798_v34 = vld [vmem:[%s5161_s3] sm:$0xff]  ;;  %v1805_v20 = vld [vmem:[%s5161_s3 + $0x38] sm:$0xff]  ;;  %v1807_v28 = vld [vmem:[%s5161_s3 + $0x48] sm:$0xff] }
 0x40a   :  { %v1540_v33 = vpop.f32.mrf.mxu0 }
 0x40b   :  { %v1541_v41 = vadd.f32 %v1540_v33, %v1459_v32  ;;  %v1631_v24 = vadd.f32 %v3566_v42, %v1548_v30  ;;  %v1800_v42 = vld [vmem:[%s5161_s3 + $0x10] sm:$0xff]  ;;  %v1809_v30 = vld [vmem:[%s5161_s3 + $0x58] sm:$0xff]  ;;  %v1811_v32 = vld [vmem:[%s5161_s3 + $0x68] sm:$0xff]  ;;  %v4325_v33 = vpop.permute.xlu0 %2062 }
 0x40c   :  { %v3573_v39 = vpop.f32.mrf.mxu0  ;;  %5198 = vst [vmem:[#allocation13_spill] sm:$0xff] %v4325_v33 }
 0x40d   :  { %v1714_v40 = vadd.f32 %v3573_v39, %v1631_v24  ;;  %v1623_v35 = vadd.f32 %v1622_v27, %v1541_v41  ;;  %v1802_v41 = vld [vmem:[%s5161_s3 + $0x20] sm:$0xff] }
 0x40e   :  { %v1707_v43 = vpop.f32.mrf.mxu0  ;;  %v1806_v24 = vld [vmem:[%s5161_s3 + $0x40] sm:$0xff] }
 0x40f   :  { %v1793_v11 = vadd.f32 %v3580_v29, %v1714_v40  ;;  %v1708_v63 = vadd.f32 %v1707_v43, %v1623_v35  ;;  %v4336_v29 = vpop.permute.xlu1 %2066  ;;  %v1808_v40 = vld [vmem:[%s5161_s3 + $0x50] sm:$0xff]  ;;  %v1810_v35 = vld [vmem:[%s5161_s3 + $0x60] sm:$0xff] }
 0x410   :  { %5199 = vst [vmem:[#allocation14_spill] sm:$0xff] %v4336_v29  ;;  %v1812_v43 = vld [vmem:[%s5161_s3 + $0x70] sm:$0xff] }
 0x411   :  { %v4314_v26 = vmul.f32 6.25e-05, %v1793_v11  ;;  %v1787_v27 = vadd.f32 %v1786_v47, %v1708_v63  ;;  %v1804_v63 = vld [vmem:[%s5161_s3 + $0x30] sm:$0xff] }
 0x413   :  { %v4338_v39 = vmul.f32 6.25e-05, %v1787_v27  ;;  %v1831_v11 = vadd.f32 %v1799_v38, %v4314_v26  ;;  %v1833_v47 = vadd.f32 %v1801_v21, %v4314_v26  ;;  %v1835_v60 = vadd.f32 %v1803_v23, %v4314_v26  ;;  %v1813_v27 = vld [vmem:[%s5161_s3 + $0x78] sm:$0xff] }
 0x414   :  { %v1837_v14 = vadd.f32 %v1805_v20, %v4314_v26  ;;  %v1839_v12 = vadd.f32 %v1807_v28, %v4314_v26  ;;  %v1841_v16 = vadd.f32 %v1809_v30, %v4314_v26  ;;  %v1843_v29 = vadd.f32 %v1811_v32, %v4314_v26 }
 0x415   :  { %v1830_v33 = vadd.f32 %v1798_v34, %v4338_v39  ;;  %v1832_v38 = vadd.f32 %v1800_v42, %v4338_v39  ;;  %v1834_v21 = vadd.f32 %v1802_v41, %v4338_v39  ;;  %v1836_v23 = vadd.f32 %v1804_v63, %v4338_v39  ;;  %v4374_v42 = vpop.permute.xlu0 %1985 }
 0x416   :  { %v1838_v45 = vadd.f32 %v1806_v24, %v4338_v39  ;;  %v1840_v37 = vadd.f32 %v1808_v40, %v4338_v39  ;;  %v1842_v20 = vadd.f32 %v1810_v35, %v4338_v39  ;;  %v1844_v28 = vadd.f32 %v1812_v43, %v4338_v39  ;;  %v4384_v35 = vpop.permute.xlu1 %1989 }
 0x417   :  { %v1845_v30 = vadd.f32 %v1813_v27, %v4314_v26  ;;  %v4368_v18 = vclamps-f32 %v1830_v33, 1.0  ;;  %v4370_v32 = vclamps-f32 %v1831_v11, 1.0  ;;  %v4372_v34 = vclamps-f32 %v1832_v38, 1.0 }
 0x418   :  { %v4376_v41 = vclamps-f32 %v1833_v47, 1.0  ;;  %v4378_v63 = vclamps-f32 %v1834_v21, 1.0  ;;  %v4380_v24 = vclamps-f32 %v1835_v60, 1.0  ;;  %v4382_v40 = vclamps-f32 %v1836_v23, 1.0 }
 0x419   :  { %v4386_v43 = vclamps-f32 %v1837_v14, 1.0  ;;  %v4388_v33 = vclamps-f32 %v1838_v45, 1.0  ;;  %v4390_v11 = vclamps-f32 %v1839_v12, 1.0  ;;  %v4392_v27 = vclamps-f32 %v1840_v37, 1.0  ;;  %1926 = vst.msk [vmem:[%s5163_s5] sm:$0xff] %vm647_vm1, %v4368_v18  ;;  %1927 = vst.msk [vmem:[%s5163_s5 + $0x8] sm:$0xff] %vm647_vm1, %v4370_v32  ;;  %v4506_v23 = vpop.permute.xlu0 %2073 }
 0x41a   :  { %1928 = vst.msk [vmem:[%s5163_s5 + $0x10] sm:$0xff] %vm647_vm1, %v4372_v34  ;;  %v4409_v60 = vclamps-f32 %v1841_v16, 1.0  ;;  %v4411_v12 = vclamps-f32 %v1842_v20, 1.0  ;;  %v4413_v14 = vclamps-f32 %v1843_v29, 1.0  ;;  %v4415_v37 = vclamps-f32 %v1844_v28, 1.0  ;;  %1929 = vst.msk [vmem:[%s5163_s5 + $0x18] sm:$0xff] %vm647_vm1, %v4376_v41  ;;  %v4516_v28 = vpop.permute.xlu1 %2077 }
 0x41b   :  { %5200 = vst [vmem:[#allocation15_spill] sm:$0xff] %v4388_v33  ;;  %5201 = vst [vmem:[#allocation16_spill] sm:$0xff] %v4390_v11  ;;  %v4437_v16 = vclamps-f32 %v1845_v30, 1.0  ;;  %v2763_v45 = vmul.f32 %v4368_v18, %v4224_v50  ;;  %v2764_v29 = vmul.f32 %v4370_v32, %v4220_v48  ;;  %v2765_v47 = vmul.f32 %v4372_v34, %v4222_v49 }
 0x41c   :  { %5202 = vst [vmem:[#allocation17_spill] sm:$0xff] %v4392_v27  ;;  %5203 = vst [vmem:[#allocation18_spill] sm:$0xff] %v4409_v60  ;;  %v2766_v48 = vmul.f32 %v4376_v41, %v4226_v51  ;;  %v2767_v49 = vmul.f32 %v4378_v63, %v4236_v56  ;;  %v2768_v50 = vmul.f32 %v4380_v24, %v4238_v57 }
 0x41d   :  { %5204 = vst [vmem:[#allocation19_spill] sm:$0xff] %v4411_v12  ;;  %5205 = vst [vmem:[#allocation20_spill] sm:$0xff] %v4413_v14  ;;  %v2769_v38 = vmul.f32 %v4382_v40, %v4244_v61  ;;  %v2770_v21 = vmul.f32 %v4386_v43, %v4246_v62  ;;  %v2771_v51 = vmul.f32 %v4388_v33, %v4252_v2  ;;  %v2796_v30 = vsel %vm647_vm1, %v2764_v29, 0.0 }
 0x41e   :  { %5206 = vst [vmem:[#allocation21_spill] sm:$0xff] %v4415_v37  ;;  %1930 = vst.msk [vmem:[%s5163_s5 + $0x20] sm:$0xff] %vm647_vm1, %v4378_v63  ;;  %v2772_v56 = vmul.f32 %v4390_v11, %v4254_v6  ;;  %v2773_v57 = vmul.f32 %v4392_v27, %v4260_v9  ;;  %v2774_v61 = vmul.f32 %v4409_v60, %v4262_v3  ;;  %v2795_v9 = vsel %vm647_vm1, %v2763_v45, 0.0 }
 0x41f   :  { %1931 = vst.msk [vmem:[%s5163_s5 + $0x28] sm:$0xff] %vm647_vm1, %v4380_v24  ;;  %1932 = vst.msk [vmem:[%s5163_s5 + $0x30] sm:$0xff] %vm647_vm1, %v4382_v40  ;;  %v2775_v20 = vmul.f32 %v4411_v12, %v4268_v10  ;;  %v2776_v62 = vmul.f32 %v4413_v14, %v4270_v13  ;;  %v2777_v2 = vmul.f32 %v4415_v37, %v4276_v22  ;;  %v2804_v3 = vsel %vm647_vm1, %v2765_v47, 0.0 }
 0x420   :  { %5207 = vst [vmem:[#allocation22_spill] sm:$0xff] %v4437_v16  ;;  %1933 = vst.msk [vmem:[%s5163_s5 + $0x38] sm:$0xff] %vm647_vm1, %v4386_v43  ;;  %v2778_v6 = vmul.f32 %v4437_v16, %v4278_v25  ;;  %v2805_v10 = vsel %vm647_vm1, %v2766_v48, 0.0  ;;  %v2814_v13 = vsel %vm647_vm1, %v2768_v50, 0.0  ;;  %v2831_v45 = vsel %vm647_vm1, %v2771_v51, 0.0 }
 0x421   :  { %1934 = vst.msk [vmem:[%s5163_s5 + $0x40] sm:$0xff] %vm647_vm1, %v4388_v33  ;;  %1935 = vst.msk [vmem:[%s5163_s5 + $0x48] sm:$0xff] %vm647_vm1, %v4390_v11  ;;  %v2832_v29 = vsel %vm647_vm1, %v2772_v56, 0.0  ;;  %v2840_v48 = vsel %vm647_vm1, %v2773_v57, 0.0  ;;  %v2850_v57 = vsel %vm647_vm1, %v2776_v62, 0.0 }
 0x422   :  { %1936 = vst.msk [vmem:[%s5163_s5 + $0x50] sm:$0xff] %vm647_vm1, %v4392_v27  ;;  %1937 = vst.msk [vmem:[%s5163_s5 + $0x58] sm:$0xff] %vm647_vm1, %v4409_v60 }
 0x423   :  { %1938 = vst.msk [vmem:[%s5163_s5 + $0x60] sm:$0xff] %vm647_vm1, %v4411_v12  ;;  %1939 = vst.msk [vmem:[%s5163_s5 + $0x68] sm:$0xff] %vm647_vm1, %v4413_v14  ;;  %v2813_v12 = vsel %vm647_vm1, %v2767_v49, 0.0  ;;  %v2806_v14 = vadd.f32 %v2805_v10, %v2804_v3  ;;  %v4531_v49 = vpop.permute.xlu0 %1996  ;;  %v4535_v3 = vpop.permute.xlu1 %2000 }
 0x424   :  { %1940 = vst.msk [vmem:[%s5163_s5 + $0x70] sm:$0xff] %vm647_vm1, %v4415_v37  ;;  %1941 = vst.msk [vmem:[%s5163_s5 + $0x78] sm:$0xff] %vm647_vm1, %v4437_v16  ;;  %v2815_v22 = vadd.f32 %v2814_v13, %v2813_v12  ;;  %v2823_v37 = vsel %vm647_vm1, %v2770_v21, 0.0  ;;  %v2849_v21 = vsel %vm647_vm1, %v2775_v20, 0.0 }
 0x425   :  { %5208 = vst [vmem:[#allocation23_spill] sm:$0xff] %v4506_v23  ;;  %5209 = vst [vmem:[#allocation24_spill] sm:$0xff] %v4516_v28  ;;  %v2797_v23 = vadd.f32 %v2796_v30, %v2795_v9  ;;  %v2822_v28 = vsel %vm647_vm1, %v2769_v38, 0.0  ;;  %v2807_v47 = vrot.slane %v2806_v14, 4  ;;  %v2833_v30 = vadd.f32 %v2832_v29, %v2831_v45 }
 0x426   :  { %v2824_v16 = vadd.f32 %v2823_v37, %v2822_v28  ;;  %v2816_v9 = vrot.slane %v2815_v22, 4  ;;  %v2841_v38 = vsel %vm647_vm1, %v2774_v61, 0.0  ;;  %v2858_v45 = vsel %vm647_vm1, %v2777_v2, 0.0 }
 0x427   :  { %v2798_v25 = vrot.slane %v2797_v23, 4  ;;  %v2808_v37 = vadd.f32 %v2807_v47, %v2806_v14  ;;  %v2834_v56 = vrot.slane %v2833_v30, 4  ;;  %v2842_v28 = vadd.f32 %v2841_v38, %v2840_v48  ;;  %v4542_v11 = vpop.permute.xlu1 %2088 }
 0x428   :  { %v2825_v12 = vrot.slane %v2824_v16, 4  ;;  %v2817_v51 = vadd.f32 %v2816_v9, %v2815_v22  ;;  %v2851_v27 = vadd.f32 %v2850_v57, %v2849_v21  ;;  %v2859_v14 = vsel %vm647_vm1, %v2778_v6, 0.0  ;;  %5211 = vst [vmem:[#allocation26_spill] sm:$0xff] %v4542_v11 }
 0x429   :  { %v2799_v50 = vadd.f32 %v2798_v25, %v2797_v23  ;;  %v2809_v23 = vrot.slane %v2808_v37, 2  ;;  %v2835_v61 = vadd.f32 %v2834_v56, %v2833_v30  ;;  %v2843_v29 = vrot.slane %v2842_v28, 4 }
 0x42a   :  { %v2826_v13 = vadd.f32 %v2825_v12, %v2824_v16  ;;  %v2818_v25 = vrot.slane %v2817_v51, 2  ;;  %v4540_v16 = vpop.permute.xlu0 %2084  ;;  %v2852_v2 = vrot.slane %v2851_v27, 4  ;;  %v2860_v38 = vadd.f32 %v2859_v14, %v2858_v45 }
 0x42b   :  { %v2800_v10 = vrot.slane %v2799_v50, 2  ;;  %v2810_v22 = vadd.f32 %v2809_v23, %v2808_v37  ;;  %v2836_v9 = vrot.slane %v2835_v61, 2  ;;  %v2844_v48 = vadd.f32 %v2843_v29, %v2842_v28  ;;  %5210 = vst [vmem:[#allocation25_spill] sm:$0xff] %v4540_v16  ;;  %v1814_v6 = vld [vmem:[%s5161_s3 + $0x80] sm:$0xff] }
 0x42c   :  { %v2827_v60 = vrot.slane %v2826_v13, 2  ;;  %v2819_v47 = vadd.f32 %v2818_v25, %v2817_v51  ;;  %v2853_v51 = vadd.f32 %v2852_v2, %v2851_v27  ;;  %v2861_v28 = vrot.slane %v2860_v38, 4  ;;  %v1816_v25 = vld [vmem:[%s5161_s3 + $0x90] sm:$0xff]  ;;  %v1818_v14 = vld [vmem:[%s5161_s3 + $0xa0] sm:$0xff] }
 0x42d   :  { %v2801_v20 = vadd.f32 %v2800_v10, %v2799_v50  ;;  %v2811_v30 = vrot.slane %v2810_v22, 1  ;;  %v2837_v50 = vadd.f32 %v2836_v9, %v2835_v61  ;;  %v2845_v10 = vrot.slane %v2844_v48, 2 }
 0x42e   :  { %v2828_v12 = vadd.f32 %v2827_v60, %v2826_v13  ;;  %v2820_v56 = vrot.slane %v2819_v47, 1  ;;  %v1815_v60 = vld [vmem:[%s5161_s3 + $0x88] sm:$0xff]  ;;  %v2854_v29 = vrot.slane %v2853_v51, 2  ;;  %v2862_v27 = vadd.f32 %v2861_v28, %v2860_v38  ;;  %v4577_v2 = vpop.permute.xlu0 %2007  ;;  %v4591_v28 = vpop.permute.xlu1 %2011 }
 0x42f   :  { %v2802_v62 = vrot.slane %v2801_v20, 1  ;;  %v4552_v13 = vadd.f32 %v2811_v30, %v2810_v22  ;;  %v2838_v45 = vrot.slane %v2837_v50, 1  ;;  %v2846_v23 = vadd.f32 %v2845_v10, %v2844_v48  ;;  %5217 = vst [vmem:[#allocation32_spill] sm:$0xff] %v4577_v2  ;;  %v1821_v10 = vld [vmem:[%s5161_s3 + $0xb8] sm:$0xff]  ;;  %5218 = vst [vmem:[#allocation33_spill] sm:$0xff] %v4591_v28 }
 0x430   :  { %v2829_v37 = vrot.slane %v2828_v12, 1  ;;  %v4554_v57 = vadd.f32 %v2820_v56, %v2819_v47  ;;  %v1846_v22 = vadd.f32 %v1814_v6, %v4338_v39  ;;  %v2855_v38 = vadd.f32 %v2854_v29, %v2853_v51  ;;  %v1822_v6 = vld [vmem:[%s5161_s3 + $0xc0] sm:$0xff]  ;;  %v1824_v29 = vld [vmem:[%s5161_s3 + $0xd0] sm:$0xff] }
 0x431   :  { %v4547_v21 = vadd.f32 %v2802_v62, %v2801_v20  ;;  %5213 = vst [vmem:[#allocation28_spill] sm:$0xff] %v4552_v13  ;;  %v1817_v20 = vld [vmem:[%s5161_s3 + $0x98] sm:$0xff]  ;;  %v4568_v47 = vadd.f32 %v2838_v45, %v2837_v50  ;;  %v2847_v9 = vrot.slane %v2846_v23, 1  ;;  %v1819_v62 = vld [vmem:[%s5161_s3 + $0xa8] sm:$0xff]  ;;  %v2863_v30 = vrot.slane %v2862_v27, 2  ;;  %v1820_v50 = vld [vmem:[%s5161_s3 + $0xb0] sm:$0xff] }
 0x432   :  { %5214 = vst [vmem:[#allocation29_spill] sm:$0xff] %v4554_v57  ;;  %v4559_v61 = vadd.f32 %v2829_v37, %v2828_v12  ;;  %v1847_v12 = vadd.f32 %v1815_v60, %v4314_v26  ;;  %v1848_v37 = vadd.f32 %v1816_v25, %v4338_v39  ;;  %v1823_v45 = vld [vmem:[%s5161_s3 + $0xc8] sm:$0xff]  ;;  %v1849_v25 = vadd.f32 %v1817_v20, %v4314_v26 }
 0x433   :  { %5212 = vst [vmem:[#allocation27_spill] sm:$0xff] %v4547_v21  ;;  %5216 = vst [vmem:[#allocation31_spill] sm:$0xff] %v4568_v47  ;;  %v2955_v48 = vsel %vm2326_vm10, %v4552_v13, %v4547_v21  ;;  %v4593_v51 = vadd.f32 %v2847_v9, %v2846_v23  ;;  %v1850_v23 = vadd.f32 %v1818_v14, %v4338_v39  ;;  %v2856_v9 = vrot.slane %v2855_v38, 1  ;;  %v1828_v13 = vld [vmem:[%s5161_s3 + $0xf0] sm:$0xff]  ;;  %v1829_v14 = vld [vmem:[%s5161_s3 + $0xf8] sm:$0xff] }
 0x434   :  { %5215 = vst [vmem:[#allocation30_spill] sm:$0xff] %v4559_v61  ;;  %v2956_v56 = vsel %vm2328_vm11, %v4554_v57, %v2955_v48  ;;  %v1825_v48 = vld [vmem:[%s5161_s3 + $0xd8] sm:$0xff]  ;;  %v2864_v21 = vadd.f32 %v2863_v30, %v2862_v27  ;;  %v1827_v57 = vld [vmem:[%s5161_s3 + $0xe8] sm:$0xff]  ;;  %v1851_v20 = vadd.f32 %v1819_v62, %v4314_v26  ;;  %v1852_v30 = vadd.f32 %v1820_v50, %v4338_v39  ;;  %v4636_v50 = vpop.permute.xlu0 %2095 }
 0x435   :  { %5219 = vst [vmem:[#allocation34_spill] sm:$0xff] %v4593_v51  ;;  %v2957_v60 = vsel %vm2330_vm12, %v4559_v61, %v2956_v56  ;;  %v1826_v61 = vld [vmem:[%s5161_s3 + $0xe0] sm:$0xff]  ;;  %v4628_v11 = vadd.f32 %v2856_v9, %v2855_v38  ;;  %v1855_v28 = vadd.f32 %v1823_v45, %v4314_v26  ;;  %v1856_v62 = vadd.f32 %v1824_v29, %v4338_v39  ;;  %v4645_v29 = vpop.permute.xlu1 %2099 }
 0x436   :  { %v2958_v56 = vsel %vm2332_vm13, %v4568_v47, %v2957_v60  ;;  %v1853_v60 = vadd.f32 %v1821_v10, %v4314_v26  ;;  %v1854_v47 = vadd.f32 %v1822_v6, %v4338_v39  ;;  %v2865_v16 = vrot.slane %v2864_v21, 1 }
 0x437   :  { %v2959_v27 = vsel %vm2334_vm14, %v4593_v51, %v2958_v56  ;;  %5220 = vst [vmem:[#allocation35_spill] sm:$0xff] %v4628_v11  ;;  %v1857_v33 = vadd.f32 %v1825_v48, %v4314_v26  ;;  %v1858_v56 = vadd.f32 %v1826_v61, %v4338_v39  ;;  %v1859_v51 = vadd.f32 %v1827_v57, %v4314_v26 }
 0x438   :  { %v1860_v2 = vadd.f32 %v1828_v13, %v4338_v39  ;;  %v4638_v10 = vadd.f32 %v2865_v16, %v2864_v21  ;;  %v2960_v38 = vsel %vm2336_vm15, %v4628_v11, %v2959_v27  ;;  %v1861_v6 = vadd.f32 %v1829_v14, %v4314_v26  ;;  %v4741_v27 = vpop.permute.xlu0 %2018 }
 0x439   :  { %v4643_v45 = vclamps-f32 %v1846_v22, 1.0  ;;  %v4647_v48 = vclamps-f32 %v1847_v12, 1.0  ;;  %v4649_v61 = vclamps-f32 %v1848_v37, 1.0  ;;  %v4651_v57 = vclamps-f32 %v1849_v25, 1.0 }
 0x43a   :  { %5221 = vst [vmem:[#allocation36_spill] sm:$0xff] %v4638_v10  ;;  %v4653_v39 = vclamps-f32 %v1850_v23, 1.0  ;;  %v2961_v16 = vsel %vm2338_vm0, %v4638_v10, %v2960_v38  ;;  %v4657_v21 = vclamps-f32 %v1851_v20, 1.0  ;;  %v4659_v13 = vclamps-f32 %v1852_v30, 1.0  ;;  %v4771_v30 = vpop.permute.xlu1 %2022 }
 0x43b   :  { %v4661_v26 = vclamps-f32 %v1853_v60, 1.0  ;;  %1942 = vst.msk [vmem:[%s5163_s5 + $0x80] sm:$0xff] %vm647_vm1, %v4643_v45  ;;  %v2971_v22 = vsel %vm647_vm1, %v2961_v16, 0.0  ;;  %v4669_v12 = vclamps-f32 %v1854_v47, 1.0  ;;  %v4671_v37 = vclamps-f32 %v1855_v28, 1.0  ;;  %1943 = vst.msk [vmem:[%s5163_s5 + $0x88] sm:$0xff] %vm647_vm1, %v4647_v48 }
 0x43c   :  { %v4673_v25 = vclamps-f32 %v1856_v62, 1.0  ;;  %1944 = vst.msk [vmem:[%s5163_s5 + $0x90] sm:$0xff] %vm647_vm1, %v4649_v61  ;;  %1945 = vst.msk [vmem:[%s5163_s5 + $0x98] sm:$0xff] %vm647_vm1, %v4651_v57  ;;  %2972 = vadd.xlane.f32.xlu0 %v2971_v22  ;;  %v4695_v47 = vclamps-f32 %v1857_v33, 1.0  ;;  %v4697_v28 = vclamps-f32 %v1858_v56, 1.0  ;;  %v4699_v23 = vclamps-f32 %v1859_v51, 1.0 }
 0x43d   :  { %1946 = vst.msk [vmem:[%s5163_s5 + $0xa0] sm:$0xff] %vm647_vm1, %v4653_v39  ;;  %v4701_v9 = vclamps-f32 %v1860_v2, 1.0  ;;  %1947 = vst.msk [vmem:[%s5163_s5 + $0xa8] sm:$0xff] %vm647_vm1, %v4657_v21  ;;  %v4718_v33 = vclamps-f32 %v1861_v6, 1.0  ;;  %v2779_v2 = vmul.f32 %v4643_v45, %v4228_v52  ;;  %v2780_v51 = vmul.f32 %v4647_v48, %v4230_v53 }
 0x43e   :  { %5222 = vst [vmem:[#allocation37_spill] sm:$0xff] %v4695_v47  ;;  %5223 = vst [vmem:[#allocation38_spill] sm:$0xff] %v4697_v28  ;;  %v2781_v20 = vmul.f32 %v4649_v61, %v4232_v54  ;;  %v2782_v52 = vmul.f32 %v4651_v57, %v4234_v55  ;;  %v2783_v53 = vmul.f32 %v4653_v39, %v4240_v58 }
 0x43f   :  { %5224 = vst [vmem:[#allocation39_spill] sm:$0xff] %v4699_v23  ;;  %5225 = vst [vmem:[#allocation40_spill] sm:$0xff] %v4701_v9  ;;  %v2784_v54 = vmul.f32 %v4657_v21, %v4242_v59  ;;  %v2785_v14 = vmul.f32 %v4659_v13, %v4248_v0  ;;  %v2786_v55 = vmul.f32 %v4661_v26, %v4250_v1  ;;  %v2868_v38 = vsel %vm647_vm1, %v2780_v51, 0.0 }
 0x440   :  { %1948 = vst.msk [vmem:[%s5163_s5 + $0xb0] sm:$0xff] %vm647_vm1, %v4659_v13  ;;  %1949 = vst.msk [vmem:[%s5163_s5 + $0xb8] sm:$0xff] %vm647_vm1, %v4661_v26  ;;  %v2787_v58 = vmul.f32 %v4669_v12, %v4256_v7  ;;  %v2788_v59 = vmul.f32 %v4671_v37, %v4258_v8  ;;  %v2789_v0 = vmul.f32 %v4673_v25, %v4264_v4  ;;  %v2867_v8 = vsel %vm647_vm1, %v2779_v2, 0.0 }
 0x441   :  { %5226 = vst [vmem:[#allocation41_spill] sm:$0xff] %v4718_v33  ;;  %1950 = vst.msk [vmem:[%s5163_s5 + $0xc0] sm:$0xff] %vm647_vm1, %v4669_v12  ;;  %v2790_v60 = vmul.f32 %v4695_v47, %v4266_v5  ;;  %v2791_v62 = vmul.f32 %v4697_v28, %v4272_v17  ;;  %v2792_v56 = vmul.f32 %v4699_v23, %v4274_v19  ;;  %v2876_v4 = vsel %vm647_vm1, %v2781_v20, 0.0 }
 0x442   :  { %1951 = vst.msk [vmem:[%s5163_s5 + $0xc8] sm:$0xff] %vm647_vm1, %v4671_v37  ;;  %1952 = vst.msk [vmem:[%s5163_s5 + $0xd0] sm:$0xff] %vm647_vm1, %v4673_v25  ;;  %v2793_v1 = vmul.f32 %v4701_v9, %v4280_v31  ;;  %v2794_v7 = vmul.f32 %v4718_v33, %v4282_v36  ;;  %v2869_v6 = vadd.f32 %v2868_v38, %v2867_v8  ;;  %v2877_v5 = vsel %vm647_vm1, %v2782_v52, 0.0  ;;  %v4804_v36 = vpop.permute.xlu0 %2106  ;;  %v4808_v8 = vpop.permute.xlu1 %2110 }
 0x443   :  { %1953 = vst.msk [vmem:[%s5163_s5 + $0xd8] sm:$0xff] %vm647_vm1, %v4695_v47  ;;  %1954 = vst.msk [vmem:[%s5163_s5 + $0xe0] sm:$0xff] %vm647_vm1, %v4697_v28  ;;  %v2885_v17 = vsel %vm647_vm1, %v2783_v53, 0.0  ;;  %v2886_v16 = vsel %vm647_vm1, %v2784_v54, 0.0  ;;  %v2878_v19 = vadd.f32 %v2877_v5, %v2876_v4  ;;  %v2894_v31 = vsel %vm647_vm1, %v2785_v14, 0.0 }
 0x444   :  { %1955 = vst.msk [vmem:[%s5163_s5 + $0xe8] sm:$0xff] %vm647_vm1, %v4699_v23  ;;  %1956 = vst.msk [vmem:[%s5163_s5 + $0xf0] sm:$0xff] %vm647_vm1, %v4701_v9  ;;  %v2887_v22 = vadd.f32 %v2886_v16, %v2885_v17  ;;  %v2895_v10 = vsel %vm647_vm1, %v2786_v55, 0.0  ;;  %v2870_v2 = vrot.slane %v2869_v6, 4  ;;  %v2903_v51 = vsel %vm647_vm1, %v2787_v58, 0.0 }
 0x445   :  { %1957 = vst.msk [vmem:[%s5163_s5 + $0xf8] sm:$0xff] %vm647_vm1, %v4718_v33  ;;  %v2896_v11 = vadd.f32 %v2895_v10, %v2894_v31  ;;  %v2904_v20 = vsel %vm647_vm1, %v2788_v59, 0.0  ;;  %5227 = vst [vmem:[#allocation42_spill] sm:$0xff] %v4808_v8  ;;  %v2879_v52 = vrot.slane %v2878_v19, 4  ;;  %v2912_v54 = vsel %vm647_vm1, %v2789_v0, 0.0  ;;  %s3633_s5 = smov 16  }
 0x446   :  { %v2888_v53 = vrot.slane %v2887_v22, 4  ;;  %v2905_v38 = vadd.f32 %v2904_v20, %v2903_v51  ;;  %v2871_v4 = vadd.f32 %v2870_v2, %v2869_v6  ;;  %v2913_v14 = vsel %vm647_vm1, %v2790_v60, 0.0  ;;  %v2030_v6 = vpop.permute.xlu0 %2029 }
 0x447   :  { %v2897_v5 = vrot.slane %v2896_v11, 4  ;;  %v2921_v55 = vsel %vm647_vm1, %v2791_v62, 0.0  ;;  %v2880_v17 = vadd.f32 %v2879_v52, %v2878_v19  ;;  %v2914_v31 = vadd.f32 %v2913_v14, %v2912_v54  ;;  %v2034_v19 = vpop.permute.xlu1 %2033 }
 0x448   :  { %v2889_v16 = vadd.f32 %v2888_v53, %v2887_v22  ;;  %v2906_v10 = vrot.slane %v2905_v38, 4  ;;  %v2872_v58 = vrot.slane %v2871_v4, 2  ;;  %v2922_v59 = vsel %vm647_vm1, %v2792_v56, 0.0 }
 0x449   :  { %v2898_v33 = vadd.f32 %v2897_v5, %v2896_v11  ;;  %v2930_v9 = vsel %vm647_vm1, %v2793_v1, 0.0  ;;  %v2881_v23 = vrot.slane %v2880_v17, 2  ;;  %v2915_v0 = vrot.slane %v2914_v31, 4 }
 0x44a   :  { %v2890_v51 = vrot.slane %v2889_v16, 2  ;;  %v2907_v20 = vadd.f32 %v2906_v10, %v2905_v38  ;;  %v2873_v2 = vadd.f32 %v2872_v58, %v2871_v4  ;;  %v2923_v60 = vadd.f32 %v2922_v59, %v2921_v55 }
 0x44b   :  { %v2899_v28 = vrot.slane %v2898_v33, 2  ;;  %v2931_v62 = vsel %vm647_vm1, %v2794_v7, 0.0  ;;  %v2882_v22 = vadd.f32 %v2881_v23, %v2880_v17  ;;  %v2916_v54 = vadd.f32 %v2915_v0, %v2914_v31 }
 0x44c   :  { %v2891_v52 = vadd.f32 %v2890_v51, %v2889_v16  ;;  %v2908_v53 = vrot.slane %v2907_v20, 2  ;;  %v2874_v11 = vrot.slane %v2873_v2, 1  ;;  %v2924_v56 = vrot.slane %v2923_v60, 4  ;;  %v4822_v16 = vpop.permute.xlu0 %2117  ;;  %v4828_v51 = vpop.permute.xlu1 %2121 }
 0x44d   :  { %v2900_v5 = vadd.f32 %v2899_v28, %v2898_v33  ;;  %v2932_v14 = vadd.f32 %v2931_v62, %v2930_v9  ;;  %v2883_v1 = vrot.slane %v2882_v22, 1  ;;  %v2917_v38 = vrot.slane %v2916_v54, 2 }
 0x44e   :  { %v2892_v47 = vrot.slane %v2891_v52, 1  ;;  %v2909_v8 = vadd.f32 %v2908_v53, %v2907_v20  ;;  %v4816_v10 = vadd.f32 %v2874_v11, %v2873_v2  ;;  %v2925_v58 = vadd.f32 %v2924_v56, %v2923_v60  ;;  %v5229_v56 = vld [vmem:[#allocation32_spill] sm:$0xff] }
 0x44f   :  { %v2901_v4 = vrot.slane %v2900_v5, 1  ;;  %v2933_v55 = vrot.slane %v2932_v14, 4  ;;  %v4818_v59 = vadd.f32 %v2883_v1, %v2882_v22  ;;  %v2918_v17 = vadd.f32 %v2917_v38, %v2916_v54 }
 0x450   :  { %v4820_v7 = vadd.f32 %v2892_v47, %v2891_v52  ;;  %v2910_v23 = vrot.slane %v2909_v8, 1  ;;  %v2926_v9 = vrot.slane %v2925_v58, 2  ;;  %v2134_v31 = vmul.f32 %v4368_v18, %v4284_v44  ;;  %v5228_v52 = vld [vmem:[#allocation10_spill] sm:$0xff] }
 0x451   :  { %v4824_v28 = vadd.f32 %v2901_v4, %v2900_v5  ;;  %v2934_v33 = vadd.f32 %v2933_v55, %v2932_v14  ;;  %v2919_v0 = vrot.slane %v2918_v17, 1  ;;  %v2962_v47 = vsel %vm2326_vm10, %v4818_v59, %v4816_v10  ;;  %v5230_v14 = vld [vmem:[#allocation15_spill] sm:$0xff]  ;;  %v5231_v4 = vld [vmem:[#allocation33_spill] sm:$0xff] }
 0x452   :  { %v4830_v20 = vadd.f32 %v2910_v23, %v2909_v8  ;;  %v2135_v2 = vmul.f32 %v4370_v32, %v4286_v46  ;;  %v2927_v60 = vadd.f32 %v2926_v9, %v2925_v58  ;;  %v2963_v22 = vsel %vm2328_vm11, %v4820_v7, %v2962_v47  ;;  %v5232_v58 = vld [vmem:[#allocation16_spill] sm:$0xff]  ;;  %v2045_v23 = vpop.permute.xlu1 %2044 }
 0x453   :  { %v2935_v62 = vrot.slane %v2934_v33, 2  ;;  %v2136_v44 = vmul.f32 %v4372_v34, %v4288_v15  ;;  %v4841_v18 = vadd.f32 %v2919_v0, %v2918_v17  ;;  %v2964_v8 = vsel %vm2330_vm12, %v4824_v28, %v2963_v22  ;;  %v5234_v17 = vld [vmem:[#allocation18_spill] sm:$0xff] }
 0x454   :  { %v2137_v53 = vmul.f32 %v4376_v41, %v5228_v52  ;;  %v2138_v54 = vmul.f32 %v4378_v63, %v4374_v42  ;;  %v2928_v46 = vrot.slane %v2927_v60, 1  ;;  %v2965_v11 = vsel %vm2332_vm13, %v4830_v20, %v2964_v8  ;;  %v2041_v63 = vpop.permute.xlu0 %2040 }
 0x455   :  { %v2936_v32 = vadd.f32 %v2935_v62, %v2934_v33  ;;  %v2139_v5 = vmul.f32 %v4380_v24, %v4384_v35  ;;  %v2966_v15 = vsel %vm2334_vm14, %v4841_v18, %v2965_v11  ;;  %v2140_v34 = vmul.f32 %v4382_v40, %v4531_v49  ;;  %v5233_v24 = vld [vmem:[#allocation17_spill] sm:$0xff]  ;;  %v5235_v49 = vld [vmem:[#allocation19_spill] sm:$0xff]  ;;  %v5238_v62 = vld [vmem:[#allocation22_spill] sm:$0xff] }
 0x456   :  { %v2141_v41 = vmul.f32 %v4386_v43, %v4535_v3  ;;  %v2142_v42 = vmul.f32 %v5230_v14, %v5229_v56  ;;  %v4861_v1 = vadd.f32 %v2928_v46, %v2927_v60  ;;  %v2143_v55 = vmul.f32 %v5232_v58, %v5231_v4  ;;  %v5236_v43 = vld [vmem:[#allocation20_spill] sm:$0xff]  ;;  %v5237_v33 = vld [vmem:[#allocation21_spill] sm:$0xff] }
 0x457   :  { %v2937_v38 = vrot.slane %v2936_v32, 1  ;;  %v2144_v35 = vmul.f32 %v5233_v24, %v4741_v27  ;;  %v2145_v40 = vmul.f32 %v5234_v17, %v4771_v30  ;;  %v2146_v9 = vmul.f32 %v5235_v49, %v2030_v6 }
 0x458   :  { %v2147_v3 = vmul.f32 %v5236_v43, %v2034_v19  ;;  %v2148_v0 = vmul.f32 %v5237_v33, %v2041_v63  ;;  %v2967_v60 = vsel %vm2336_vm15, %v4861_v1, %v2966_v15  ;;  %v2149_v22 = vmul.f32 %v5238_v62, %v2045_v23 }
 0x459   :  { %v4872_v47 = vadd.f32 %v2937_v38, %v2936_v32  ;;  %v2166_v8 = vsel %vm647_vm1, %v2134_v31, 0.0  ;;  %v2167_v27 = vsel %vm647_vm1, %v2135_v2, 0.0  ;;  %v2175_v52 = vsel %vm647_vm1, %v2136_v44, 0.0 }
 0x45a   :  { %v2176_v30 = vsel %vm647_vm1, %v2137_v53, 0.0  ;;  %v2184_v6 = vsel %vm647_vm1, %v2138_v54, 0.0  ;;  %v2168_v46 = vadd.f32 %v2167_v27, %v2166_v8  ;;  %v2185_v11 = vsel %vm647_vm1, %v2139_v5, 0.0 }
 0x45b   :  { %v2968_v19 = vsel %vm2338_vm0, %v4872_v47, %v2967_v60  ;;  %v2177_v32 = vadd.f32 %v2176_v30, %v2175_v52  ;;  %v2186_v56 = vadd.f32 %v2185_v11, %v2184_v6  ;;  %v2193_v31 = vsel %vm647_vm1, %v2140_v34, 0.0 }
 0x45c   :  { %v2974_v15 = vsel %vm647_vm1, %v2968_v19, 0.0  ;;  %v2194_v2 = vsel %vm647_vm1, %v2141_v41, 0.0  ;;  %v2169_v44 = vrot.slane %v2168_v46, 4  ;;  %v2202_v54 = vsel %vm647_vm1, %v2142_v42, 0.0 }
 0x45d   :  { %2975 = vadd.xlane.f32.xlu1 %v2974_v15  ;;  %v2178_v14 = vrot.slane %v2177_v32, 4  ;;  %v2195_v53 = vadd.f32 %v2194_v2, %v2193_v31  ;;  %v2187_v63 = vrot.slane %v2186_v56, 4  ;;  %v2203_v38 = vsel %vm647_vm1, %v2143_v55, 0.0 }
 0x45e   :  { %v2211_v4 = vsel %vm647_vm1, %v2144_v35, 0.0  ;;  %v2212_v5 = vsel %vm647_vm1, %v2145_v40, 0.0  ;;  %v2170_v58 = vadd.f32 %v2169_v44, %v2168_v46  ;;  %v2204_v17 = vadd.f32 %v2203_v38, %v2202_v54 }
 0x45f   :  { %v2179_v24 = vadd.f32 %v2178_v14, %v2177_v32  ;;  %v2196_v23 = vrot.slane %v2195_v53, 4  ;;  %v2188_v34 = vadd.f32 %v2187_v63, %v2186_v56  ;;  %v2213_v49 = vadd.f32 %v2212_v5, %v2211_v4 }
 0x460   :  { %v2220_v41 = vsel %vm647_vm1, %v2146_v9, 0.0  ;;  %v2221_v43 = vsel %vm647_vm1, %v2147_v3, 0.0  ;;  %v2171_v33 = vrot.slane %v2170_v58, 2  ;;  %v2205_v62 = vrot.slane %v2204_v17, 4 }
 0x461   :  { %v2180_v60 = vrot.slane %v2179_v24, 2  ;;  %v2197_v42 = vadd.f32 %v2196_v23, %v2195_v53  ;;  %v2189_v8 = vrot.slane %v2188_v34, 2  ;;  %v2214_v55 = vrot.slane %v2213_v49, 4 }
 0x462   :  { %v2222_v27 = vadd.f32 %v2221_v43, %v2220_v41  ;;  %v2229_v35 = vsel %vm647_vm1, %v2148_v0, 0.0  ;;  %v2172_v40 = vadd.f32 %v2171_v33, %v2170_v58  ;;  %v2206_v6 = vadd.f32 %v2205_v62, %v2204_v17  ;;  %v5239_v17 = vld [vmem:[#allocation11_spill] sm:$0xff]  ;;  %v5240_v62 = vld [vmem:[#allocation12_spill] sm:$0xff] }
 0x463   :  { %v2181_v52 = vadd.f32 %v2180_v60, %v2179_v24  ;;  %v2198_v30 = vrot.slane %v2197_v42, 2  ;;  %v2190_v19 = vadd.f32 %v2189_v8, %v2188_v34  ;;  %v2215_v46 = vadd.f32 %v2214_v55, %v2213_v49  ;;  %v5241_v55 = vld [vmem:[#allocation13_spill] sm:$0xff] }
 0x464   :  { %v2223_v32 = vrot.slane %v2222_v27, 4  ;;  %v2230_v9 = vsel %vm647_vm1, %v2149_v22, 0.0  ;;  %v2173_v11 = vrot.slane %v2172_v40, 1  ;;  %v2207_v56 = vrot.slane %v2206_v6, 2 }
 0x465   :  { %v2182_v3 = vrot.slane %v2181_v52, 1  ;;  %v2199_v15 = vadd.f32 %v2198_v30, %v2197_v42  ;;  %v2191_v31 = vrot.slane %v2190_v19, 1  ;;  %v2216_v2 = vrot.slane %v2215_v46, 2 }
 0x466   :  { %v2224_v44 = vadd.f32 %v2223_v32, %v2222_v27  ;;  %v2231_v14 = vadd.f32 %v2230_v9, %v2229_v35  ;;  %v4896_v53 = vadd.f32 %v2173_v11, %v2172_v40  ;;  %v2208_v63 = vadd.f32 %v2207_v56, %v2206_v6  ;;  %v5244_v32 = vld [vmem:[#allocation24_spill] sm:$0xff]  ;;  %v5246_v56 = vld [vmem:[#allocation26_spill] sm:$0xff] }
 0x467   :  { %v4898_v0 = vadd.f32 %v2182_v3, %v2181_v52  ;;  %v2200_v54 = vrot.slane %v2199_v15, 1  ;;  %v4900_v38 = vadd.f32 %v2191_v31, %v2190_v19  ;;  %v2217_v4 = vadd.f32 %v2216_v2, %v2215_v46  ;;  %v5242_v52 = vld [vmem:[#allocation14_spill] sm:$0xff]  ;;  %v5243_v19 = vld [vmem:[#allocation23_spill] sm:$0xff] }
 0x468   :  { %v2225_v5 = vrot.slane %v2224_v44, 2  ;;  %v2232_v58 = vrot.slane %v2231_v14, 4  ;;  %v2209_v24 = vrot.slane %v2208_v63, 1  ;;  %v2150_v34 = vmul.f32 %v4643_v45, %v5239_v17  ;;  %v5247_v2 = vld [vmem:[#allocation42_spill] sm:$0xff] }
 0x469   :  { %v4902_v22 = vadd.f32 %v2200_v54, %v2199_v15  ;;  %v2327_v23 = vsel %vm2326_vm10, %v4898_v0, %v4896_v53  ;;  %v2218_v49 = vrot.slane %v2217_v4, 1  ;;  %v2151_v8 = vmul.f32 %v4647_v48, %v5240_v62  ;;  %v5245_v48 = vld [vmem:[#allocation25_spill] sm:$0xff]  ;;  %v2133_v54 = vpop.permute.xlu1 %2132 }
 0x46a   :  { %v2226_v41 = vadd.f32 %v2225_v5, %v2224_v44  ;;  %v2233_v43 = vadd.f32 %v2232_v58, %v2231_v14  ;;  %v2329_v33 = vsel %vm2328_vm11, %v4900_v38, %v2327_v23  ;;  %v4911_v60 = vadd.f32 %v2209_v24, %v2208_v63  ;;  %v2129_v14 = vpop.permute.xlu0 %2128  ;;  %v5251_v58 = vld [vmem:[#allocation40_spill] sm:$0xff] }
 0x46b   :  { %v2331_v42 = vsel %vm2330_vm12, %v4902_v22, %v2329_v33  ;;  %v2152_v27 = vmul.f32 %v4649_v61, %v5241_v55  ;;  %v4919_v35 = vadd.f32 %v2218_v49, %v2217_v4  ;;  %v2153_v30 = vmul.f32 %v4651_v57, %v5242_v52 }
 0x46c   :  { %v2227_v45 = vrot.slane %v2226_v41, 1  ;;  %v2234_v40 = vrot.slane %v2233_v43, 2  ;;  %v2333_v6 = vsel %vm2332_vm13, %v4911_v60, %v2331_v42  ;;  %v2154_v46 = vmul.f32 %v4653_v39, %v5243_v19 }
 0x46d   :  { %v2155_v9 = vmul.f32 %v4657_v21, %v5244_v32  ;;  %v2156_v11 = vmul.f32 %v4659_v13, %v5245_v48  ;;  %v2335_v15 = vsel %vm2334_vm14, %v4919_v35, %v2333_v6  ;;  %v2157_v57 = vmul.f32 %v4661_v26, %v5246_v56  ;;  %v5248_v13 = vld [vmem:[#allocation37_spill] sm:$0xff]  ;;  %v5249_v26 = vld [vmem:[#allocation38_spill] sm:$0xff] }
 0x46e   :  { %v4931_v61 = vadd.f32 %v2227_v45, %v2226_v41  ;;  %v2235_v3 = vadd.f32 %v2234_v40, %v2233_v43  ;;  %v2158_v31 = vmul.f32 %v4669_v12, %v4636_v50  ;;  %v2159_v39 = vmul.f32 %v4671_v37, %v4645_v29  ;;  %v5250_v50 = vld [vmem:[#allocation39_spill] sm:$0xff]  ;;  %v5252_v37 = vld [vmem:[#allocation41_spill] sm:$0xff] }
 0x46f   :  { %v2160_v21 = vmul.f32 %v4673_v25, %v4804_v36  ;;  %v2161_v44 = vmul.f32 %v5248_v13, %v5247_v2  ;;  %v2162_v5 = vmul.f32 %v5249_v26, %v4822_v16  ;;  %v2163_v12 = vmul.f32 %v5250_v50, %v4828_v51 }
 0x470   :  { %v2236_v63 = vrot.slane %v2235_v3, 1  ;;  %v2337_v4 = vsel %vm2336_vm15, %v4931_v61, %v2335_v15  ;;  %v2164_v29 = vmul.f32 %v5251_v58, %v2129_v14  ;;  %v2165_v24 = vmul.f32 %v5252_v37, %v2133_v54 }
 0x471   :  { %v2238_v25 = vsel %vm647_vm1, %v2150_v34, 0.0  ;;  %v2239_v36 = vsel %vm647_vm1, %v2151_v8, 0.0  ;;  %v2247_v49 = vsel %vm647_vm1, %v2152_v27, 0.0  ;;  %v2248_v41 = vsel %vm647_vm1, %v2153_v30, 0.0 }
 0x472   :  { %v4955_v23 = vadd.f32 %v2236_v63, %v2235_v3  ;;  %v2240_v17 = vadd.f32 %v2239_v36, %v2238_v25  ;;  %v2249_v43 = vadd.f32 %v2248_v41, %v2247_v49  ;;  %v2256_v16 = vsel %vm647_vm1, %v2154_v46, 0.0 }
 0x473   :  { %v2257_v51 = vsel %vm647_vm1, %v2155_v9, 0.0  ;;  %v2265_v33 = vsel %vm647_vm1, %v2156_v11, 0.0  ;;  %v2266_v8 = vsel %vm647_vm1, %v2157_v57, 0.0  ;;  %v2274_v40 = vsel %vm647_vm1, %v2158_v31, 0.0 }
 0x474   :  { %v2339_v42 = vsel %vm2338_vm0, %v4955_v23, %v2337_v4  ;;  %v2241_v34 = vrot.slane %v2240_v17, 4  ;;  %v2258_v62 = vadd.f32 %v2257_v51, %v2256_v16  ;;  %v2250_v45 = vrot.slane %v2249_v43, 4 }
 0x475   :  { %v2349_v55 = vsel %vm647_vm1, %v2339_v42, 0.0  ;;  %v2267_v27 = vadd.f32 %v2266_v8, %v2265_v33  ;;  %v2275_v6 = vsel %vm647_vm1, %v2159_v39, 0.0  ;;  %v2283_v19 = vsel %vm647_vm1, %v2160_v21, 0.0 }
 0x476   :  { %2350 = vadd.xlane.f32.xlu0 %v2349_v55  ;;  %v2242_v52 = vadd.f32 %v2241_v34, %v2240_v17  ;;  %v2259_v30 = vrot.slane %v2258_v62, 4  ;;  %v2251_v46 = vadd.f32 %v2250_v45, %v2249_v43  ;;  %v2276_v9 = vadd.f32 %v2275_v6, %v2274_v40 }
 0x477   :  { %v2268_v32 = vrot.slane %v2267_v27, 4  ;;  %v2284_v48 = vsel %vm647_vm1, %v2161_v44, 0.0  ;;  %v2292_v56 = vsel %vm647_vm1, %v2162_v5, 0.0  ;;  %v2293_v13 = vsel %vm647_vm1, %v2163_v12, 0.0 }
 0x478   :  { %v2243_v11 = vrot.slane %v2242_v52, 2  ;;  %v2260_v3 = vadd.f32 %v2259_v30, %v2258_v62  ;;  %v2285_v15 = vadd.f32 %v2284_v48, %v2283_v19  ;;  %v2252_v57 = vrot.slane %v2251_v46, 2 }
 0x479   :  { %v2269_v2 = vadd.f32 %v2268_v32, %v2267_v27  ;;  %v2277_v31 = vrot.slane %v2276_v9, 4  ;;  %v2294_v63 = vadd.f32 %v2293_v13, %v2292_v56  ;;  %v2301_v50 = vsel %vm647_vm1, %v2164_v29, 0.0 }
 0x47a   :  { %v2244_v14 = vadd.f32 %v2243_v11, %v2242_v52  ;;  %v2261_v54 = vrot.slane %v2260_v3, 2  ;;  %v2286_v39 = vrot.slane %v2285_v15, 4  ;;  %v2253_v21 = vadd.f32 %v2252_v57, %v2251_v46 }
 0x47b   :  { %v2270_v4 = vrot.slane %v2269_v2, 2  ;;  %v2278_v26 = vadd.f32 %v2277_v31, %v2276_v9  ;;  %v2295_v25 = vrot.slane %v2294_v63, 4  ;;  %v2302_v49 = vsel %vm647_vm1, %v2165_v24, 0.0 }
 0x47c   :  { %v2245_v44 = vrot.slane %v2244_v14, 1  ;;  %v2262_v58 = vadd.f32 %v2261_v54, %v2260_v3  ;;  %v2287_v37 = vadd.f32 %v2286_v39, %v2285_v15  ;;  %v2254_v36 = vrot.slane %v2253_v21, 1 }
 0x47d   :  { %v2271_v5 = vadd.f32 %v2270_v4, %v2269_v2  ;;  %v2279_v17 = vrot.slane %v2278_v26, 2  ;;  %v2296_v16 = vadd.f32 %v2295_v25, %v2294_v63  ;;  %v2303_v34 = vadd.f32 %v2302_v49, %v2301_v50 }
 0x47e   :  { %v4974_v41 = vadd.f32 %v2245_v44, %v2244_v14  ;;  %v2263_v12 = vrot.slane %v2262_v58, 1  ;;  %v2288_v43 = vrot.slane %v2287_v37, 2  ;;  %v4976_v51 = vadd.f32 %v2254_v36, %v2253_v21  ;;  %v5254_v36 = vld [vmem:[#allocation29_spill] sm:$0xff] }
 0x47f   :  { %v2272_v33 = vrot.slane %v2271_v5, 1  ;;  %v2280_v42 = vadd.f32 %v2279_v17, %v2278_v26  ;;  %v2297_v8 = vrot.slane %v2296_v16, 2  ;;  %v2304_v27 = vrot.slane %v2303_v34, 4  ;;  %v5255_v17 = vld [vmem:[#allocation30_spill] sm:$0xff] }
 0x480   :  { %v4978_v29 = vadd.f32 %v2263_v12, %v2262_v58  ;;  %v2289_v62 = vadd.f32 %v2288_v43, %v2287_v37  ;;  %v2340_v24 = vsel %vm2326_vm10, %v4976_v51, %v4974_v41  ;;  %v5253_v37 = vld [vmem:[#allocation28_spill] sm:$0xff]  ;;  %v5256_v12 = vld [vmem:[#allocation31_spill] sm:$0xff] }
 0x481   :  { %v4980_v55 = vadd.f32 %v2272_v33, %v2271_v5  ;;  %v2281_v45 = vrot.slane %v2280_v42, 1  ;;  %v2298_v52 = vadd.f32 %v2297_v8, %v2296_v16  ;;  %v2305_v19 = vadd.f32 %v2304_v27, %v2303_v34  ;;  %v5257_v16 = vld [vmem:[#allocation27_spill] sm:$0xff] }
 0x482   :  { %v2290_v40 = vrot.slane %v2289_v62, 1  ;;  %v2341_v30 = vsel %vm2328_vm11, %v4978_v29, %v2340_v24  ;;  %v5260_v24 = vld [vmem:[#allocation36_spill] sm:$0xff] }
 0x483   :  { %v4987_v6 = vadd.f32 %v2281_v45, %v2280_v42  ;;  %v2342_v46 = vsel %vm2330_vm12, %v4980_v55, %v2341_v30  ;;  %v2299_v32 = vrot.slane %v2298_v52, 1  ;;  %v2306_v48 = vrot.slane %v2305_v19, 2  ;;  %v5258_v42 = vld [vmem:[#allocation34_spill] sm:$0xff]  ;;  %v5259_v45 = vld [vmem:[#allocation35_spill] sm:$0xff] }
 0x484   :  { %v4991_v9 = vadd.f32 %v2290_v40, %v2289_v62 }
 0x485   :  { %v2343_v11 = vsel %vm2332_vm13, %v4987_v6, %v2342_v46  ;;  %v2307_v3 = vadd.f32 %v2306_v48, %v2305_v19  ;;  %v4997_v56 = vadd.f32 %v2299_v32, %v2298_v52 }
 0x486   :  { %v2344_v15 = vsel %vm2334_vm14, %v4991_v9, %v2343_v11 }
 0x487   :  { %v2308_v57 = vrot.slane %v2307_v3, 1  ;;  %v2345_v2 = vsel %vm2336_vm15, %v4997_v56, %v2344_v15 }
 0x489   :  { %v5001_v31 = vadd.f32 %v2308_v57, %v2307_v3 }
 0x48b   :  { %v2346_v13 = vsel %vm2338_vm0, %v5001_v31, %v2345_v2 }
 0x48c   :  { %v2352_v14 = vsel %vm647_vm1, %v2346_v13, 0.0  ;;  %vm2453_vm1 = vcmask 122880  }
 0x48d   :  { %2353 = vadd.xlane.f32.xlu0 %v2352_v14 }
 0x4c5   :  { %v2973_v54 = vpop.xlane.xlu0 %2972 }
 0x4c6   :  { %v2977_v39 = vmul.f32 0.0625, %v2973_v54 }
 0x4c8   :  { %v2981_v63 = vrot.slane %v2977_v39, 1  ;;  %v2982_v21 = vrot.slane %v2977_v39, 2  ;;  %v2983_v4 = vrot.slane %v2977_v39, 3  ;;  %v2984_v26 = vrot.slane %v2977_v39, 4 }
 0x4c9   :  { %v2985_v50 = vrot.slane %v2977_v39, 5  ;;  %v2986_v44 = vrot.slane %v2977_v39, 6  ;;  %v2987_v58 = vrot.slane %v2977_v39, 7  ;;  %v3011_v33 = vsub.f32 %v5257_v16, %v2977_v39 }
 0x4ca   :  { %v3012_v25 = vsub.f32 %v5253_v37, %v2981_v63  ;;  %v3013_v5 = vsub.f32 %v5254_v36, %v2982_v21  ;;  %v3014_v49 = vsub.f32 %v5255_v17, %v2983_v4  ;;  %v3015_v43 = vsub.f32 %v5256_v12, %v2984_v26 }
 0x4cb   :  { %v3016_v34 = vsub.f32 %v5258_v42, %v2985_v50  ;;  %v3017_v27 = vsub.f32 %v5259_v45, %v2986_v44  ;;  %v3018_v40 = vsub.f32 %v5260_v24, %v2987_v58 }
 0x4cc   :  { %v3043_v62 = vrot.slane %v3012_v25, 7  ;;  %v3045_v8 = vrot.slane %v3013_v5, 6  ;;  %v3047_v30 = vrot.slane %v3014_v49, 5  ;;  %v3049_v46 = vrot.slane %v3015_v43, 4 }
 0x4cd   :  { %v3051_v48 = vrot.slane %v3016_v34, 3  ;;  %v3053_v3 = vrot.slane %v3017_v27, 2  ;;  %v3055_v57 = vrot.slane %v3018_v40, 1 }
 0x4ce   :  { %v3044_v52 = vsel %vm2326_vm10, %v3043_v62, %v3011_v33 }
 0x4cf   :  { %v3046_v19 = vsel %vm2328_vm11, %v3045_v8, %v3044_v52 }
 0x4d0   :  { %v3048_v32 = vsel %vm2330_vm12, %v3047_v30, %v3046_v19 }
 0x4d1   :  { %v3050_v11 = vsel %vm2332_vm13, %v3049_v46, %v3048_v32 }
 0x4d2   :  { %v3052_v15 = vsel %vm2334_vm14, %v3051_v48, %v3050_v11 }
 0x4d3   :  { %v3054_v2 = vsel %vm2336_vm15, %v3053_v3, %v3052_v15  ;;  %v3634_v15 = vmov 1983009808  }
 0x4d4   :  { %v3056_v13 = vsel %vm2338_vm0, %v3055_v57, %v3054_v2  ;;  %v2457_v57 = vunpack.c.l.s4 %v3634_v15 }
 0x4d5   :  { %3071 = vrot.lane.b32.xlu1 %v3056_v13, %s3633_s5 }
 0x4e6   :  { %v2976_v14 = vpop.xlane.xlu1 %2975 }
 0x4e7   :  { %v2978_v54 = vmul.f32 0.0625, %v2976_v14 }
 0x4e9   :  { %v2988_v39 = vrot.slane %v2978_v54, 1  ;;  %v2989_v63 = vrot.slane %v2978_v54, 2  ;;  %v2990_v21 = vrot.slane %v2978_v54, 3  ;;  %v2991_v4 = vrot.slane %v2978_v54, 4 }
 0x4ea   :  { %v2992_v26 = vrot.slane %v2978_v54, 5  ;;  %v2993_v50 = vrot.slane %v2978_v54, 6  ;;  %v2994_v44 = vrot.slane %v2978_v54, 7  ;;  %v3019_v5 = vsub.f32 %v4816_v10, %v2978_v54 }
 0x4eb   :  { %v3020_v58 = vsub.f32 %v4818_v59, %v2988_v39  ;;  %v3021_v37 = vsub.f32 %v4820_v7, %v2989_v63  ;;  %v3022_v25 = vsub.f32 %v4824_v28, %v2990_v21  ;;  %v3023_v36 = vsub.f32 %v4830_v20, %v2991_v4 }
 0x4ec   :  { %v3024_v17 = vsub.f32 %v4841_v18, %v2992_v26  ;;  %v3025_v43 = vsub.f32 %v4861_v1, %v2993_v50  ;;  %v3026_v16 = vsub.f32 %v4872_v47, %v2994_v44  ;;  %v2458_v4 = vunpack.c.0.s8 %v2457_v57 }
 0x4ed   :  { %v3057_v49 = vrot.slane %v3020_v58, 7  ;;  %v3059_v12 = vrot.slane %v3021_v37, 6  ;;  %v3061_v42 = vrot.slane %v3022_v25, 5  ;;  %v3063_v7 = vrot.slane %v3023_v36, 4  ;;  %v5261_v58 = vld [vmem:[#allocation9_spill] sm:$0xff]  ;;  %v5262_v25 = vld [vmem:[#allocation7_spill] sm:$0xff] }
 0x4ee   :  { %v3065_v34 = vrot.slane %v3024_v17, 3  ;;  %v3067_v10 = vrot.slane %v3025_v43, 2  ;;  %v3069_v62 = vrot.slane %v3026_v16, 1 }
 0x4ef   :  { %v3058_v33 = vsel %vm2326_vm10, %v3057_v49, %v3019_v5 }
 0x4f0   :  { %v3060_v59 = vsel %vm2328_vm11, %v3059_v12, %v3058_v33 }
 0x4f1   :  { %v3062_v28 = vsel %vm2330_vm12, %v3061_v42, %v3060_v59 }
 0x4f2   :  { %v3064_v20 = vsel %vm2332_vm13, %v3063_v7, %v3062_v28 }
 0x4f3   :  { %v3066_v18 = vsel %vm2334_vm14, %v3065_v34, %v3064_v20 }
 0x4f4   :  { %v3068_v8 = vsel %vm2336_vm15, %v3067_v10, %v3066_v18 }
 0x4f5   :  { %v3070_v1 = vsel %vm2338_vm0, %v3069_v62, %v3068_v8 }
 0x4f6   :  { %3073 = vrot.lane.b32.xlu0 %v3070_v1, %s3633_s5 }
 0x4ff   :  { %v2351_v47 = vpop.xlane.xlu0 %2350 }
 0x500   :  { %v2355_v45 = vmul.f32 0.0625, %v2351_v47 }
 0x502   :  { %v2359_v27 = vrot.slane %v2355_v45, 1  ;;  %v2360_v24 = vrot.slane %v2355_v45, 2  ;;  %v2361_v40 = vrot.slane %v2355_v45, 3  ;;  %v2362_v52 = vrot.slane %v2355_v45, 4 }
 0x503   :  { %v2363_v30 = vrot.slane %v2355_v45, 5  ;;  %v2364_v19 = vrot.slane %v2355_v45, 6  ;;  %v2365_v46 = vrot.slane %v2355_v45, 7  ;;  %v2389_v2 = vsub.f32 %v4896_v53, %v2355_v45 }
 0x504   :  { %v2390_v32 = vsub.f32 %v4898_v0, %v2359_v27  ;;  %v2391_v48 = vsub.f32 %v4900_v38, %v2360_v24  ;;  %v2392_v11 = vsub.f32 %v4902_v22, %v2361_v40  ;;  %v2393_v3 = vsub.f32 %v4911_v60, %v2362_v52 }
 0x505   :  { %v2394_v13 = vsub.f32 %v4919_v35, %v2363_v30  ;;  %v2395_v39 = vsub.f32 %v4931_v61, %v2364_v19  ;;  %v2396_v63 = vsub.f32 %v4955_v23, %v2365_v46  ;;  %v5053_v23 = vsub.s32 %v2458_v4, %v5261_v58  ;;  %v5265_v58 = vld [vmem:[#allocation6_spill] sm:$0xff] }
 0x506   :  { %v2421_v14 = vrot.slane %v2390_v32, 7  ;;  %v2423_v54 = vrot.slane %v2391_v48, 6  ;;  %v2425_v21 = vrot.slane %v2392_v11, 5  ;;  %v2427_v22 = vrot.slane %v2393_v3, 4 }
 0x507   :  { %v2429_v26 = vrot.slane %v2394_v13, 3  ;;  %v2431_v50 = vrot.slane %v2395_v39, 2  ;;  %v2433_v44 = vrot.slane %v2396_v63, 1 }
 0x508   :  { %v2422_v0 = vsel %vm2326_vm10, %v2421_v14, %v2389_v2 }
 0x509   :  { %v2424_v38 = vsel %vm2328_vm11, %v2423_v54, %v2422_v0 }
 0x50a   :  { %v2426_v60 = vsel %vm2330_vm12, %v2425_v21, %v2424_v38 }
 0x50b   :  { %v2428_v53 = vsel %vm2332_vm13, %v2427_v22, %v2426_v60  ;;  %v5264_v60 = vld [vmem:[#allocation5_spill] sm:$0xff] }
 0x50c   :  { %v2430_v35 = vsel %vm2334_vm14, %v2429_v26, %v2428_v53 }
 0x50d   :  { %v2432_v61 = vsel %vm2336_vm15, %v2431_v50, %v2430_v35 }
 0x50e   :  { %v2434_v37 = vsel %vm2338_vm0, %v2433_v44, %v2432_v61 }
 0x50f   :  { %v2451_v36 = vadd.f32 %v2434_v37, %v5262_v25 }
 0x511   :  { %v2462_v5 = vrot.slane %v2451_v36, %v5053_v23  ;;  %2454 = vst.msk [vmem:[#allocation2] sm:$0x1] %vm2453_vm1, %v2451_v36  ;;  %v2483_v49 = vcombine.high %v2451_v36, %v2451_v36 }
 0x513   :  { %v3241_v17 = vrot.slane %v2462_v5, 9  ;;  %v2470_v12 = vcombine.high %v2462_v5, %v2462_v5  ;;  %v2490_v33 = vrot.slane %v2483_v49, %v5053_v23 }
 0x515   :  { %2465 = vrot.lane.b32.xlu1 %v3241_v17, %s3633_s5  ;;  %v2503_v14 = vcombine.high %v2490_v33, %v2490_v33  ;;  %v3242_v54 = vrot.slane %v2470_v12, 9  ;;  %v3243_v63 = vrot.slane %v2490_v33, 9 }
 0x516   :  { %v2354_v43 = vpop.xlane.xlu0 %2353 }
 0x517   :  { %v2356_v16 = vmul.f32 0.0625, %v2354_v43  ;;  %v3244_v22 = vrot.slane %v2503_v14, 9 }
 0x519   :  { %2471 = vrot.lane.b32.xlu1 %v2470_v12, %s3635_s10  ;;  %v2366_v42 = vrot.slane %v2356_v16, 1  ;;  %v2367_v59 = vrot.slane %v2356_v16, 2  ;;  %v2368_v7 = vrot.slane %v2356_v16, 3  ;;  %v2369_v28 = vrot.slane %v2356_v16, 4 }
 0x51a   :  { %v2370_v34 = vrot.slane %v2356_v16, 5  ;;  %v2371_v20 = vrot.slane %v2356_v16, 6  ;;  %v2372_v10 = vrot.slane %v2356_v16, 7  ;;  %v2397_v47 = vsub.f32 %v4974_v41, %v2356_v16 }
 0x51b   :  { %v2398_v18 = vsub.f32 %v4976_v51, %v2366_v42  ;;  %v2399_v62 = vsub.f32 %v4978_v29, %v2367_v59  ;;  %v2400_v8 = vsub.f32 %v4980_v55, %v2368_v7  ;;  %v2401_v1 = vsub.f32 %v4987_v6, %v2369_v28 }
 0x51c   :  { %v2402_v45 = vsub.f32 %v4991_v9, %v2370_v34  ;;  %v2403_v40 = vsub.f32 %v4997_v56, %v2371_v20  ;;  %v2404_v52 = vsub.f32 %v5001_v31, %v2372_v10  ;;  %v5263_v31 = vld [vmem:[#allocation8_spill] sm:$0xff] }
 0x51d   :  { %2491 = vrot.lane.b32.xlu1 %v2490_v33, %s3636_s11  ;;  %v2435_v27 = vrot.slane %v2398_v18, 7  ;;  %v2437_v24 = vrot.slane %v2399_v62, 6  ;;  %v2439_v29 = vrot.slane %v2400_v8, 5  ;;  %v2441_v30 = vrot.slane %v2401_v1, 4 }
 0x51e   :  { %v2443_v46 = vrot.slane %v2402_v45, 3  ;;  %v2445_v41 = vrot.slane %v2403_v40, 2  ;;  %v2447_v32 = vrot.slane %v2404_v52, 1 }
 0x51f   :  { %v2436_v51 = vsel %vm2326_vm10, %v2435_v27, %v2397_v47 }
 0x520   :  { %v2438_v55 = vsel %vm2328_vm11, %v2437_v24, %v2436_v51 }
 0x521   :  { %v2440_v19 = vsel %vm2330_vm12, %v2439_v29, %v2438_v55 }
 0x522   :  { %v2442_v6 = vsel %vm2332_vm13, %v2441_v30, %v2440_v19 }
 0x523   :  { %v2444_v9 = vsel %vm2334_vm14, %v2443_v46, %v2442_v6 }
 0x524   :  { %v2446_v48 = vsel %vm2336_vm15, %v2445_v41, %v2444_v9 }
 0x525   :  { %v2448_v56 = vsel %vm2338_vm0, %v2447_v32, %v2446_v48 }
 0x526   :  { %v2452_v11 = vadd.f32 %v2448_v56, %v5263_v31 }
 0x528   :  { %v2524_v3 = vrot.slane %v2452_v11, %v5053_v23  ;;  %2516 = vst.msk [vmem:[#allocation2 + $0x2] sm:$0x1] %vm2453_vm1, %v2452_v11  ;;  %v2542_v57 = vcombine.high %v2452_v11, %v2452_v11 }
 0x52a   :  { %v2531_v15 = vcombine.high %v2524_v3, %v2524_v3  ;;  %v3245_v2 = vrot.slane %v2524_v3, 9  ;;  %v2549_v13 = vrot.slane %v2542_v57, %v5053_v23 }
 0x52c   :  { %2532 = vrot.lane.b32.xlu0 %v2531_v15, %s3635_s10  ;;  %2527 = vrot.lane.b32.xlu1 %v3245_v2, %s3633_s5  ;;  %v3246_v39 = vrot.slane %v2531_v15, 9  ;;  %v2560_v0 = vcombine.high %v2549_v13, %v2549_v13  ;;  %v3247_v21 = vrot.slane %v2549_v13, 9 }
 0x52e   :  { %v3248_v38 = vrot.slane %v2560_v0, 9 }
 0x530   :  { %2550 = vrot.lane.b32.xlu0 %v2549_v13, %s3636_s11  ;;  %2504 = vrot.lane.b32.xlu1 %v2503_v14, %s3637_s12 }
 0x534   :  { %2478 = vrot.lane.b32.xlu0 %v3242_v54, %s3638_s13  ;;  %2538 = vrot.lane.b32.xlu1 %v3246_v39, %s3638_s13 }
 0x538   :  { %2498 = vrot.lane.b32.xlu0 %v3243_v63, %s3639_s14  ;;  %2556 = vrot.lane.b32.xlu1 %v3247_v21, %s3639_s14 }
 0x53c   :  { %2561 = vrot.lane.b32.xlu0 %v2560_v0, %s3637_s12  ;;  %2567 = vrot.lane.b32.xlu1 %v3248_v38, %s3632_s2 }
 0x540   :  { %2511 = vrot.lane.b32.xlu0 %v3244_v22, %s3632_s2 }
 0x547   :  { %v3072_v4 = vpop.permute.xlu1 %3071 }
 0x548   :  { %v3077_v26 = vadd.f32 %v3072_v4, %v5264_v60 }
 0x54a   :  { %v5095_v53 = vrot.slane %v3077_v26, %v5053_v23  ;;  %v3106_v35 = vcombine.high %v3077_v26, %v3077_v26 }
 0x54c   :  { %v3095_v50 = vcombine.high %v5095_v53, %v5095_v53  ;;  %3087 = vrot.lane.b32.xlu0 %v5095_v53, %s3632_s2  ;;  %v3113_v44 = vrot.slane %v3106_v35, %v5053_v23  ;;  %v3249_v52 = vrot.slane %v5095_v53, 9 }
 0x54e   :  { %3096 = vrot.lane.b32.xlu1 %v3095_v50, %s3633_s5  ;;  %v3250_v17 = vrot.slane %v3095_v50, 9  ;;  %v3251_v16 = vrot.slane %v3113_v44, 9  ;;  %v3124_v42 = vcombine.high %v3113_v44, %v3113_v44 }
 0x550   :  { %v3252_v59 = vrot.slane %v3124_v42, 9 }
 0x552   :  { %3114 = vrot.lane.b32.xlu1 %v3113_v44, %s3638_s13 }
 0x568   :  { %v3074_v61 = vpop.permute.xlu0 %3073 }
 0x569   :  { %v3078_v37 = vadd.f32 %v3074_v61, %v5265_v58 }
 0x56b   :  { %v5106_v25 = vrot.slane %v3078_v37, %v5053_v23  ;;  %v3162_v5 = vcombine.high %v3078_v37, %v3078_v37 }
 0x56d   :  { %v3151_v36 = vcombine.high %v5106_v25, %v5106_v25  ;;  %3143 = vrot.lane.b32.xlu0 %v5106_v25, %s3632_s2  ;;  %v3169_v49 = vrot.slane %v3162_v5, %v5053_v23  ;;  %v3253_v30 = vrot.slane %v5106_v25, 9  ;;  %s3640_s2 = smov [#allocation2]  }
 0x56e   :  { %s3197_s1 = sshll.u32 %s3640_s2, 4  ;;  %s3198_s1 = int_to_ptr.vmem [resolvable:$true] %s3197_s1 }
 0x56f   :  { %3152 = vrot.lane.b32.xlu1 %v3151_v36, %s3633_s5  ;;  %v3254_v12 = vrot.slane %v3151_v36, 9  ;;  %v3255_v43 = vrot.slane %v3169_v49, 9  ;;  %v3180_v33 = vcombine.high %v3169_v49, %v3169_v49  ;;  %s3609_s15 = scalar_lea.vmem %s3198_s1, 64  ;;  %p3614_p1 = scmp.lt.s32.totalorder %s3198_s1, %s3198_s1 }
 0x570   :  { %p3610_p0 = scmp.ne.s32.totalorder %s3198_s1, %s3609_s15  ;;  %p3615_p2 = scmp.lt.s32.totalorder %s3609_s15, %s3609_s15 }
 0x571   :  { %3102 = vrot.lane.b32.xlu0 %v3250_v17, %s3635_s10  ;;  %v3256_v23 = vrot.slane %v3180_v33, 9 }
 0x572   :  { %p3616_p3 = por %p3615_p2, %p3614_p1 }
 0x573   :  { %3170 = vrot.lane.b32.xlu1 %v3169_v49, %s3638_s13 }
 0x574   :  { %p3617_p4 = pnand %p3616_p3, %p3610_p0 }
 0x575   :  { %3158 = vrot.lane.b32.xlu0 %v3254_v12, %s3635_s10 }
 0x577   :  { %3176 = vrot.lane.b32.xlu1 %v3255_v43, %s3636_s11 }
 0x579   :  { %3120 = vrot.lane.b32.xlu0 %v3251_v16, %s3636_s11 }
 0x57b   :  { %3181 = vrot.lane.b32.xlu1 %v3180_v33, %s3639_s14 }
 0x57d   :  { %3125 = vrot.lane.b32.xlu0 %v3124_v42, %s3639_s14 }
 0x57f   :  { %3187 = vrot.lane.b32.xlu1 %v3256_v23, %s3637_s12 }
 0x581   :  { %3131 = vrot.lane.b32.xlu0 %v3252_v59, %s3637_s12 }
 0x587   :  { %v2466_v7 = vpop.permute.xlu1 %2465 }
 0x588   :  { %2469 = vst.msk [vmem:[#allocation2] sm:$0x1] %vm2468_vm2, %v2466_v7 }
 0x58b   :  { %v2472_v28 = vpop.permute.xlu1 %2471 }
 0x58c   :  { %2475 = vst.msk [vmem:[#allocation2] sm:$0x1] %vm2474_vm3, %v2472_v28 }
 0x58f   :  { %v2492_v34 = vpop.permute.xlu1 %2491 }
 0x59e   :  { %v2533_v20 = vpop.permute.xlu0 %2532  ;;  %v2528_v10 = vpop.permute.xlu1 %2527 }
 0x59f   :  { %2530 = vst.msk [vmem:[#allocation2 + $0x2] sm:$0x1] %vm2468_vm2, %v2528_v10 }
 0x5a0   :  { %2535 = vst.msk [vmem:[#allocation2 + $0x2] sm:$0x1] %vm2474_vm3, %v2533_v20 }
 0x5a2   :  { %v2551_v18 = vpop.permute.xlu0 %2550  ;;  %v2505_v62 = vpop.permute.xlu1 %2504 }
 0x5a6   :  { %v2479_v8 = vpop.permute.xlu0 %2478  ;;  %v2539_v1 = vpop.permute.xlu1 %2538 }
 0x5a7   :  { %2482 = vst.msk [vmem:[#allocation2] sm:$0x1] %vm2481_vm4, %v2479_v8  ;;  %2541 = vst.msk [vmem:[#allocation2 + $0x2] sm:$0x1] %vm2481_vm4, %v2539_v1 }
 0x5a8   :  { %2495 = vst.msk [vmem:[#allocation2] sm:$0x1] %vm2494_vm5, %v2492_v34  ;;  %2553 = vst.msk [vmem:[#allocation2 + $0x2] sm:$0x1] %vm2494_vm5, %v2551_v18 }
 0x5aa   :  { %v2499_v47 = vpop.permute.xlu0 %2498  ;;  %v2557_v45 = vpop.permute.xlu1 %2556 }
 0x5ab   :  { %2502 = vst.msk [vmem:[#allocation2] sm:$0x1] %vm2501_vm6, %v2499_v47  ;;  %2559 = vst.msk [vmem:[#allocation2 + $0x2] sm:$0x1] %vm2501_vm6, %v2557_v45 }
 0x5ac   :  { %2508 = vst.msk [vmem:[#allocation2] sm:$0x1] %vm2507_vm7, %v2505_v62 }
 0x5ae   :  { %v2562_v27 = vpop.permute.xlu0 %2561  ;;  %v2568_v24 = vpop.permute.xlu1 %2567 }
 0x5af   :  { %2564 = vst.msk [vmem:[#allocation2 + $0x2] sm:$0x1] %vm2507_vm7, %v2562_v27 }
 0x5b0   :  { %2570 = vst.msk [vmem:[#allocation2 + $0x2] sm:$0x1] %vm2514_vm8, %v2568_v24 }
 0x5b2   :  { %v2512_v40 = vpop.permute.xlu0 %2511 }
 0x5b3   :  { %2515 = vst.msk [vmem:[#allocation2] sm:$0x1] %vm2514_vm8, %v2512_v40 }
 0x5be   :  { %v3088_v51 = vpop.permute.xlu0 %3087 }
 0x5bf   :  { %3090 = vst.msk [vmem:[#allocation2 + $0x1] sm:$0x1] %vm2453_vm1, %v3088_v51 }
 0x5c0   :  { %3094 = vst.msk [vmem:[#allocation2 + $0x1] sm:$0x1] %vm2468_vm2, %v3249_v52  ;;  %v3097_v29 = vpop.permute.xlu1 %3096 }
 0x5c1   :  { %3099 = vst.msk [vmem:[#allocation2 + $0x1] sm:$0x1] %vm2474_vm3, %v3097_v29 }
 0x5c4   :  { %v3115_v55 = vpop.permute.xlu1 %3114 }
 0x5df   :  { %v3144_v19 = vpop.permute.xlu0 %3143 }
 0x5e0   :  { %3146 = vst.msk [vmem:[#allocation2 + $0x3] sm:$0x1] %vm2453_vm1, %v3144_v19 }
 0x5e1   :  { %3150 = vst.msk [vmem:[#allocation2 + $0x3] sm:$0x1] %vm2468_vm2, %v3253_v30  ;;  %v3153_v46 = vpop.permute.xlu1 %3152 }
 0x5e2   :  { %3155 = vst.msk [vmem:[#allocation2 + $0x3] sm:$0x1] %vm2474_vm3, %v3153_v46 }
 0x5e3   :  { %v3103_v6 = vpop.permute.xlu0 %3102 }
 0x5e4   :  { %3105 = vst.msk [vmem:[#allocation2 + $0x1] sm:$0x1] %vm2481_vm4, %v3103_v6 }
 0x5e5   :  { %3117 = vst.msk [vmem:[#allocation2 + $0x1] sm:$0x1] %vm2494_vm5, %v3115_v55  ;;  %v3171_v41 = vpop.permute.xlu1 %3170 }
 0x5e7   :  { %v3159_v9 = vpop.permute.xlu0 %3158 }
 0x5e8   :  { %3161 = vst.msk [vmem:[#allocation2 + $0x3] sm:$0x1] %vm2481_vm4, %v3159_v9 }
 0x5e9   :  { %3173 = vst.msk [vmem:[#allocation2 + $0x3] sm:$0x1] %vm2494_vm5, %v3171_v41  ;;  %v3177_v32 = vpop.permute.xlu1 %3176 }
 0x5ea   :  { %3179 = vst.msk [vmem:[#allocation2 + $0x3] sm:$0x1] %vm2501_vm6, %v3177_v32 }
 0x5eb   :  { %v3121_v48 = vpop.permute.xlu0 %3120 }
 0x5ec   :  { %3123 = vst.msk [vmem:[#allocation2 + $0x1] sm:$0x1] %vm2501_vm6, %v3121_v48 }
 0x5ed   :  { %v3182_v56 = vpop.permute.xlu1 %3181 }
 0x5ee   :  { %3184 = vst.msk [vmem:[#allocation2 + $0x3] sm:$0x1] %vm2507_vm7, %v3182_v56 }
 0x5ef   :  { %v3126_v31 = vpop.permute.xlu0 %3125 }
 0x5f0   :  { %3128 = vst.msk [vmem:[#allocation2 + $0x1] sm:$0x1] %vm2507_vm7, %v3126_v31 }
 0x5f1   :  { %v3188_v11 = vpop.permute.xlu1 %3187 }
 0x5f2   :  { %3190 = vst.msk [vmem:[#allocation2 + $0x3] sm:$0x1] %vm2514_vm8, %v3188_v11 }
 0x5f3   :  { %v3132_v3 = vpop.permute.xlu0 %3131 }
 0x5f4   :  { %3134 = vst.msk [vmem:[#allocation2 + $0x1] sm:$0x1] %vm2514_vm8, %v3132_v3 }
 0x5f5   :  { %3620 = shalt.err (!%p3617_p4)
}
 0x5f6   :  { %3200 = dma.vmem_to_hbm [thread:$0]  %s3198_s1, 64, %s5162_s4, [#allocation3]  }
 0x5f7   :  { %3629 = dma.done.wait [#allocation3], 64  }
 0x5f8   :  { %3630 = vsyncadd [#allocation3], 4294967232 }
 0x5f9   :  { %3208 = vsyncpa [#allocation3], 1 }

</bundles_post_ra>
